<compile_context>
chip_gen: v7x
topology: tpu7x:2x2x1
jax: 0.10.0
libtpu: 0.0.40
codegen_flags: <defaults>
</compile_context>

<pallas_src>
import math

import jax
import jax.numpy as jnp
import numpy as np
from jax.experimental import pallas as pl
from jax.experimental.pallas import tpu as pltpu

# ---- static problem configuration (small, consistent with the module) ----
B, T, H = 2, 16, 32          # batch, sequence length, hidden_size
BT = B * T                   # folded batch*time rows
SCALE_FACTOR = 4
R = H // SCALE_FACTOR        # red_size = 8 (hidden size inside encoder layers)
HEADS = 4                    # head_size
ATT = R                      # att_size defaults to hidden_size (=red_size) inside EncoderLayer
HD = HEADS * ATT             # 32
NUM_FRAMES = (8, 16)         # one EncoderLayer per entry; T must be divisible by each entry
L = len(NUM_FRAMES)
LN_EPS = 1e-6
BN_EPS = 1e-5

# ---- packed-parameter slab layout (static offsets) ----
# gmats: (H + R, H)         rows 0:H   cols 0:R -> reduce conv weight  (H, R)
#                           rows H:H+R cols 0:H -> increase conv weight (R, H)
GM_ROWS = H + R
# lmats: (L, LM_ROWS, HD)   per layer: wq | wk | wv | wo | w1 | w2 stacked along rows
WQ_BASE = 0
WK_BASE = R
WV_BASE = 2 * R
WO_BASE = 3 * R                      # wo stored as (HD, R) in cols 0:R
W1_BASE = 3 * R + HD
W2_BASE = W1_BASE + R
LM_ROWS = W2_BASE + R                # 72
# vecs: (VEC_ROWS, H)       rows 0:5  -> reduce  BN/bias params (R cols used)
#                           rows 5:10 -> increase BN/bias params (H cols used)
#                           rows 10+8l .. : ln1g ln1b ln2g ln2b ln3g ln3b b1 b2 for layer l
VEC_LAYER_BASE = 10
VEC_ROWS = VEC_LAYER_BASE + 8 * L    # 26


def _layernorm(x, g, b):
    mu = jnp.mean(x, axis=-1, keepdims=True)
    var = jnp.mean((x - mu) ** 2, axis=-1, keepdims=True)
    return (x - mu) * jax.lax.rsqrt(var + LN_EPS) * g + b


def encoder_kernel(x_ref, gmats_ref, lmats_ref, vecs_ref, out_ref):
    """Single grid step: processes all B*T rows at once."""
    x = x_ref[...]                                   # (BT, H)

    def vec(row, n):
        return vecs_ref[row, 0:n]

    # --- reduce_dim: Conv1d(k=1) == per-row matmul, then BatchNorm1d (eval) ---
    w_red = gmats_ref[0:H, 0:R]                      # (H, R)
    br = vec(0, R); gr = vec(1, R); er = vec(2, R); mr = vec(3, R); vr = vec(4, R)
    h = jnp.dot(x, w_red, preferred_element_type=jnp.float32) + br
    h = (h - mr) * (gr * jax.lax.rsqrt(vr + BN_EPS)) + er

    total = jnp.zeros((BT, R), jnp.float32)
    scale = ATT ** -0.5

    for l, F in enumerate(NUM_FRAMES):               # static unroll over encoder layers
        NG = BT // F                                 # total frame groups (batch folded into rows)
        base = VEC_LAYER_BASE + 8 * l
        ln1g, ln1b = vec(base + 0, R), vec(base + 1, R)
        ln2g, ln2b = vec(base + 2, R), vec(base + 3, R)
        ln3g, ln3b = vec(base + 4, R), vec(base + 5, R)
        b1, b2 = vec(base + 6, R), vec(base + 7, R)
        wq = lmats_ref[l, WQ_BASE:WQ_BASE + R, :]    # (R, HD)
        wk = lmats_ref[l, WK_BASE:WK_BASE + R, :]
        wv = lmats_ref[l, WV_BASE:WV_BASE + R, :]

        xl = h

        # ---- self-attention block (grouped multi-head attention, register-resident) ----
        y = _layernorm(xl, ln1g, ln1b)
        q = jnp.dot(y, wq, preferred_element_type=jnp.float32) * scale   # (BT, HD)
        k = jnp.dot(y, wk, preferred_element_type=jnp.float32)
        v = jnp.dot(y, wv, preferred_element_type=jnp.float32)

        att = jnp.zeros((BT, R), jnp.float32)
        for hd in range(HEADS):                      # static unroll; groups batched in one einsum
            cs = slice(hd * ATT, (hd + 1) * ATT)
            qh = q[:, cs].reshape(NG, F, ATT)
            kh = k[:, cs].reshape(NG, F, ATT)
            vh = v[:, cs].reshape(NG, F, ATT)
            s = jnp.einsum('gqd,gkd->gqk', qh, kh,
                           preferred_element_type=jnp.float32)           # (NG, F, F)
            p = jax.nn.softmax(s, axis=-1)
            ah = jnp.einsum('gqk,gkd->gqd', p, vh,
                            preferred_element_type=jnp.float32)          # (NG, F, ATT)
            # head's slice of the output projection (== concat(heads) @ wo)
            wo_h = lmats_ref[l, WO_BASE + hd * ATT:WO_BASE + (hd + 1) * ATT, 0:R]  # (ATT, R)
            att = att + jnp.dot(ah.reshape(BT, ATT), wo_h,
                                preferred_element_type=jnp.float32)
        xl = xl + att

        # ---- feed-forward block ----
        w1 = lmats_ref[l, W1_BASE:W1_BASE + R, 0:R]  # (R, R)
        w2 = lmats_ref[l, W2_BASE:W2_BASE + R, 0:R]  # (R, R)
        y = _layernorm(xl, ln2g, ln2b)
        y = jnp.maximum(jnp.dot(y, w1, preferred_element_type=jnp.float32) + b1, 0.0)
        y = jnp.dot(y, w2, preferred_element_type=jnp.float32) + b2
        xl = xl + y

        xl = _layernorm(xl, ln3g, ln3b)
        total = total + xl

    # --- increase_dim: Conv1d(k=1) + BatchNorm1d (eval) ---
    w_inc = gmats_ref[H:H + R, 0:H]                  # (R, H)
    bi = vec(5, H); gi = vec(6, H); ei = vec(7, H); mi = vec(8, H); vi = vec(9, H)
    o = jnp.dot(total, w_inc, preferred_element_type=jnp.float32) + bi
    o = (o - mi) * (gi * jax.lax.rsqrt(vi + BN_EPS)) + ei
    out_ref[...] = o.astype(out_ref.dtype)


@jax.jit
def encoder_forward(x, gmats, lmats, vecs):
    x2 = x.reshape(BT, H)                            # fold batch into the sublane axis
    out2 = pl.pallas_call(
        encoder_kernel,
        out_shape=jax.ShapeDtypeStruct((BT, H), jnp.float32),
        grid_spec=pltpu.PrefetchScalarGridSpec(
            num_scalar_prefetch=0,
            grid=(1,),                               # single step; whole problem fits in VMEM
            in_specs=[
                pl.BlockSpec((BT, H), lambda i: (0, 0)),
                pl.BlockSpec((GM_ROWS, H), lambda i: (0, 0)),
                pl.BlockSpec((L, LM_ROWS, HD), lambda i: (0, 0, 0)),
                pl.BlockSpec((VEC_ROWS, H), lambda i: (0, 0)),
            ],
            out_specs=pl.BlockSpec((BT, H), lambda i: (0, 0)),
        ),
        compiler_params=pltpu.CompilerParams(dimension_semantics=("arbitrary",)),
    )(x2, gmats, lmats, vecs)
    return out2.reshape(B, T, H)


# ---------------- parameter packing (few DMA streams instead of 27) ----------------
def pack_params(weights):
    (wr, br, gr, er, mr, vr, wi, bi, gi, ei, mi, vi,
     ln1g, ln1b, wq, wk, wv, wo, ln2g, ln2b, w1, b1, w2, b2, ln3g, ln3b) = weights

    gmats = jnp.zeros((GM_ROWS, H), jnp.float32)
    gmats = gmats.at[0:H, 0:R].set(wr)
    gmats = gmats.at[H:H + R, 0:H].set(wi)

    lmats = jnp.zeros((L, LM_ROWS, HD), jnp.float32)
    lmats = lmats.at[:, WQ_BASE:WQ_BASE + R, :].set(wq)
    lmats = lmats.at[:, WK_BASE:WK_BASE + R, :].set(wk)
    lmats = lmats.at[:, WV_BASE:WV_BASE + R, :].set(wv)
    lmats = lmats.at[:, WO_BASE:WO_BASE + HD, 0:R].set(wo)
    lmats = lmats.at[:, W1_BASE:W1_BASE + R, 0:R].set(w1)
    lmats = lmats.at[:, W2_BASE:W2_BASE + R, 0:R].set(w2)

    vecs = jnp.zeros((VEC_ROWS, H), jnp.float32)
    for i, a in enumerate([br, gr, er, mr, vr]):          # each (1, R)
        vecs = vecs.at[i, 0:R].set(a[0])
    for i, a in enumerate([bi, gi, ei, mi, vi]):          # each (1, H)
        vecs = vecs.at[5 + i, 0:H].set(a[0])
    per_layer = [ln1g, ln1b, ln2g, ln2b, ln3g, ln3b, b1, b2]   # each (L, R)
    for l in range(L):
        for i, a in enumerate(per_layer):
            vecs = vecs.at[VEC_LAYER_BASE + 8 * l + i, 0:R].set(a[l])
    return gmats, lmats, vecs


# ---------------- deterministic parameter construction ----------------
def xavier(key, shape, fan_in, fan_out):
    lim = math.sqrt(6.0 / (fan_in + fan_out))
    return jax.random.uniform(key, shape, jnp.float32, -lim, lim)


def make_params(key):
    ks = jax.random.split(key, 24)
    # reduce_dim: Conv1d(H->R, k=1) + BN(R)
    wr = xavier(ks[0], (H, R), H, R)
    br = jax.random.normal(ks[1], (1, R), jnp.float32) * 0.1
    gr = jax.random.uniform(ks[2], (1, R), jnp.float32, 0.5, 1.5)
    er = jax.random.normal(ks[3], (1, R), jnp.float32) * 0.1
    mr = jax.random.normal(ks[4], (1, R), jnp.float32) * 0.1
    vr = jax.random.uniform(ks[5], (1, R), jnp.float32, 0.5, 1.5)
    # increase_dim: Conv1d(R->H, k=1) + BN(H)
    wi = xavier(ks[6], (R, H), R, H)
    bi = jax.random.normal(ks[7], (1, H), jnp.float32) * 0.1
    gi = jax.random.uniform(ks[8], (1, H), jnp.float32, 0.5, 1.5)
    ei = jax.random.normal(ks[9], (1, H), jnp.float32) * 0.1
    mi = jax.random.normal(ks[10], (1, H), jnp.float32) * 0.1
    vi = jax.random.uniform(ks[11], (1, H), jnp.float32, 0.5, 1.5)
    # per-layer stacks (LayerNorms init like nn.LayerNorm defaults; linear biases zero)
    ln1g = jnp.ones((L, R), jnp.float32); ln1b = jnp.zeros((L, R), jnp.float32)
    ln2g = jnp.ones((L, R), jnp.float32); ln2b = jnp.zeros((L, R), jnp.float32)
    ln3g = jnp.ones((L, R), jnp.float32); ln3b = jnp.zeros((L, R), jnp.float32)
    wq = xavier(ks[12], (L, R, HD), R, HD)
    wk = xavier(ks[13], (L, R, HD), R, HD)
    wv = xavier(ks[14], (L, R, HD), R, HD)
    wo = xavier(ks[15], (L, HD, R), HD, R)
    w1 = xavier(ks[16], (L, R, R), R, R); b1 = jnp.zeros((L, R), jnp.float32)
    w2 = xavier(ks[17], (L, R, R), R, R); b2 = jnp.zeros((L, R), jnp.float32)
    return (wr, br, gr, er, mr, vr, wi, bi, gi, ei, mi, vi,
            ln1g, ln1b, wq, wk, wv, wo, ln2g, ln2b, w1, b1, w2, b2, ln3g, ln3b)


# ---------------- pure-JAX reference mirroring the PyTorch ops ----------------
def _layernorm_ref(x, g, b):
    mu = x.mean(-1, keepdims=True)
    var = ((x - mu) ** 2).mean(-1, keepdims=True)
    return (x - mu) / jnp.sqrt(var + LN_EPS) * g + b


def encoder_reference(x, weights):
    (wr, br, gr, er, mr, vr, wi, bi, gi, ei, mi, vi,
     ln1g, ln1b, wq, wk, wv, wo, ln2g, ln2b, w1, b1, w2, b2, ln3g, ln3b) = weights
    hi = 'highest'
    h = jnp.einsum('bth,hr->btr', x, wr, precision=hi) + br
    h = (h - mr) * (gr / jnp.sqrt(vr + BN_EPS)) + er
    total = jnp.zeros_like(h)
    scale = ATT ** -0.5
    for l, F in enumerate(NUM_FRAMES):
        G = T // F
        xl = h
        y = _layernorm_ref(xl, ln1g[l], ln1b[l])
        q = jnp.einsum('btr,rd->btd', y, wq[l], precision=hi).reshape(B, G, F, HEADS, ATT)
        k = jnp.einsum('btr,rd->btd', y, wk[l], precision=hi).reshape(B, G, F, HEADS, ATT)
        v = jnp.einsum('btr,rd->btd', y, wv[l], precision=hi).reshape(B, G, F, HEADS, ATT)
        q = jnp.swapaxes(q, 2, 3) * scale      # (B,G,HEADS,F,ATT)
        k = jnp.swapaxes(k, 2, 3)
        v = jnp.swapaxes(v, 2, 3)
        s = jnp.einsum('bghfd,bghkd->bghfk', q, k, precision=hi)
        p = jax.nn.softmax(s, axis=-1)
        a = jnp.einsum('bghfk,bghkd->bghfd', p, v, precision=hi)
        a = jnp.swapaxes(a, 2, 3).reshape(B, T, HEADS * ATT)
        y = jnp.einsum('btd,dr->btr', a, wo[l], precision=hi)
        xl = xl + y
        y = _layernorm_ref(xl, ln2g[l], ln2b[l])
        y = jnp.maximum(jnp.einsum('btr,rf->btf', y, w1[l], precision=hi) + b1[l], 0.0)
        y = jnp.einsum('btf,fr->btr', y, w2[l], precision=hi) + b2[l]
        xl = xl + y
        xl = _layernorm_ref(xl, ln3g[l], ln3b[l])
        total = total + xl
    o = jnp.einsum('btr,rh->bth', total, wi, precision=hi) + bi
    o = (o - mi) * (gi / jnp.sqrt(vi + BN_EPS)) + ei
    return o


if __name__ == "__main__":
    key = jax.random.PRNGKey(0)
    kx, kp = jax.random.split(key)
    x = jax.random.normal(kx, (B, T, H), jnp.float32)
    weights = make_params(kp)
    gmats, lmats, vecs = pack_params(weights)

    out = encoder_forward(x, gmats, lmats, vecs)
    out = jax.block_until_ready(out)

    ref = encoder_reference(x, weights)
    np.testing.assert_allclose(np.asarray(out), np.asarray(ref), rtol=1e-3, atol=1e-3)

    print("KERNEL_OK")
</pallas_src>

<mosaic_0001>
module attributes {stable_mosaic.version = 11 : i64} {
  func.func @encoder_kernel(%arg0: i32, %arg1: memref<32x32xf32, #tpu.memory_space<vmem>>, %arg2: memref<40x32xf32, #tpu.memory_space<vmem>>, %arg3: memref<2x72x32xf32, #tpu.memory_space<vmem>>, %arg4: memref<26x32xf32, #tpu.memory_space<vmem>>, %arg5: memref<32x32xf32, #tpu.memory_space<vmem>>) attributes {dimension_semantics = [#tpu.dimension_semantics<arbitrary>], iteration_bounds = array<i64: 1>, scalar_prefetch = 0 : i64, scratch_operands = 0 : i64, tpu.core_type = #tpu.core_type<tc>, window_params = [{pipeline_mode = #tpu.pipeline_mode<synchronous>, transform_indices = @transform_0, window_bounds = array<i64: 32, 32>}, {pipeline_mode = #tpu.pipeline_mode<synchronous>, transform_indices = @transform_1, window_bounds = array<i64: 40, 32>}, {pipeline_mode = #tpu.pipeline_mode<synchronous>, transform_indices = @transform_2, window_bounds = array<i64: 2, 72, 32>}, {pipeline_mode = #tpu.pipeline_mode<synchronous>, transform_indices = @transform_3, window_bounds = array<i64: 26, 32>}, {pipeline_mode = #tpu.pipeline_mode<synchronous>, transform_indices = @transform_4, window_bounds = array<i64: 32, 32>}]} {
    %c0 = arith.constant 0 : index
    %c0_0 = arith.constant 0 : index
    %0 = vector.load %arg1[%c0, %c0_0] : memref<32x32xf32, #tpu.memory_space<vmem>>, vector<32x32xf32>
    %c0_1 = arith.constant 0 : index
    %c0_2 = arith.constant 0 : index
    %1 = vector.load %arg2[%c0_1, %c0_2] : memref<40x32xf32, #tpu.memory_space<vmem>>, vector<32x8xf32>
    %c0_3 = arith.constant 0 : index
    %c0_4 = arith.constant 0 : index
    %2 = vector.load %arg4[%c0_3, %c0_4] : memref<26x32xf32, #tpu.memory_space<vmem>>, vector<1x8xf32>
    %3 = vector.shape_cast %2 : vector<1x8xf32> to vector<8xf32>
    %c1 = arith.constant 1 : index
    %c0_5 = arith.constant 0 : index
    %4 = vector.load %arg4[%c1, %c0_5] : memref<26x32xf32, #tpu.memory_space<vmem>>, vector<1x8xf32>
    %5 = vector.shape_cast %4 : vector<1x8xf32> to vector<8xf32>
    %c2 = arith.constant 2 : index
    %c0_6 = arith.constant 0 : index
    %6 = vector.load %arg4[%c2, %c0_6] : memref<26x32xf32, #tpu.memory_space<vmem>>, vector<1x8xf32>
    %7 = vector.shape_cast %6 : vector<1x8xf32> to vector<8xf32>
    %c3 = arith.constant 3 : index
    %c0_7 = arith.constant 0 : index
    %8 = vector.load %arg4[%c3, %c0_7] : memref<26x32xf32, #tpu.memory_space<vmem>>, vector<1x8xf32>
    %9 = vector.shape_cast %8 : vector<1x8xf32> to vector<8xf32>
    %c4 = arith.constant 4 : index
    %c0_8 = arith.constant 0 : index
    %10 = vector.load %arg4[%c4, %c0_8] : memref<26x32xf32, #tpu.memory_space<vmem>>, vector<1x8xf32>
    %11 = vector.shape_cast %10 : vector<1x8xf32> to vector<8xf32>
    %cst = arith.constant dense<0.000000e+00> : vector<32x8xf32>
    %12 = tpu.matmul %0, %1, %cst {dimension_numbers = #tpu.dot_dimension_numbers<[1], [0], [0], [1], [0, 0, 1, 1], [], []>} : vector<32x32xf32>, vector<32x8xf32>, vector<32x8xf32> -> vector<32x8xf32>
    %13 = vector.shape_cast %3 : vector<8xf32> to vector<1x8xf32>
    %14 = vector.broadcast %13 : vector<1x8xf32> to vector<32x8xf32>
    %15 = arith.addf %12, %14 : vector<32x8xf32>
    %16 = vector.shape_cast %9 : vector<8xf32> to vector<1x8xf32>
    %17 = vector.broadcast %16 : vector<1x8xf32> to vector<32x8xf32>
    %18 = arith.subf %15, %17 : vector<32x8xf32>
    %cst_9 = arith.constant 9.99999974E-6 : f32
    %19 = vector.broadcast %cst_9 : f32 to vector<8xf32>
    %20 = arith.addf %11, %19 : vector<8xf32>
    %21 = math.rsqrt %20 : vector<8xf32>
    %22 = arith.mulf %5, %21 : vector<8xf32>
    %23 = vector.shape_cast %22 : vector<8xf32> to vector<1x8xf32>
    %24 = vector.broadcast %23 : vector<1x8xf32> to vector<32x8xf32>
    %25 = arith.mulf %18, %24 : vector<32x8xf32>
    %26 = vector.shape_cast %7 : vector<8xf32> to vector<1x8xf32>
    %27 = vector.broadcast %26 : vector<1x8xf32> to vector<32x8xf32>
    %28 = arith.addf %25, %27 : vector<32x8xf32>
    %cst_10 = arith.constant 0.000000e+00 : f32
    %29 = vector.broadcast %cst_10 : f32 to vector<32x8xf32>
    %c10 = arith.constant 10 : index
    %c0_11 = arith.constant 0 : index
    %30 = vector.load %arg4[%c10, %c0_11] : memref<26x32xf32, #tpu.memory_space<vmem>>, vector<1x8xf32>
    %31 = vector.shape_cast %30 : vector<1x8xf32> to vector<8xf32>
    %c11 = arith.constant 11 : index
    %c0_12 = arith.constant 0 : index
    %32 = vector.load %arg4[%c11, %c0_12] : memref<26x32xf32, #tpu.memory_space<vmem>>, vector<1x8xf32>
    %33 = vector.shape_cast %32 : vector<1x8xf32> to vector<8xf32>
    %c12 = arith.constant 12 : index
    %c0_13 = arith.constant 0 : index
    %34 = vector.load %arg4[%c12, %c0_13] : memref<26x32xf32, #tpu.memory_space<vmem>>, vector<1x8xf32>
    %35 = vector.shape_cast %34 : vector<1x8xf32> to vector<8xf32>
    %c13 = arith.constant 13 : index
    %c0_14 = arith.constant 0 : index
    %36 = vector.load %arg4[%c13, %c0_14] : memref<26x32xf32, #tpu.memory_space<vmem>>, vector<1x8xf32>
    %37 = vector.shape_cast %36 : vector<1x8xf32> to vector<8xf32>
    %c14 = arith.constant 14 : index
    %c0_15 = arith.constant 0 : index
    %38 = vector.load %arg4[%c14, %c0_15] : memref<26x32xf32, #tpu.memory_space<vmem>>, vector<1x8xf32>
    %39 = vector.shape_cast %38 : vector<1x8xf32> to vector<8xf32>
    %c15 = arith.constant 15 : index
    %c0_16 = arith.constant 0 : index
    %40 = vector.load %arg4[%c15, %c0_16] : memref<26x32xf32, #tpu.memory_space<vmem>>, vector<1x8xf32>
    %41 = vector.shape_cast %40 : vector<1x8xf32> to vector<8xf32>
    %c16 = arith.constant 16 : index
    %c0_17 = arith.constant 0 : index
    %42 = vector.load %arg4[%c16, %c0_17] : memref<26x32xf32, #tpu.memory_space<vmem>>, vector<1x8xf32>
    %43 = vector.shape_cast %42 : vector<1x8xf32> to vector<8xf32>
    %c17 = arith.constant 17 : index
    %c0_18 = arith.constant 0 : index
    %44 = vector.load %arg4[%c17, %c0_18] : memref<26x32xf32, #tpu.memory_space<vmem>>, vector<1x8xf32>
    %45 = vector.shape_cast %44 : vector<1x8xf32> to vector<8xf32>
    %c0_19 = arith.constant 0 : index
    %c0_20 = arith.constant 0 : index
    %c0_21 = arith.constant 0 : index
    %46 = vector.load %arg3[%c0_19, %c0_20, %c0_21] : memref<2x72x32xf32, #tpu.memory_space<vmem>>, vector<1x8x32xf32>
    %47 = vector.shape_cast %46 : vector<1x8x32xf32> to vector<8x32xf32>
    %c0_22 = arith.constant 0 : index
    %c8 = arith.constant 8 : index
    %c0_23 = arith.constant 0 : index
    %48 = vector.load %arg3[%c0_22, %c8, %c0_23] : memref<2x72x32xf32, #tpu.memory_space<vmem>>, vector<1x8x32xf32>
    %49 = vector.shape_cast %48 : vector<1x8x32xf32> to vector<8x32xf32>
    %c0_24 = arith.constant 0 : index
    %c16_25 = arith.constant 16 : index
    %c0_26 = arith.constant 0 : index
    %50 = vector.load %arg3[%c0_24, %c16_25, %c0_26] : memref<2x72x32xf32, #tpu.memory_space<vmem>>, vector<1x8x32xf32>
    %51 = vector.shape_cast %50 : vector<1x8x32xf32> to vector<8x32xf32>
    %cst_27 = arith.constant dense<0.000000e+00> : vector<32xf32>
    %52 = vector.multi_reduction <add>, %28, %cst_27 [1] : vector<32x8xf32> to vector<32xf32>
    %53 = vector.shape_cast %52 : vector<32xf32> to vector<32x1xf32>
    %cst_28 = arith.constant 8.000000e+00 : f32
    %54 = vector.broadcast %cst_28 : f32 to vector<32x1xf32>
    %55 = arith.divf %53, %54 : vector<32x1xf32>
    %56 = vector.broadcast %55 : vector<32x1xf32> to vector<32x8xf32>
    %57 = arith.subf %28, %56 : vector<32x8xf32>
    %58 = arith.mulf %57, %57 : vector<32x8xf32>
    %cst_29 = arith.constant dense<0.000000e+00> : vector<32xf32>
    %59 = vector.multi_reduction <add>, %58, %cst_29 [1] : vector<32x8xf32> to vector<32xf32>
    %60 = vector.shape_cast %59 : vector<32xf32> to vector<32x1xf32>
    %cst_30 = arith.constant 8.000000e+00 : f32
    %61 = vector.broadcast %cst_30 : f32 to vector<32x1xf32>
    %62 = arith.divf %60, %61 : vector<32x1xf32>
    %63 = vector.broadcast %55 : vector<32x1xf32> to vector<32x8xf32>
    %64 = arith.subf %28, %63 : vector<32x8xf32>
    %cst_31 = arith.constant 9.99999997E-7 : f32
    %65 = vector.broadcast %cst_31 : f32 to vector<32x1xf32>
    %66 = arith.addf %62, %65 : vector<32x1xf32>
    %67 = math.rsqrt %66 : vector<32x1xf32>
    %68 = vector.broadcast %67 : vector<32x1xf32> to vector<32x8xf32>
    %69 = arith.mulf %64, %68 : vector<32x8xf32>
    %70 = vector.shape_cast %31 : vector<8xf32> to vector<1x8xf32>
    %71 = vector.broadcast %70 : vector<1x8xf32> to vector<32x8xf32>
    %72 = arith.mulf %69, %71 : vector<32x8xf32>
    %73 = vector.shape_cast %33 : vector<8xf32> to vector<1x8xf32>
    %74 = vector.broadcast %73 : vector<1x8xf32> to vector<32x8xf32>
    %75 = arith.addf %72, %74 : vector<32x8xf32>
    %cst_32 = arith.constant dense<0.000000e+00> : vector<32x32xf32>
    %76 = tpu.matmul %75, %47, %cst_32 {dimension_numbers = #tpu.dot_dimension_numbers<[1], [0], [0], [1], [0, 0, 1, 1], [], []>} : vector<32x8xf32>, vector<8x32xf32>, vector<32x32xf32> -> vector<32x32xf32>
    %cst_33 = arith.constant 0.353553385 : f32
    %77 = vector.broadcast %cst_33 : f32 to vector<32x32xf32>
    %78 = arith.mulf %76, %77 : vector<32x32xf32>
    %cst_34 = arith.constant dense<0.000000e+00> : vector<32x32xf32>
    %79 = tpu.matmul %75, %49, %cst_34 {dimension_numbers = #tpu.dot_dimension_numbers<[1], [0], [0], [1], [0, 0, 1, 1], [], []>} : vector<32x8xf32>, vector<8x32xf32>, vector<32x32xf32> -> vector<32x32xf32>
    %cst_35 = arith.constant dense<0.000000e+00> : vector<32x32xf32>
    %80 = tpu.matmul %75, %51, %cst_35 {dimension_numbers = #tpu.dot_dimension_numbers<[1], [0], [0], [1], [0, 0, 1, 1], [], []>} : vector<32x8xf32>, vector<8x32xf32>, vector<32x32xf32> -> vector<32x32xf32>
    %cst_36 = arith.constant 0.000000e+00 : f32
    %81 = vector.broadcast %cst_36 : f32 to vector<32x8xf32>
    %82 = vector.extract_strided_slice %78 {offsets = [0, 0], sizes = [32, 8], strides = [1, 1]} : vector<32x32xf32> to vector<32x8xf32>
    %83 = vector.shape_cast %82 : vector<32x8xf32> to vector<4x8x8xf32>
    %84 = vector.extract_strided_slice %79 {offsets = [0, 0], sizes = [32, 8], strides = [1, 1]} : vector<32x32xf32> to vector<32x8xf32>
    %85 = vector.shape_cast %84 : vector<32x8xf32> to vector<4x8x8xf32>
    %86 = vector.extract_strided_slice %80 {offsets = [0, 0], sizes = [32, 8], strides = [1, 1]} : vector<32x32xf32> to vector<32x8xf32>
    %87 = vector.shape_cast %86 : vector<32x8xf32> to vector<4x8x8xf32>
    "tpu.trace_start"() <{level = 10 : i32, message = "gqd,gkd->gqk"}> : () -> ()
    %cst_37 = arith.constant dense<0.000000e+00> : vector<4x8x8xf32>
    %88 = tpu.matmul %83, %85, %cst_37 {dimension_numbers = #tpu.dot_dimension_numbers<[2], [2], [1], [1], [0, 0, 0, 1, 1, 1], [0], [0]>} : vector<4x8x8xf32>, vector<4x8x8xf32>, vector<4x8x8xf32> -> vector<4x8x8xf32>
    "tpu.trace_stop"() : () -> ()
    %cst_38 = arith.constant dense<0xFF800000> : vector<4x8xf32>
    %89 = vector.multi_reduction <maximumf>, %88, %cst_38 [2] : vector<4x8x8xf32> to vector<4x8xf32>
    %cst_39 = arith.constant 0xFF800000 : f32
    %90 = vector.broadcast %cst_39 : f32 to vector<4x8xf32>
    %91 = arith.maximumf %90, %89 : vector<4x8xf32>
    %92 = vector.shape_cast %91 : vector<4x8xf32> to vector<4x8x1xf32>
    %93 = vector.broadcast %92 : vector<4x8x1xf32> to vector<4x8x8xf32>
    %94 = arith.subf %88, %93 : vector<4x8x8xf32>
    %95 = math.exp %94 : vector<4x8x8xf32>
    %cst_40 = arith.constant dense<0.000000e+00> : vector<4x8xf32>
    %96 = vector.multi_reduction <add>, %95, %cst_40 [2] : vector<4x8x8xf32> to vector<4x8xf32>
    %97 = vector.shape_cast %96 : vector<4x8xf32> to vector<4x8x1xf32>
    %98 = vector.broadcast %97 : vector<4x8x1xf32> to vector<4x8x8xf32>
    %99 = arith.divf %95, %98 : vector<4x8x8xf32>
    "tpu.trace_start"() <{level = 10 : i32, message = "gqk,gkd->gqd"}> : () -> ()
    %cst_41 = arith.constant dense<0.000000e+00> : vector<4x8x8xf32>
    %100 = tpu.matmul %99, %87, %cst_41 {dimension_numbers = #tpu.dot_dimension_numbers<[2], [1], [1], [2], [0, 0, 0, 1, 1, 2], [0], [0]>} : vector<4x8x8xf32>, vector<4x8x8xf32>, vector<4x8x8xf32> -> vector<4x8x8xf32>
    "tpu.trace_stop"() : () -> ()
    %c0_42 = arith.constant 0 : index
    %c24 = arith.constant 24 : index
    %c0_43 = arith.constant 0 : index
    %101 = vector.load %arg3[%c0_42, %c24, %c0_43] : memref<2x72x32xf32, #tpu.memory_space<vmem>>, vector<1x8x8xf32>
    %102 = vector.shape_cast %101 : vector<1x8x8xf32> to vector<8x8xf32>
    %103 = vector.shape_cast %100 : vector<4x8x8xf32> to vector<32x8xf32>
    %cst_44 = arith.constant dense<0.000000e+00> : vector<32x8xf32>
    %104 = tpu.matmul %103, %102, %cst_44 {dimension_numbers = #tpu.dot_dimension_numbers<[1], [0], [0], [1], [0, 0, 1, 1], [], []>} : vector<32x8xf32>, vector<8x8xf32>, vector<32x8xf32> -> vector<32x8xf32>
    %105 = arith.addf %81, %104 : vector<32x8xf32>
    %106 = vector.extract_strided_slice %78 {offsets = [0, 8], sizes = [32, 8], strides = [1, 1]} : vector<32x32xf32> to vector<32x8xf32>
    %107 = vector.shape_cast %106 : vector<32x8xf32> to vector<4x8x8xf32>
    %108 = vector.extract_strided_slice %79 {offsets = [0, 8], sizes = [32, 8], strides = [1, 1]} : vector<32x32xf32> to vector<32x8xf32>
    %109 = vector.shape_cast %108 : vector<32x8xf32> to vector<4x8x8xf32>
    %110 = vector.extract_strided_slice %80 {offsets = [0, 8], sizes = [32, 8], strides = [1, 1]} : vector<32x32xf32> to vector<32x8xf32>
    %111 = vector.shape_cast %110 : vector<32x8xf32> to vector<4x8x8xf32>
    "tpu.trace_start"() <{level = 10 : i32, message = "gqd,gkd->gqk"}> : () -> ()
    %cst_45 = arith.constant dense<0.000000e+00> : vector<4x8x8xf32>
    %112 = tpu.matmul %107, %109, %cst_45 {dimension_numbers = #tpu.dot_dimension_numbers<[2], [2], [1], [1], [0, 0, 0, 1, 1, 1], [0], [0]>} : vector<4x8x8xf32>, vector<4x8x8xf32>, vector<4x8x8xf32> -> vector<4x8x8xf32>
    "tpu.trace_stop"() : () -> ()
    %cst_46 = arith.constant dense<0xFF800000> : vector<4x8xf32>
    %113 = vector.multi_reduction <maximumf>, %112, %cst_46 [2] : vector<4x8x8xf32> to vector<4x8xf32>
    %cst_47 = arith.constant 0xFF800000 : f32
    %114 = vector.broadcast %cst_47 : f32 to vector<4x8xf32>
    %115 = arith.maximumf %114, %113 : vector<4x8xf32>
    %116 = vector.shape_cast %115 : vector<4x8xf32> to vector<4x8x1xf32>
    %117 = vector.broadcast %116 : vector<4x8x1xf32> to vector<4x8x8xf32>
    %118 = arith.subf %112, %117 : vector<4x8x8xf32>
    %119 = math.exp %118 : vector<4x8x8xf32>
    %cst_48 = arith.constant dense<0.000000e+00> : vector<4x8xf32>
    %120 = vector.multi_reduction <add>, %119, %cst_48 [2] : vector<4x8x8xf32> to vector<4x8xf32>
    %121 = vector.shape_cast %120 : vector<4x8xf32> to vector<4x8x1xf32>
    %122 = vector.broadcast %121 : vector<4x8x1xf32> to vector<4x8x8xf32>
    %123 = arith.divf %119, %122 : vector<4x8x8xf32>
    "tpu.trace_start"() <{level = 10 : i32, message = "gqk,gkd->gqd"}> : () -> ()
    %cst_49 = arith.constant dense<0.000000e+00> : vector<4x8x8xf32>
    %124 = tpu.matmul %123, %111, %cst_49 {dimension_numbers = #tpu.dot_dimension_numbers<[2], [1], [1], [2], [0, 0, 0, 1, 1, 2], [0], [0]>} : vector<4x8x8xf32>, vector<4x8x8xf32>, vector<4x8x8xf32> -> vector<4x8x8xf32>
    "tpu.trace_stop"() : () -> ()
    %c0_50 = arith.constant 0 : index
    %c32 = arith.constant 32 : index
    %c0_51 = arith.constant 0 : index
    %125 = vector.load %arg3[%c0_50, %c32, %c0_51] : memref<2x72x32xf32, #tpu.memory_space<vmem>>, vector<1x8x8xf32>
    %126 = vector.shape_cast %125 : vector<1x8x8xf32> to vector<8x8xf32>
    %127 = vector.shape_cast %124 : vector<4x8x8xf32> to vector<32x8xf32>
    %cst_52 = arith.constant dense<0.000000e+00> : vector<32x8xf32>
    %128 = tpu.matmul %127, %126, %cst_52 {dimension_numbers = #tpu.dot_dimension_numbers<[1], [0], [0], [1], [0, 0, 1, 1], [], []>} : vector<32x8xf32>, vector<8x8xf32>, vector<32x8xf32> -> vector<32x8xf32>
    %129 = arith.addf %105, %128 : vector<32x8xf32>
    %130 = vector.extract_strided_slice %78 {offsets = [0, 16], sizes = [32, 8], strides = [1, 1]} : vector<32x32xf32> to vector<32x8xf32>
    %131 = vector.shape_cast %130 : vector<32x8xf32> to vector<4x8x8xf32>
    %132 = vector.extract_strided_slice %79 {offsets = [0, 16], sizes = [32, 8], strides = [1, 1]} : vector<32x32xf32> to vector<32x8xf32>
    %133 = vector.shape_cast %132 : vector<32x8xf32> to vector<4x8x8xf32>
    %134 = vector.extract_strided_slice %80 {offsets = [0, 16], sizes = [32, 8], strides = [1, 1]} : vector<32x32xf32> to vector<32x8xf32>
    %135 = vector.shape_cast %134 : vector<32x8xf32> to vector<4x8x8xf32>
    "tpu.trace_start"() <{level = 10 : i32, message = "gqd,gkd->gqk"}> : () -> ()
    %cst_53 = arith.constant dense<0.000000e+00> : vector<4x8x8xf32>
    %136 = tpu.matmul %131, %133, %cst_53 {dimension_numbers = #tpu.dot_dimension_numbers<[2], [2], [1], [1], [0, 0, 0, 1, 1, 1], [0], [0]>} : vector<4x8x8xf32>, vector<4x8x8xf32>, vector<4x8x8xf32> -> vector<4x8x8xf32>
    "tpu.trace_stop"() : () -> ()
    %cst_54 = arith.constant dense<0xFF800000> : vector<4x8xf32>
    %137 = vector.multi_reduction <maximumf>, %136, %cst_54 [2] : vector<4x8x8xf32> to vector<4x8xf32>
    %cst_55 = arith.constant 0xFF800000 : f32
    %138 = vector.broadcast %cst_55 : f32 to vector<4x8xf32>
    %139 = arith.maximumf %138, %137 : vector<4x8xf32>
    %140 = vector.shape_cast %139 : vector<4x8xf32> to vector<4x8x1xf32>
    %141 = vector.broadcast %140 : vector<4x8x1xf32> to vector<4x8x8xf32>
    %142 = arith.subf %136, %141 : vector<4x8x8xf32>
    %143 = math.exp %142 : vector<4x8x8xf32>
    %cst_56 = arith.constant dense<0.000000e+00> : vector<4x8xf32>
    %144 = vector.multi_reduction <add>, %143, %cst_56 [2] : vector<4x8x8xf32> to vector<4x8xf32>
    %145 = vector.shape_cast %144 : vector<4x8xf32> to vector<4x8x1xf32>
    %146 = vector.broadcast %145 : vector<4x8x1xf32> to vector<4x8x8xf32>
    %147 = arith.divf %143, %146 : vector<4x8x8xf32>
    "tpu.trace_start"() <{level = 10 : i32, message = "gqk,gkd->gqd"}> : () -> ()
    %cst_57 = arith.constant dense<0.000000e+00> : vector<4x8x8xf32>
    %148 = tpu.matmul %147, %135, %cst_57 {dimension_numbers = #tpu.dot_dimension_numbers<[2], [1], [1], [2], [0, 0, 0, 1, 1, 2], [0], [0]>} : vector<4x8x8xf32>, vector<4x8x8xf32>, vector<4x8x8xf32> -> vector<4x8x8xf32>
    "tpu.trace_stop"() : () -> ()
    %c0_58 = arith.constant 0 : index
    %c40 = arith.constant 40 : index
    %c0_59 = arith.constant 0 : index
    %149 = vector.load %arg3[%c0_58, %c40, %c0_59] : memref<2x72x32xf32, #tpu.memory_space<vmem>>, vector<1x8x8xf32>
    %150 = vector.shape_cast %149 : vector<1x8x8xf32> to vector<8x8xf32>
    %151 = vector.shape_cast %148 : vector<4x8x8xf32> to vector<32x8xf32>
    %cst_60 = arith.constant dense<0.000000e+00> : vector<32x8xf32>
    %152 = tpu.matmul %151, %150, %cst_60 {dimension_numbers = #tpu.dot_dimension_numbers<[1], [0], [0], [1], [0, 0, 1, 1], [], []>} : vector<32x8xf32>, vector<8x8xf32>, vector<32x8xf32> -> vector<32x8xf32>
    %153 = arith.addf %129, %152 : vector<32x8xf32>
    %154 = vector.extract_strided_slice %78 {offsets = [0, 24], sizes = [32, 8], strides = [1, 1]} : vector<32x32xf32> to vector<32x8xf32>
    %155 = vector.shape_cast %154 : vector<32x8xf32> to vector<4x8x8xf32>
    %156 = vector.extract_strided_slice %79 {offsets = [0, 24], sizes = [32, 8], strides = [1, 1]} : vector<32x32xf32> to vector<32x8xf32>
    %157 = vector.shape_cast %156 : vector<32x8xf32> to vector<4x8x8xf32>
    %158 = vector.extract_strided_slice %80 {offsets = [0, 24], sizes = [32, 8], strides = [1, 1]} : vector<32x32xf32> to vector<32x8xf32>
    %159 = vector.shape_cast %158 : vector<32x8xf32> to vector<4x8x8xf32>
    "tpu.trace_start"() <{level = 10 : i32, message = "gqd,gkd->gqk"}> : () -> ()
    %cst_61 = arith.constant dense<0.000000e+00> : vector<4x8x8xf32>
    %160 = tpu.matmul %155, %157, %cst_61 {dimension_numbers = #tpu.dot_dimension_numbers<[2], [2], [1], [1], [0, 0, 0, 1, 1, 1], [0], [0]>} : vector<4x8x8xf32>, vector<4x8x8xf32>, vector<4x8x8xf32> -> vector<4x8x8xf32>
    "tpu.trace_stop"() : () -> ()
    %cst_62 = arith.constant dense<0xFF800000> : vector<4x8xf32>
    %161 = vector.multi_reduction <maximumf>, %160, %cst_62 [2] : vector<4x8x8xf32> to vector<4x8xf32>
    %cst_63 = arith.constant 0xFF800000 : f32
    %162 = vector.broadcast %cst_63 : f32 to vector<4x8xf32>
    %163 = arith.maximumf %162, %161 : vector<4x8xf32>
    %164 = vector.shape_cast %163 : vector<4x8xf32> to vector<4x8x1xf32>
    %165 = vector.broadcast %164 : vector<4x8x1xf32> to vector<4x8x8xf32>
    %166 = arith.subf %160, %165 : vector<4x8x8xf32>
    %167 = math.exp %166 : vector<4x8x8xf32>
    %cst_64 = arith.constant dense<0.000000e+00> : vector<4x8xf32>
    %168 = vector.multi_reduction <add>, %167, %cst_64 [2] : vector<4x8x8xf32> to vector<4x8xf32>
    %169 = vector.shape_cast %168 : vector<4x8xf32> to vector<4x8x1xf32>
    %170 = vector.broadcast %169 : vector<4x8x1xf32> to vector<4x8x8xf32>
    %171 = arith.divf %167, %170 : vector<4x8x8xf32>
    "tpu.trace_start"() <{level = 10 : i32, message = "gqk,gkd->gqd"}> : () -> ()
    %cst_65 = arith.constant dense<0.000000e+00> : vector<4x8x8xf32>
    %172 = tpu.matmul %171, %159, %cst_65 {dimension_numbers = #tpu.dot_dimension_numbers<[2], [1], [1], [2], [0, 0, 0, 1, 1, 2], [0], [0]>} : vector<4x8x8xf32>, vector<4x8x8xf32>, vector<4x8x8xf32> -> vector<4x8x8xf32>
    "tpu.trace_stop"() : () -> ()
    %c0_66 = arith.constant 0 : index
    %c48 = arith.constant 48 : index
    %c0_67 = arith.constant 0 : index
    %173 = vector.load %arg3[%c0_66, %c48, %c0_67] : memref<2x72x32xf32, #tpu.memory_space<vmem>>, vector<1x8x8xf32>
    %174 = vector.shape_cast %173 : vector<1x8x8xf32> to vector<8x8xf32>
    %175 = vector.shape_cast %172 : vector<4x8x8xf32> to vector<32x8xf32>
    %cst_68 = arith.constant dense<0.000000e+00> : vector<32x8xf32>
    %176 = tpu.matmul %175, %174, %cst_68 {dimension_numbers = #tpu.dot_dimension_numbers<[1], [0], [0], [1], [0, 0, 1, 1], [], []>} : vector<32x8xf32>, vector<8x8xf32>, vector<32x8xf32> -> vector<32x8xf32>
    %177 = arith.addf %153, %176 : vector<32x8xf32>
    %178 = arith.addf %28, %177 : vector<32x8xf32>
    %c0_69 = arith.constant 0 : index
    %c56 = arith.constant 56 : index
    %c0_70 = arith.constant 0 : index
    %179 = vector.load %arg3[%c0_69, %c56, %c0_70] : memref<2x72x32xf32, #tpu.memory_space<vmem>>, vector<1x8x8xf32>
    %180 = vector.shape_cast %179 : vector<1x8x8xf32> to vector<8x8xf32>
    %c0_71 = arith.constant 0 : index
    %c64 = arith.constant 64 : index
    %c0_72 = arith.constant 0 : index
    %181 = vector.load %arg3[%c0_71, %c64, %c0_72] : memref<2x72x32xf32, #tpu.memory_space<vmem>>, vector<1x8x8xf32>
    %182 = vector.shape_cast %181 : vector<1x8x8xf32> to vector<8x8xf32>
    %cst_73 = arith.constant dense<0.000000e+00> : vector<32xf32>
    %183 = vector.multi_reduction <add>, %178, %cst_73 [1] : vector<32x8xf32> to vector<32xf32>
    %184 = vector.shape_cast %183 : vector<32xf32> to vector<32x1xf32>
    %cst_74 = arith.constant 8.000000e+00 : f32
    %185 = vector.broadcast %cst_74 : f32 to vector<32x1xf32>
    %186 = arith.divf %184, %185 : vector<32x1xf32>
    %187 = vector.broadcast %186 : vector<32x1xf32> to vector<32x8xf32>
    %188 = arith.subf %178, %187 : vector<32x8xf32>
    %189 = arith.mulf %188, %188 : vector<32x8xf32>
    %cst_75 = arith.constant dense<0.000000e+00> : vector<32xf32>
    %190 = vector.multi_reduction <add>, %189, %cst_75 [1] : vector<32x8xf32> to vector<32xf32>
    %191 = vector.shape_cast %190 : vector<32xf32> to vector<32x1xf32>
    %cst_76 = arith.constant 8.000000e+00 : f32
    %192 = vector.broadcast %cst_76 : f32 to vector<32x1xf32>
    %193 = arith.divf %191, %192 : vector<32x1xf32>
    %194 = vector.broadcast %186 : vector<32x1xf32> to vector<32x8xf32>
    %195 = arith.subf %178, %194 : vector<32x8xf32>
    %cst_77 = arith.constant 9.99999997E-7 : f32
    %196 = vector.broadcast %cst_77 : f32 to vector<32x1xf32>
    %197 = arith.addf %193, %196 : vector<32x1xf32>
    %198 = math.rsqrt %197 : vector<32x1xf32>
    %199 = vector.broadcast %198 : vector<32x1xf32> to vector<32x8xf32>
    %200 = arith.mulf %195, %199 : vector<32x8xf32>
    %201 = vector.shape_cast %35 : vector<8xf32> to vector<1x8xf32>
    %202 = vector.broadcast %201 : vector<1x8xf32> to vector<32x8xf32>
    %203 = arith.mulf %200, %202 : vector<32x8xf32>
    %204 = vector.shape_cast %37 : vector<8xf32> to vector<1x8xf32>
    %205 = vector.broadcast %204 : vector<1x8xf32> to vector<32x8xf32>
    %206 = arith.addf %203, %205 : vector<32x8xf32>
    %cst_78 = arith.constant dense<0.000000e+00> : vector<32x8xf32>
    %207 = tpu.matmul %206, %180, %cst_78 {dimension_numbers = #tpu.dot_dimension_numbers<[1], [0], [0], [1], [0, 0, 1, 1], [], []>} : vector<32x8xf32>, vector<8x8xf32>, vector<32x8xf32> -> vector<32x8xf32>
    %208 = vector.shape_cast %43 : vector<8xf32> to vector<1x8xf32>
    %209 = vector.broadcast %208 : vector<1x8xf32> to vector<32x8xf32>
    %210 = arith.addf %207, %209 : vector<32x8xf32>
    %cst_79 = arith.constant 0.000000e+00 : f32
    %211 = vector.broadcast %cst_79 : f32 to vector<32x8xf32>
    %212 = arith.maximumf %210, %211 : vector<32x8xf32>
    %cst_80 = arith.constant dense<0.000000e+00> : vector<32x8xf32>
    %213 = tpu.matmul %212, %182, %cst_80 {dimension_numbers = #tpu.dot_dimension_numbers<[1], [0], [0], [1], [0, 0, 1, 1], [], []>} : vector<32x8xf32>, vector<8x8xf32>, vector<32x8xf32> -> vector<32x8xf32>
    %214 = vector.shape_cast %45 : vector<8xf32> to vector<1x8xf32>
    %215 = vector.broadcast %214 : vector<1x8xf32> to vector<32x8xf32>
    %216 = arith.addf %213, %215 : vector<32x8xf32>
    %217 = arith.addf %178, %216 : vector<32x8xf32>
    %cst_81 = arith.constant dense<0.000000e+00> : vector<32xf32>
    %218 = vector.multi_reduction <add>, %217, %cst_81 [1] : vector<32x8xf32> to vector<32xf32>
    %219 = vector.shape_cast %218 : vector<32xf32> to vector<32x1xf32>
    %cst_82 = arith.constant 8.000000e+00 : f32
    %220 = vector.broadcast %cst_82 : f32 to vector<32x1xf32>
    %221 = arith.divf %219, %220 : vector<32x1xf32>
    %222 = vector.broadcast %221 : vector<32x1xf32> to vector<32x8xf32>
    %223 = arith.subf %217, %222 : vector<32x8xf32>
    %224 = arith.mulf %223, %223 : vector<32x8xf32>
    %cst_83 = arith.constant dense<0.000000e+00> : vector<32xf32>
    %225 = vector.multi_reduction <add>, %224, %cst_83 [1] : vector<32x8xf32> to vector<32xf32>
    %226 = vector.shape_cast %225 : vector<32xf32> to vector<32x1xf32>
    %cst_84 = arith.constant 8.000000e+00 : f32
    %227 = vector.broadcast %cst_84 : f32 to vector<32x1xf32>
    %228 = arith.divf %226, %227 : vector<32x1xf32>
    %229 = vector.broadcast %221 : vector<32x1xf32> to vector<32x8xf32>
    %230 = arith.subf %217, %229 : vector<32x8xf32>
    %cst_85 = arith.constant 9.99999997E-7 : f32
    %231 = vector.broadcast %cst_85 : f32 to vector<32x1xf32>
    %232 = arith.addf %228, %231 : vector<32x1xf32>
    %233 = math.rsqrt %232 : vector<32x1xf32>
    %234 = vector.broadcast %233 : vector<32x1xf32> to vector<32x8xf32>
    %235 = arith.mulf %230, %234 : vector<32x8xf32>
    %236 = vector.shape_cast %39 : vector<8xf32> to vector<1x8xf32>
    %237 = vector.broadcast %236 : vector<1x8xf32> to vector<32x8xf32>
    %238 = arith.mulf %235, %237 : vector<32x8xf32>
    %239 = vector.shape_cast %41 : vector<8xf32> to vector<1x8xf32>
    %240 = vector.broadcast %239 : vector<1x8xf32> to vector<32x8xf32>
    %241 = arith.addf %238, %240 : vector<32x8xf32>
    %242 = arith.addf %29, %241 : vector<32x8xf32>
    %c18 = arith.constant 18 : index
    %c0_86 = arith.constant 0 : index
    %243 = vector.load %arg4[%c18, %c0_86] : memref<26x32xf32, #tpu.memory_space<vmem>>, vector<1x8xf32>
    %244 = vector.shape_cast %243 : vector<1x8xf32> to vector<8xf32>
    %c19 = arith.constant 19 : index
    %c0_87 = arith.constant 0 : index
    %245 = vector.load %arg4[%c19, %c0_87] : memref<26x32xf32, #tpu.memory_space<vmem>>, vector<1x8xf32>
    %246 = vector.shape_cast %245 : vector<1x8xf32> to vector<8xf32>
    %c20 = arith.constant 20 : index
    %c0_88 = arith.constant 0 : index
    %247 = vector.load %arg4[%c20, %c0_88] : memref<26x32xf32, #tpu.memory_space<vmem>>, vector<1x8xf32>
    %248 = vector.shape_cast %247 : vector<1x8xf32> to vector<8xf32>
    %c21 = arith.constant 21 : index
    %c0_89 = arith.constant 0 : index
    %249 = vector.load %arg4[%c21, %c0_89] : memref<26x32xf32, #tpu.memory_space<vmem>>, vector<1x8xf32>
    %250 = vector.shape_cast %249 : vector<1x8xf32> to vector<8xf32>
    %c22 = arith.constant 22 : index
    %c0_90 = arith.constant 0 : index
    %251 = vector.load %arg4[%c22, %c0_90] : memref<26x32xf32, #tpu.memory_space<vmem>>, vector<1x8xf32>
    %252 = vector.shape_cast %251 : vector<1x8xf32> to vector<8xf32>
    %c23 = arith.constant 23 : index
    %c0_91 = arith.constant 0 : index
    %253 = vector.load %arg4[%c23, %c0_91] : memref<26x32xf32, #tpu.memory_space<vmem>>, vector<1x8xf32>
    %254 = vector.shape_cast %253 : vector<1x8xf32> to vector<8xf32>
    %c24_92 = arith.constant 24 : index
    %c0_93 = arith.constant 0 : index
    %255 = vector.load %arg4[%c24_92, %c0_93] : memref<26x32xf32, #tpu.memory_space<vmem>>, vector<1x8xf32>
    %256 = vector.shape_cast %255 : vector<1x8xf32> to vector<8xf32>
    %c25 = arith.constant 25 : index
    %c0_94 = arith.constant 0 : index
    %257 = vector.load %arg4[%c25, %c0_94] : memref<26x32xf32, #tpu.memory_space<vmem>>, vector<1x8xf32>
    %258 = vector.shape_cast %257 : vector<1x8xf32> to vector<8xf32>
    %c1_95 = arith.constant 1 : index
    %c0_96 = arith.constant 0 : index
    %c0_97 = arith.constant 0 : index
    %259 = vector.load %arg3[%c1_95, %c0_96, %c0_97] : memref<2x72x32xf32, #tpu.memory_space<vmem>>, vector<1x8x32xf32>
    %260 = vector.shape_cast %259 : vector<1x8x32xf32> to vector<8x32xf32>
    %c1_98 = arith.constant 1 : index
    %c8_99 = arith.constant 8 : index
    %c0_100 = arith.constant 0 : index
    %261 = vector.load %arg3[%c1_98, %c8_99, %c0_100] : memref<2x72x32xf32, #tpu.memory_space<vmem>>, vector<1x8x32xf32>
    %262 = vector.shape_cast %261 : vector<1x8x32xf32> to vector<8x32xf32>
    %c1_101 = arith.constant 1 : index
    %c16_102 = arith.constant 16 : index
    %c0_103 = arith.constant 0 : index
    %263 = vector.load %arg3[%c1_101, %c16_102, %c0_103] : memref<2x72x32xf32, #tpu.memory_space<vmem>>, vector<1x8x32xf32>
    %264 = vector.shape_cast %263 : vector<1x8x32xf32> to vector<8x32xf32>
    %cst_104 = arith.constant dense<0.000000e+00> : vector<32xf32>
    %265 = vector.multi_reduction <add>, %28, %cst_104 [1] : vector<32x8xf32> to vector<32xf32>
    %266 = vector.shape_cast %265 : vector<32xf32> to vector<32x1xf32>
    %cst_105 = arith.constant 8.000000e+00 : f32
    %267 = vector.broadcast %cst_105 : f32 to vector<32x1xf32>
    %268 = arith.divf %266, %267 : vector<32x1xf32>
    %269 = vector.broadcast %268 : vector<32x1xf32> to vector<32x8xf32>
    %270 = arith.subf %28, %269 : vector<32x8xf32>
    %271 = arith.mulf %270, %270 : vector<32x8xf32>
    %cst_106 = arith.constant dense<0.000000e+00> : vector<32xf32>
    %272 = vector.multi_reduction <add>, %271, %cst_106 [1] : vector<32x8xf32> to vector<32xf32>
    %273 = vector.shape_cast %272 : vector<32xf32> to vector<32x1xf32>
    %cst_107 = arith.constant 8.000000e+00 : f32
    %274 = vector.broadcast %cst_107 : f32 to vector<32x1xf32>
    %275 = arith.divf %273, %274 : vector<32x1xf32>
    %276 = vector.broadcast %268 : vector<32x1xf32> to vector<32x8xf32>
    %277 = arith.subf %28, %276 : vector<32x8xf32>
    %cst_108 = arith.constant 9.99999997E-7 : f32
    %278 = vector.broadcast %cst_108 : f32 to vector<32x1xf32>
    %279 = arith.addf %275, %278 : vector<32x1xf32>
    %280 = math.rsqrt %279 : vector<32x1xf32>
    %281 = vector.broadcast %280 : vector<32x1xf32> to vector<32x8xf32>
    %282 = arith.mulf %277, %281 : vector<32x8xf32>
    %283 = vector.shape_cast %244 : vector<8xf32> to vector<1x8xf32>
    %284 = vector.broadcast %283 : vector<1x8xf32> to vector<32x8xf32>
    %285 = arith.mulf %282, %284 : vector<32x8xf32>
    %286 = vector.shape_cast %246 : vector<8xf32> to vector<1x8xf32>
    %287 = vector.broadcast %286 : vector<1x8xf32> to vector<32x8xf32>
    %288 = arith.addf %285, %287 : vector<32x8xf32>
    %cst_109 = arith.constant dense<0.000000e+00> : vector<32x32xf32>
    %289 = tpu.matmul %288, %260, %cst_109 {dimension_numbers = #tpu.dot_dimension_numbers<[1], [0], [0], [1], [0, 0, 1, 1], [], []>} : vector<32x8xf32>, vector<8x32xf32>, vector<32x32xf32> -> vector<32x32xf32>
    %cst_110 = arith.constant 0.353553385 : f32
    %290 = vector.broadcast %cst_110 : f32 to vector<32x32xf32>
    %291 = arith.mulf %289, %290 : vector<32x32xf32>
    %cst_111 = arith.constant dense<0.000000e+00> : vector<32x32xf32>
    %292 = tpu.matmul %288, %262, %cst_111 {dimension_numbers = #tpu.dot_dimension_numbers<[1], [0], [0], [1], [0, 0, 1, 1], [], []>} : vector<32x8xf32>, vector<8x32xf32>, vector<32x32xf32> -> vector<32x32xf32>
    %cst_112 = arith.constant dense<0.000000e+00> : vector<32x32xf32>
    %293 = tpu.matmul %288, %264, %cst_112 {dimension_numbers = #tpu.dot_dimension_numbers<[1], [0], [0], [1], [0, 0, 1, 1], [], []>} : vector<32x8xf32>, vector<8x32xf32>, vector<32x32xf32> -> vector<32x32xf32>
    %cst_113 = arith.constant 0.000000e+00 : f32
    %294 = vector.broadcast %cst_113 : f32 to vector<32x8xf32>
    %295 = vector.extract_strided_slice %291 {offsets = [0, 0], sizes = [32, 8], strides = [1, 1]} : vector<32x32xf32> to vector<32x8xf32>
    %296 = vector.shape_cast %295 : vector<32x8xf32> to vector<2x16x8xf32>
    %297 = vector.extract_strided_slice %292 {offsets = [0, 0], sizes = [32, 8], strides = [1, 1]} : vector<32x32xf32> to vector<32x8xf32>
    %298 = vector.shape_cast %297 : vector<32x8xf32> to vector<2x16x8xf32>
    %299 = vector.extract_strided_slice %293 {offsets = [0, 0], sizes = [32, 8], strides = [1, 1]} : vector<32x32xf32> to vector<32x8xf32>
    %300 = vector.shape_cast %299 : vector<32x8xf32> to vector<2x16x8xf32>
    "tpu.trace_start"() <{level = 10 : i32, message = "gqd,gkd->gqk"}> : () -> ()
    %cst_114 = arith.constant dense<0.000000e+00> : vector<2x16x16xf32>
    %301 = tpu.matmul %296, %298, %cst_114 {dimension_numbers = #tpu.dot_dimension_numbers<[2], [2], [1], [1], [0, 0, 0, 1, 1, 1], [0], [0]>} : vector<2x16x8xf32>, vector<2x16x8xf32>, vector<2x16x16xf32> -> vector<2x16x16xf32>
    "tpu.trace_stop"() : () -> ()
    %cst_115 = arith.constant dense<0xFF800000> : vector<2x16xf32>
    %302 = vector.multi_reduction <maximumf>, %301, %cst_115 [2] : vector<2x16x16xf32> to vector<2x16xf32>
    %cst_116 = arith.constant 0xFF800000 : f32
    %303 = vector.broadcast %cst_116 : f32 to vector<2x16xf32>
    %304 = arith.maximumf %303, %302 : vector<2x16xf32>
    %305 = vector.shape_cast %304 : vector<2x16xf32> to vector<2x16x1xf32>
    %306 = vector.broadcast %305 : vector<2x16x1xf32> to vector<2x16x16xf32>
    %307 = arith.subf %301, %306 : vector<2x16x16xf32>
    %308 = math.exp %307 : vector<2x16x16xf32>
    %cst_117 = arith.constant dense<0.000000e+00> : vector<2x16xf32>
    %309 = vector.multi_reduction <add>, %308, %cst_117 [2] : vector<2x16x16xf32> to vector<2x16xf32>
    %310 = vector.shape_cast %309 : vector<2x16xf32> to vector<2x16x1xf32>
    %311 = vector.broadcast %310 : vector<2x16x1xf32> to vector<2x16x16xf32>
    %312 = arith.divf %308, %311 : vector<2x16x16xf32>
    "tpu.trace_start"() <{level = 10 : i32, message = "gqk,gkd->gqd"}> : () -> ()
    %cst_118 = arith.constant dense<0.000000e+00> : vector<2x16x8xf32>
    %313 = tpu.matmul %312, %300, %cst_118 {dimension_numbers = #tpu.dot_dimension_numbers<[2], [1], [1], [2], [0, 0, 0, 1, 1, 2], [0], [0]>} : vector<2x16x16xf32>, vector<2x16x8xf32>, vector<2x16x8xf32> -> vector<2x16x8xf32>
    "tpu.trace_stop"() : () -> ()
    %c1_119 = arith.constant 1 : index
    %c24_120 = arith.constant 24 : index
    %c0_121 = arith.constant 0 : index
    %314 = vector.load %arg3[%c1_119, %c24_120, %c0_121] : memref<2x72x32xf32, #tpu.memory_space<vmem>>, vector<1x8x8xf32>
    %315 = vector.shape_cast %314 : vector<1x8x8xf32> to vector<8x8xf32>
    %316 = vector.shape_cast %313 : vector<2x16x8xf32> to vector<32x8xf32>
    %cst_122 = arith.constant dense<0.000000e+00> : vector<32x8xf32>
    %317 = tpu.matmul %316, %315, %cst_122 {dimension_numbers = #tpu.dot_dimension_numbers<[1], [0], [0], [1], [0, 0, 1, 1], [], []>} : vector<32x8xf32>, vector<8x8xf32>, vector<32x8xf32> -> vector<32x8xf32>
    %318 = arith.addf %294, %317 : vector<32x8xf32>
    %319 = vector.extract_strided_slice %291 {offsets = [0, 8], sizes = [32, 8], strides = [1, 1]} : vector<32x32xf32> to vector<32x8xf32>
    %320 = vector.shape_cast %319 : vector<32x8xf32> to vector<2x16x8xf32>
    %321 = vector.extract_strided_slice %292 {offsets = [0, 8], sizes = [32, 8], strides = [1, 1]} : vector<32x32xf32> to vector<32x8xf32>
    %322 = vector.shape_cast %321 : vector<32x8xf32> to vector<2x16x8xf32>
    %323 = vector.extract_strided_slice %293 {offsets = [0, 8], sizes = [32, 8], strides = [1, 1]} : vector<32x32xf32> to vector<32x8xf32>
    %324 = vector.shape_cast %323 : vector<32x8xf32> to vector<2x16x8xf32>
    "tpu.trace_start"() <{level = 10 : i32, message = "gqd,gkd->gqk"}> : () -> ()
    %cst_123 = arith.constant dense<0.000000e+00> : vector<2x16x16xf32>
    %325 = tpu.matmul %320, %322, %cst_123 {dimension_numbers = #tpu.dot_dimension_numbers<[2], [2], [1], [1], [0, 0, 0, 1, 1, 1], [0], [0]>} : vector<2x16x8xf32>, vector<2x16x8xf32>, vector<2x16x16xf32> -> vector<2x16x16xf32>
    "tpu.trace_stop"() : () -> ()
    %cst_124 = arith.constant dense<0xFF800000> : vector<2x16xf32>
    %326 = vector.multi_reduction <maximumf>, %325, %cst_124 [2] : vector<2x16x16xf32> to vector<2x16xf32>
    %cst_125 = arith.constant 0xFF800000 : f32
    %327 = vector.broadcast %cst_125 : f32 to vector<2x16xf32>
    %328 = arith.maximumf %327, %326 : vector<2x16xf32>
    %329 = vector.shape_cast %328 : vector<2x16xf32> to vector<2x16x1xf32>
    %330 = vector.broadcast %329 : vector<2x16x1xf32> to vector<2x16x16xf32>
    %331 = arith.subf %325, %330 : vector<2x16x16xf32>
    %332 = math.exp %331 : vector<2x16x16xf32>
    %cst_126 = arith.constant dense<0.000000e+00> : vector<2x16xf32>
    %333 = vector.multi_reduction <add>, %332, %cst_126 [2] : vector<2x16x16xf32> to vector<2x16xf32>
    %334 = vector.shape_cast %333 : vector<2x16xf32> to vector<2x16x1xf32>
    %335 = vector.broadcast %334 : vector<2x16x1xf32> to vector<2x16x16xf32>
    %336 = arith.divf %332, %335 : vector<2x16x16xf32>
    "tpu.trace_start"() <{level = 10 : i32, message = "gqk,gkd->gqd"}> : () -> ()
    %cst_127 = arith.constant dense<0.000000e+00> : vector<2x16x8xf32>
    %337 = tpu.matmul %336, %324, %cst_127 {dimension_numbers = #tpu.dot_dimension_numbers<[2], [1], [1], [2], [0, 0, 0, 1, 1, 2], [0], [0]>} : vector<2x16x16xf32>, vector<2x16x8xf32>, vector<2x16x8xf32> -> vector<2x16x8xf32>
    "tpu.trace_stop"() : () -> ()
    %c1_128 = arith.constant 1 : index
    %c32_129 = arith.constant 32 : index
    %c0_130 = arith.constant 0 : index
    %338 = vector.load %arg3[%c1_128, %c32_129, %c0_130] : memref<2x72x32xf32, #tpu.memory_space<vmem>>, vector<1x8x8xf32>
    %339 = vector.shape_cast %338 : vector<1x8x8xf32> to vector<8x8xf32>
    %340 = vector.shape_cast %337 : vector<2x16x8xf32> to vector<32x8xf32>
    %cst_131 = arith.constant dense<0.000000e+00> : vector<32x8xf32>
    %341 = tpu.matmul %340, %339, %cst_131 {dimension_numbers = #tpu.dot_dimension_numbers<[1], [0], [0], [1], [0, 0, 1, 1], [], []>} : vector<32x8xf32>, vector<8x8xf32>, vector<32x8xf32> -> vector<32x8xf32>
    %342 = arith.addf %318, %341 : vector<32x8xf32>
    %343 = vector.extract_strided_slice %291 {offsets = [0, 16], sizes = [32, 8], strides = [1, 1]} : vector<32x32xf32> to vector<32x8xf32>
    %344 = vector.shape_cast %343 : vector<32x8xf32> to vector<2x16x8xf32>
    %345 = vector.extract_strided_slice %292 {offsets = [0, 16], sizes = [32, 8], strides = [1, 1]} : vector<32x32xf32> to vector<32x8xf32>
    %346 = vector.shape_cast %345 : vector<32x8xf32> to vector<2x16x8xf32>
    %347 = vector.extract_strided_slice %293 {offsets = [0, 16], sizes = [32, 8], strides = [1, 1]} : vector<32x32xf32> to vector<32x8xf32>
    %348 = vector.shape_cast %347 : vector<32x8xf32> to vector<2x16x8xf32>
    "tpu.trace_start"() <{level = 10 : i32, message = "gqd,gkd->gqk"}> : () -> ()
    %cst_132 = arith.constant dense<0.000000e+00> : vector<2x16x16xf32>
    %349 = tpu.matmul %344, %346, %cst_132 {dimension_numbers = #tpu.dot_dimension_numbers<[2], [2], [1], [1], [0, 0, 0, 1, 1, 1], [0], [0]>} : vector<2x16x8xf32>, vector<2x16x8xf32>, vector<2x16x16xf32> -> vector<2x16x16xf32>
    "tpu.trace_stop"() : () -> ()
    %cst_133 = arith.constant dense<0xFF800000> : vector<2x16xf32>
    %350 = vector.multi_reduction <maximumf>, %349, %cst_133 [2] : vector<2x16x16xf32> to vector<2x16xf32>
    %cst_134 = arith.constant 0xFF800000 : f32
    %351 = vector.broadcast %cst_134 : f32 to vector<2x16xf32>
    %352 = arith.maximumf %351, %350 : vector<2x16xf32>
    %353 = vector.shape_cast %352 : vector<2x16xf32> to vector<2x16x1xf32>
    %354 = vector.broadcast %353 : vector<2x16x1xf32> to vector<2x16x16xf32>
    %355 = arith.subf %349, %354 : vector<2x16x16xf32>
    %356 = math.exp %355 : vector<2x16x16xf32>
    %cst_135 = arith.constant dense<0.000000e+00> : vector<2x16xf32>
    %357 = vector.multi_reduction <add>, %356, %cst_135 [2] : vector<2x16x16xf32> to vector<2x16xf32>
    %358 = vector.shape_cast %357 : vector<2x16xf32> to vector<2x16x1xf32>
    %359 = vector.broadcast %358 : vector<2x16x1xf32> to vector<2x16x16xf32>
    %360 = arith.divf %356, %359 : vector<2x16x16xf32>
    "tpu.trace_start"() <{level = 10 : i32, message = "gqk,gkd->gqd"}> : () -> ()
    %cst_136 = arith.constant dense<0.000000e+00> : vector<2x16x8xf32>
    %361 = tpu.matmul %360, %348, %cst_136 {dimension_numbers = #tpu.dot_dimension_numbers<[2], [1], [1], [2], [0, 0, 0, 1, 1, 2], [0], [0]>} : vector<2x16x16xf32>, vector<2x16x8xf32>, vector<2x16x8xf32> -> vector<2x16x8xf32>
    "tpu.trace_stop"() : () -> ()
    %c1_137 = arith.constant 1 : index
    %c40_138 = arith.constant 40 : index
    %c0_139 = arith.constant 0 : index
    %362 = vector.load %arg3[%c1_137, %c40_138, %c0_139] : memref<2x72x32xf32, #tpu.memory_space<vmem>>, vector<1x8x8xf32>
    %363 = vector.shape_cast %362 : vector<1x8x8xf32> to vector<8x8xf32>
    %364 = vector.shape_cast %361 : vector<2x16x8xf32> to vector<32x8xf32>
    %cst_140 = arith.constant dense<0.000000e+00> : vector<32x8xf32>
    %365 = tpu.matmul %364, %363, %cst_140 {dimension_numbers = #tpu.dot_dimension_numbers<[1], [0], [0], [1], [0, 0, 1, 1], [], []>} : vector<32x8xf32>, vector<8x8xf32>, vector<32x8xf32> -> vector<32x8xf32>
    %366 = arith.addf %342, %365 : vector<32x8xf32>
    %367 = vector.extract_strided_slice %291 {offsets = [0, 24], sizes = [32, 8], strides = [1, 1]} : vector<32x32xf32> to vector<32x8xf32>
    %368 = vector.shape_cast %367 : vector<32x8xf32> to vector<2x16x8xf32>
    %369 = vector.extract_strided_slice %292 {offsets = [0, 24], sizes = [32, 8], strides = [1, 1]} : vector<32x32xf32> to vector<32x8xf32>
    %370 = vector.shape_cast %369 : vector<32x8xf32> to vector<2x16x8xf32>
    %371 = vector.extract_strided_slice %293 {offsets = [0, 24], sizes = [32, 8], strides = [1, 1]} : vector<32x32xf32> to vector<32x8xf32>
    %372 = vector.shape_cast %371 : vector<32x8xf32> to vector<2x16x8xf32>
    "tpu.trace_start"() <{level = 10 : i32, message = "gqd,gkd->gqk"}> : () -> ()
    %cst_141 = arith.constant dense<0.000000e+00> : vector<2x16x16xf32>
    %373 = tpu.matmul %368, %370, %cst_141 {dimension_numbers = #tpu.dot_dimension_numbers<[2], [2], [1], [1], [0, 0, 0, 1, 1, 1], [0], [0]>} : vector<2x16x8xf32>, vector<2x16x8xf32>, vector<2x16x16xf32> -> vector<2x16x16xf32>
    "tpu.trace_stop"() : () -> ()
    %cst_142 = arith.constant dense<0xFF800000> : vector<2x16xf32>
    %374 = vector.multi_reduction <maximumf>, %373, %cst_142 [2] : vector<2x16x16xf32> to vector<2x16xf32>
    %cst_143 = arith.constant 0xFF800000 : f32
    %375 = vector.broadcast %cst_143 : f32 to vector<2x16xf32>
    %376 = arith.maximumf %375, %374 : vector<2x16xf32>
    %377 = vector.shape_cast %376 : vector<2x16xf32> to vector<2x16x1xf32>
    %378 = vector.broadcast %377 : vector<2x16x1xf32> to vector<2x16x16xf32>
    %379 = arith.subf %373, %378 : vector<2x16x16xf32>
    %380 = math.exp %379 : vector<2x16x16xf32>
    %cst_144 = arith.constant dense<0.000000e+00> : vector<2x16xf32>
    %381 = vector.multi_reduction <add>, %380, %cst_144 [2] : vector<2x16x16xf32> to vector<2x16xf32>
    %382 = vector.shape_cast %381 : vector<2x16xf32> to vector<2x16x1xf32>
    %383 = vector.broadcast %382 : vector<2x16x1xf32> to vector<2x16x16xf32>
    %384 = arith.divf %380, %383 : vector<2x16x16xf32>
    "tpu.trace_start"() <{level = 10 : i32, message = "gqk,gkd->gqd"}> : () -> ()
    %cst_145 = arith.constant dense<0.000000e+00> : vector<2x16x8xf32>
    %385 = tpu.matmul %384, %372, %cst_145 {dimension_numbers = #tpu.dot_dimension_numbers<[2], [1], [1], [2], [0, 0, 0, 1, 1, 2], [0], [0]>} : vector<2x16x16xf32>, vector<2x16x8xf32>, vector<2x16x8xf32> -> vector<2x16x8xf32>
    "tpu.trace_stop"() : () -> ()
    %c1_146 = arith.constant 1 : index
    %c48_147 = arith.constant 48 : index
    %c0_148 = arith.constant 0 : index
    %386 = vector.load %arg3[%c1_146, %c48_147, %c0_148] : memref<2x72x32xf32, #tpu.memory_space<vmem>>, vector<1x8x8xf32>
    %387 = vector.shape_cast %386 : vector<1x8x8xf32> to vector<8x8xf32>
    %388 = vector.shape_cast %385 : vector<2x16x8xf32> to vector<32x8xf32>
    %cst_149 = arith.constant dense<0.000000e+00> : vector<32x8xf32>
    %389 = tpu.matmul %388, %387, %cst_149 {dimension_numbers = #tpu.dot_dimension_numbers<[1], [0], [0], [1], [0, 0, 1, 1], [], []>} : vector<32x8xf32>, vector<8x8xf32>, vector<32x8xf32> -> vector<32x8xf32>
    %390 = arith.addf %366, %389 : vector<32x8xf32>
    %391 = arith.addf %28, %390 : vector<32x8xf32>
    %c1_150 = arith.constant 1 : index
    %c56_151 = arith.constant 56 : index
    %c0_152 = arith.constant 0 : index
    %392 = vector.load %arg3[%c1_150, %c56_151, %c0_152] : memref<2x72x32xf32, #tpu.memory_space<vmem>>, vector<1x8x8xf32>
    %393 = vector.shape_cast %392 : vector<1x8x8xf32> to vector<8x8xf32>
    %c1_153 = arith.constant 1 : index
    %c64_154 = arith.constant 64 : index
    %c0_155 = arith.constant 0 : index
    %394 = vector.load %arg3[%c1_153, %c64_154, %c0_155] : memref<2x72x32xf32, #tpu.memory_space<vmem>>, vector<1x8x8xf32>
    %395 = vector.shape_cast %394 : vector<1x8x8xf32> to vector<8x8xf32>
    %cst_156 = arith.constant dense<0.000000e+00> : vector<32xf32>
    %396 = vector.multi_reduction <add>, %391, %cst_156 [1] : vector<32x8xf32> to vector<32xf32>
    %397 = vector.shape_cast %396 : vector<32xf32> to vector<32x1xf32>
    %cst_157 = arith.constant 8.000000e+00 : f32
    %398 = vector.broadcast %cst_157 : f32 to vector<32x1xf32>
    %399 = arith.divf %397, %398 : vector<32x1xf32>
    %400 = vector.broadcast %399 : vector<32x1xf32> to vector<32x8xf32>
    %401 = arith.subf %391, %400 : vector<32x8xf32>
    %402 = arith.mulf %401, %401 : vector<32x8xf32>
    %cst_158 = arith.constant dense<0.000000e+00> : vector<32xf32>
    %403 = vector.multi_reduction <add>, %402, %cst_158 [1] : vector<32x8xf32> to vector<32xf32>
    %404 = vector.shape_cast %403 : vector<32xf32> to vector<32x1xf32>
    %cst_159 = arith.constant 8.000000e+00 : f32
    %405 = vector.broadcast %cst_159 : f32 to vector<32x1xf32>
    %406 = arith.divf %404, %405 : vector<32x1xf32>
    %407 = vector.broadcast %399 : vector<32x1xf32> to vector<32x8xf32>
    %408 = arith.subf %391, %407 : vector<32x8xf32>
    %cst_160 = arith.constant 9.99999997E-7 : f32
    %409 = vector.broadcast %cst_160 : f32 to vector<32x1xf32>
    %410 = arith.addf %406, %409 : vector<32x1xf32>
    %411 = math.rsqrt %410 : vector<32x1xf32>
    %412 = vector.broadcast %411 : vector<32x1xf32> to vector<32x8xf32>
    %413 = arith.mulf %408, %412 : vector<32x8xf32>
    %414 = vector.shape_cast %248 : vector<8xf32> to vector<1x8xf32>
    %415 = vector.broadcast %414 : vector<1x8xf32> to vector<32x8xf32>
    %416 = arith.mulf %413, %415 : vector<32x8xf32>
    %417 = vector.shape_cast %250 : vector<8xf32> to vector<1x8xf32>
    %418 = vector.broadcast %417 : vector<1x8xf32> to vector<32x8xf32>
    %419 = arith.addf %416, %418 : vector<32x8xf32>
    %cst_161 = arith.constant dense<0.000000e+00> : vector<32x8xf32>
    %420 = tpu.matmul %419, %393, %cst_161 {dimension_numbers = #tpu.dot_dimension_numbers<[1], [0], [0], [1], [0, 0, 1, 1], [], []>} : vector<32x8xf32>, vector<8x8xf32>, vector<32x8xf32> -> vector<32x8xf32>
    %421 = vector.shape_cast %256 : vector<8xf32> to vector<1x8xf32>
    %422 = vector.broadcast %421 : vector<1x8xf32> to vector<32x8xf32>
    %423 = arith.addf %420, %422 : vector<32x8xf32>
    %cst_162 = arith.constant 0.000000e+00 : f32
    %424 = vector.broadcast %cst_162 : f32 to vector<32x8xf32>
    %425 = arith.maximumf %423, %424 : vector<32x8xf32>
    %cst_163 = arith.constant dense<0.000000e+00> : vector<32x8xf32>
    %426 = tpu.matmul %425, %395, %cst_163 {dimension_numbers = #tpu.dot_dimension_numbers<[1], [0], [0], [1], [0, 0, 1, 1], [], []>} : vector<32x8xf32>, vector<8x8xf32>, vector<32x8xf32> -> vector<32x8xf32>
    %427 = vector.shape_cast %258 : vector<8xf32> to vector<1x8xf32>
    %428 = vector.broadcast %427 : vector<1x8xf32> to vector<32x8xf32>
    %429 = arith.addf %426, %428 : vector<32x8xf32>
    %430 = arith.addf %391, %429 : vector<32x8xf32>
    %cst_164 = arith.constant dense<0.000000e+00> : vector<32xf32>
    %431 = vector.multi_reduction <add>, %430, %cst_164 [1] : vector<32x8xf32> to vector<32xf32>
    %432 = vector.shape_cast %431 : vector<32xf32> to vector<32x1xf32>
    %cst_165 = arith.constant 8.000000e+00 : f32
    %433 = vector.broadcast %cst_165 : f32 to vector<32x1xf32>
    %434 = arith.divf %432, %433 : vector<32x1xf32>
    %435 = vector.broadcast %434 : vector<32x1xf32> to vector<32x8xf32>
    %436 = arith.subf %430, %435 : vector<32x8xf32>
    %437 = arith.mulf %436, %436 : vector<32x8xf32>
    %cst_166 = arith.constant dense<0.000000e+00> : vector<32xf32>
    %438 = vector.multi_reduction <add>, %437, %cst_166 [1] : vector<32x8xf32> to vector<32xf32>
    %439 = vector.shape_cast %438 : vector<32xf32> to vector<32x1xf32>
    %cst_167 = arith.constant 8.000000e+00 : f32
    %440 = vector.broadcast %cst_167 : f32 to vector<32x1xf32>
    %441 = arith.divf %439, %440 : vector<32x1xf32>
    %442 = vector.broadcast %434 : vector<32x1xf32> to vector<32x8xf32>
    %443 = arith.subf %430, %442 : vector<32x8xf32>
    %cst_168 = arith.constant 9.99999997E-7 : f32
    %444 = vector.broadcast %cst_168 : f32 to vector<32x1xf32>
    %445 = arith.addf %441, %444 : vector<32x1xf32>
    %446 = math.rsqrt %445 : vector<32x1xf32>
    %447 = vector.broadcast %446 : vector<32x1xf32> to vector<32x8xf32>
    %448 = arith.mulf %443, %447 : vector<32x8xf32>
    %449 = vector.shape_cast %252 : vector<8xf32> to vector<1x8xf32>
    %450 = vector.broadcast %449 : vector<1x8xf32> to vector<32x8xf32>
    %451 = arith.mulf %448, %450 : vector<32x8xf32>
    %452 = vector.shape_cast %254 : vector<8xf32> to vector<1x8xf32>
    %453 = vector.broadcast %452 : vector<1x8xf32> to vector<32x8xf32>
    %454 = arith.addf %451, %453 : vector<32x8xf32>
    %455 = arith.addf %242, %454 : vector<32x8xf32>
    %c32_169 = arith.constant 32 : index
    %c0_170 = arith.constant 0 : index
    %456 = vector.load %arg2[%c32_169, %c0_170] : memref<40x32xf32, #tpu.memory_space<vmem>>, vector<8x32xf32>
    %c5 = arith.constant 5 : index
    %c0_171 = arith.constant 0 : index
    %457 = vector.load %arg4[%c5, %c0_171] : memref<26x32xf32, #tpu.memory_space<vmem>>, vector<1x32xf32>
    %458 = vector.shape_cast %457 : vector<1x32xf32> to vector<32xf32>
    %c6 = arith.constant 6 : index
    %c0_172 = arith.constant 0 : index
    %459 = vector.load %arg4[%c6, %c0_172] : memref<26x32xf32, #tpu.memory_space<vmem>>, vector<1x32xf32>
    %460 = vector.shape_cast %459 : vector<1x32xf32> to vector<32xf32>
    %c7 = arith.constant 7 : index
    %c0_173 = arith.constant 0 : index
    %461 = vector.load %arg4[%c7, %c0_173] : memref<26x32xf32, #tpu.memory_space<vmem>>, vector<1x32xf32>
    %462 = vector.shape_cast %461 : vector<1x32xf32> to vector<32xf32>
    %c8_174 = arith.constant 8 : index
    %c0_175 = arith.constant 0 : index
    %463 = vector.load %arg4[%c8_174, %c0_175] : memref<26x32xf32, #tpu.memory_space<vmem>>, vector<1x32xf32>
    %464 = vector.shape_cast %463 : vector<1x32xf32> to vector<32xf32>
    %c9 = arith.constant 9 : index
    %c0_176 = arith.constant 0 : index
    %465 = vector.load %arg4[%c9, %c0_176] : memref<26x32xf32, #tpu.memory_space<vmem>>, vector<1x32xf32>
    %466 = vector.shape_cast %465 : vector<1x32xf32> to vector<32xf32>
    %cst_177 = arith.constant dense<0.000000e+00> : vector<32x32xf32>
    %467 = tpu.matmul %455, %456, %cst_177 {dimension_numbers = #tpu.dot_dimension_numbers<[1], [0], [0], [1], [0, 0, 1, 1], [], []>} : vector<32x8xf32>, vector<8x32xf32>, vector<32x32xf32> -> vector<32x32xf32>
    %468 = vector.shape_cast %458 : vector<32xf32> to vector<1x32xf32>
    %469 = vector.broadcast %468 : vector<1x32xf32> to vector<32x32xf32>
    %470 = arith.addf %467, %469 : vector<32x32xf32>
    %471 = vector.shape_cast %464 : vector<32xf32> to vector<1x32xf32>
    %472 = vector.broadcast %471 : vector<1x32xf32> to vector<32x32xf32>
    %473 = arith.subf %470, %472 : vector<32x32xf32>
    %cst_178 = arith.constant 9.99999974E-6 : f32
    %474 = vector.broadcast %cst_178 : f32 to vector<32xf32>
    %475 = arith.addf %466, %474 : vector<32xf32>
    %476 = math.rsqrt %475 : vector<32xf32>
    %477 = arith.mulf %460, %476 : vector<32xf32>
    %478 = vector.shape_cast %477 : vector<32xf32> to vector<1x32xf32>
    %479 = vector.broadcast %478 : vector<1x32xf32> to vector<32x32xf32>
    %480 = arith.mulf %473, %479 : vector<32x32xf32>
    %481 = vector.shape_cast %462 : vector<32xf32> to vector<1x32xf32>
    %482 = vector.broadcast %481 : vector<1x32xf32> to vector<32x32xf32>
    %483 = arith.addf %480, %482 : vector<32x32xf32>
    %c0_179 = arith.constant 0 : index
    %c0_180 = arith.constant 0 : index
    %484 = vector.load %arg5[%c0_179, %c0_180] : memref<32x32xf32, #tpu.memory_space<vmem>>, vector<32x32xf32>
    tpu.vector_store %arg5[%c0_179, %c0_180], %483 {strides = array<i32>} : memref<32x32xf32, #tpu.memory_space<vmem>>, vector<32x32xf32>,
    return
  }
  func.func @transform_0(%arg0: i32) -> (i32, i32) {
    %c0_i32 = arith.constant 0 : i32
    %c0_i32_0 = arith.constant 0 : i32
    %c0_i32_1 = arith.constant 0 : i32
    return %c0_i32, %c0_i32_0 : i32, i32
  }
  func.func @transform_1(%arg0: i32) -> (i32, i32) {
    %c0_i32 = arith.constant 0 : i32
    %c0_i32_0 = arith.constant 0 : i32
    %c0_i32_1 = arith.constant 0 : i32
    return %c0_i32, %c0_i32_0 : i32, i32
  }
  func.func @transform_2(%arg0: i32) -> (i32, i32, i32) {
    %c0_i32 = arith.constant 0 : i32
    %c0_i32_0 = arith.constant 0 : i32
    %c0_i32_1 = arith.constant 0 : i32
    %c0_i32_2 = arith.constant 0 : i32
    return %c0_i32, %c0_i32_0, %c0_i32_1 : i32, i32, i32
  }
  func.func @transform_3(%arg0: i32) -> (i32, i32) {
    %c0_i32 = arith.constant 0 : i32
    %c0_i32_0 = arith.constant 0 : i32
    %c0_i32_1 = arith.constant 0 : i32
    return %c0_i32, %c0_i32_0 : i32, i32
  }
  func.func @transform_4(%arg0: i32) -> (i32, i32) {
    %c0_i32 = arith.constant 0 : i32
    %c0_i32_0 = arith.constant 0 : i32
    %c0_i32_1 = arith.constant 0 : i32
    return %c0_i32, %c0_i32_0 : i32, i32
  }
}

</mosaic_0001>

<bundles_post_ra>
// kernel: encoder_forward.1
= control target key start
LH: loop header
LB: loop body
LE: loop exit
PB: predicated region body
PF: predicated region fallthrough
CT: control target
= control target key end

     0   :  { %vm35_vm0 = vcmask 261120   ;;  %s8926_s0 = inlined_call_operand.vmem [shape: f32[32,32], index: 0, kind: input, shape index: {}]   ;;  %s8927_s1 = inlined_call_operand.vmem [shape: f32[40,32], index: 1, kind: input, shape index: {}]   ;;  %s8928_s2 = inlined_call_operand.vmem [shape: f32[2,72,32], index: 2, kind: input, shape index: {}]   ;;  %s8929_s3 = inlined_call_operand.vmem [shape: f32[26,32], index: 3, kind: input, shape index: {}]   ;;  %s8930_s4 = inlined_call_operand.hbm [shape: f32[32,32], index: 4, kind: output, shape index: {}]  }
   0x1   :  { %v22_v0 = vld [vmem:[%s8927_s1] sm:$0xff]  ;;  %v23_v1 = vld [vmem:[%s8927_s1 + $0x8] sm:$0xff]  ;;  %v24_v2 = vld [vmem:[%s8927_s1 + $0x10] sm:$0xff] }
   0x2   :  { %v7562_v3 = vpack.c.bf16 %v23_v1, %v22_v0  ;;  %v25_v4 = vld [vmem:[%s8927_s1 + $0x18] sm:$0xff]  ;;  %v18_v5 = vld [vmem:[%s8926_s0] sm:$0xff] }
   0x3   :  { %v7566_v6 = vpack.c.bf16 %v25_v4, %v24_v2  ;;  %7132 = vmatprep.mubr.msk.f32.mxu0 %vm35_vm0, %v18_v5 }
   0x4   :  { %7563 = vmatprep.subr.bf16.mxu0 %v7562_v3 }
   0x5   :  { %7565 = vmatpush3.bf16.msra.mxu0 %v7562_v3 }
   0x6   :  { %9 = vsyncpa [#allocation3], 0  ;;  %7567 = vmatprep.subr.bf16.mxu0 %v7566_v6  ;;  %v19_v7 = vld [vmem:[%s8926_s0 + $0x8] sm:$0xff]  ;;  %v20_v8 = vld [vmem:[%s8926_s0 + $0x10] sm:$0xff]  ;;  %v144_v12 = vlaneseq  ;;  %vm171_vm1 = vcmask 64512   ;;  %vm7939_vm2 = vmmov 0  }
   0x7   :  { %v21_v9 = vld [vmem:[%s8926_s0 + $0x18] sm:$0xff]  ;;  %v30_v10 = vld [vmem:[%s8929_s3 + $0x4] sm:$0x1]  ;;  %v27_v15 = vld [vmem:[%s8929_s3 + $0x1] sm:$0x1]  ;;  %s7940_s24 = smov 120  }
   0x8   :  { %v141_v11 = vadd.f32 1e-05, %v30_v10  ;;  %v8002_v13 = vshrl.u32 %v144_v12, 7  ;;  %v6686_v16 = vld [vmem:[%s8929_s3] ss:$0 sm:$0xff]  ;;  %v170_v3 = vld [vmem:[%s8928_s2 + $0x10] sm:$0xff]  ;;  %vm8528_vm3 = vmpackc.low %vm171_vm1, %vm171_vm1 }
   0x9   :  { %7569 = vmatpush3.bf16.msra.mxu0 %v7566_v6  ;;  %v6691_v19 = vld [vmem:[%s8929_s3 + $0x3] ss:$0 sm:$0xff]  ;;  %v6692_v28 = vld [vmem:[%s8929_s3 + $0x2] ss:$0 sm:$0xff]  ;;  %v169_v4 = vld [vmem:[%s8928_s2 + $0x8] sm:$0xff]  ;;  %s7941_s25 = smov 112  }
   0xa   :  { %7742 = vrsqrt.f32 %v141_v11  ;;  %v146_v18 = vsub.s32 0, %v8002_v13  ;;  %v168_v2 = vld [vmem:[%s8928_s2] sm:$0xff]  ;;  %7154 = vmatprep.subr.mxu0 %v170_v3  ;;  %s7942_s30 = smov 104   ;;  %vm4365_vm4 = vcmask 130048   ;;  %s7943_s14 = smov [#allocation2]  }
   0xb   :  { %7138 = vmatprep.subr.mxu1 %v168_v2  ;;  %s6675_s15 = sshll.u32 %s7943_s14, 4  ;;  %s6676_s15 = int_to_ptr.vmem [resolvable:$true] %s6675_s15 }
   0xc   :  { %7133 = vmatmul.mubr.msk.f32.vlgmr.msra.gmra.mrb[0].mxu0 %vm35_vm0, %v19_v7  ;;  %7139 = vmatpush3.msra.mxu1 %v168_v2  ;;  %p7919_p1 = scmp.lt.s32.totalorder %s6676_s15, %s6676_s15 }
   0xd   :  { %7135 = vmatprep.mubr.msk.f32.mxu0 %vm35_vm0, %v20_v8  ;;  %7155 = vmatpush3.msra.mxu0 %v170_v3 }
   0xe   :  { %7146 = vmatprep.subr.mxu1 %v169_v4 }
  0x10   :  { %7136 = vmatmul.mubr.msk.f32.gmra.mrb[2].mxu0 %vm35_vm0, %v21_v9 }
  0x14   :  { %v7743_v14 = vpop.eup %7742 }
  0x15   :  { %v143_v17 = vmul.f32 %v7743_v14, %v27_v15 }
  0x17   :  { %v147_v23 = vrot.slane %v143_v17, %v146_v18 }
  0xdf   :  { %v7134_v20 = vpop.f32.mrb[0].mxu0 }
  0xe0   :  { %v120_v21 = vadd.f32 %v7134_v20, %v6686_v16  ;;  %v114_v22 = vpop.f32.mrb[1].mxu0  ;;  %v6693_v20 = vld [vmem:[%s8929_s3 + $0xa] ss:$0 sm:$0xff] }
  0xe1   :  { %v115_v24 = vadd.f32 %v6686_v16, %v114_v22  ;;  %v6694_v22 = vld [vmem:[%s8929_s3 + $0xb] ss:$0 sm:$0xff] }
  0xe2   :  { %v138_v25 = vsub.f32 %v120_v21, %v6691_v19 }
  0xe3   :  { %v137_v26 = vsub.f32 %v115_v24, %v6691_v19  ;;  %v7137_v27 = vpop.f32.mrb[2].mxu0 }
  0xe4   :  { %v130_v29 = vadd.f32 %v7137_v27, %v6686_v16  ;;  %v124_v30 = vpop.f32.mrb[3].mxu0  ;;  %v149_v31 = vmul.f32 %v147_v23, %v138_v25 }
  0xe5   :  { %v148_v32 = vmul.f32 %v147_v23, %v137_v26  ;;  %v125_v33 = vadd.f32 %v6686_v16, %v124_v30 }
  0xe6   :  { %v140_v34 = vsub.f32 %v130_v29, %v6691_v19  ;;  %v8021_v37 = vadd.f32 %v6692_v28, %v149_v31 }
  0xe7   :  { %v8019_v35 = vadd.f32 %v6692_v28, %v148_v32  ;;  %v139_v36 = vsub.f32 %v125_v33, %v6691_v19 }
  0xe8   :  { %v151_v38 = vmul.f32 %v147_v23, %v140_v34  ;;  %v175_v44 = vsel %vm171_vm1, %v8021_v37, 0.0 }
  0xe9   :  { %v150_v39 = vmul.f32 %v147_v23, %v139_v36  ;;  %v172_v40 = vsel %vm171_vm1, %v8019_v35, 0.0 }
  0xea   :  { %173 = vadd.xlane.f32.xlu0 %v172_v40  ;;  %v8027_v42 = vadd.f32 %v6692_v28, %v151_v38 }
  0xeb   :  { %v8025_v41 = vadd.f32 %v6692_v28, %v150_v39  ;;  %v7938_v39 = vmov 0.0  }
  0xec   :  { %v181_v45 = vsel %vm171_vm1, %v8027_v42, 0.0  ;;  %7172 = vmatprep.subr.mxu0 %v7938_v39 }
  0xed   :  { %v178_v43 = vsel %vm171_vm1, %v8025_v41, 0.0 }
  0xee   :  { %179 = vadd.xlane.f32.xlu1 %v178_v43  ;;  %176 = vadd.xlane.f32.xlu0 %v175_v44 }
  0xf2   :  { %182 = vadd.xlane.f32.xlu1 %v181_v45 }
 0x177   :  { %v174_v46 = vpop.xlane.xlu0 %173 }
 0x178   :  { %v185_v47 = vmul.f32 0.125, %v174_v46 }
 0x17a   :  { %v189_v48 = vsub.f32 %v8019_v35, %v185_v47 }
 0x17b   :  { %v180_v49 = vpop.xlane.xlu1 %179  ;;  %v177_v50 = vpop.xlane.xlu0 %176 }
 0x17c   :  { %v187_v51 = vmul.f32 0.125, %v180_v49  ;;  %v186_v52 = vmul.f32 0.125, %v177_v50  ;;  %v193_v53 = vmul.f32 %v189_v48, %v189_v48 }
 0x17e   :  { %v191_v54 = vsub.f32 %v8025_v41, %v187_v51  ;;  %v190_v55 = vsub.f32 %v8021_v37, %v186_v52  ;;  %v197_v56 = vsel %vm171_vm1, %v193_v53, 0.0 }
 0x17f   :  { %v183_v57 = vpop.xlane.xlu1 %182  ;;  %198 = vadd.xlane.f32.xlu0 %v197_v56 }
 0x180   :  { %v188_v58 = vmul.f32 0.125, %v183_v57  ;;  %v195_v59 = vmul.f32 %v191_v54, %v191_v54  ;;  %v194_v60 = vmul.f32 %v190_v55, %v190_v55 }
 0x182   :  { %v192_v61 = vsub.f32 %v8027_v42, %v188_v58  ;;  %v203_v62 = vsel %vm171_vm1, %v195_v59, 0.0  ;;  %v200_v63 = vsel %vm171_vm1, %v194_v60, 0.0 }
 0x183   :  { %204 = vadd.xlane.f32.xlu0 %v203_v62  ;;  %201 = vadd.xlane.f32.xlu1 %v200_v63 }
 0x184   :  { %v196_v0 = vmul.f32 %v192_v61, %v192_v61 }
 0x186   :  { %v206_v1 = vsel %vm171_vm1, %v196_v0, 0.0 }
 0x187   :  { %207 = vadd.xlane.f32.xlu1 %v206_v1 }
 0x20c   :  { %v199_v5 = vpop.xlane.xlu0 %198 }
 0x20d   :  { %v209_v6 = vmul.f32 0.125, %v199_v5 }
 0x20f   :  { %v213_v7 = vadd.f32 1e-06, %v209_v6 }
 0x210   :  { %v202_v8 = vpop.xlane.xlu1 %201  ;;  %v205_v9 = vpop.xlane.xlu0 %204 }
 0x211   :  { %7744 = vrsqrt.f32 %v213_v7  ;;  %v210_v10 = vmul.f32 0.125, %v202_v8  ;;  %v211_v11 = vmul.f32 0.125, %v205_v9 }
 0x213   :  { %v214_v12 = vadd.f32 1e-06, %v210_v10  ;;  %v215_v14 = vadd.f32 1e-06, %v211_v11 }
 0x214   :  { %v208_v15 = vpop.xlane.xlu1 %207 }
 0x215   :  { %7746 = vrsqrt.f32 %v214_v12  ;;  %v212_v16 = vmul.f32 0.125, %v208_v15 }
 0x216   :  { %7748 = vrsqrt.f32 %v215_v14 }
 0x217   :  { %v216_v17 = vadd.f32 1e-06, %v212_v16 }
 0x219   :  { %7750 = vrsqrt.f32 %v216_v17 }
 0x21b   :  { %v7745_v19 = vpop.eup %7744 }
 0x21c   :  { %v8055_v21 = vmul.f32 %v7745_v19, %v189_v48 }
 0x21e   :  { %v229_v23 = vmul.f32 %v6693_v20, %v8055_v21 }
 0x21f   :  { %v7747_v24 = vpop.eup %7746 }
 0x220   :  { %v7749_v25 = vpop.eup %7748  ;;  %v237_v26 = vadd.f32 %v6694_v22, %v229_v23  ;;  %v8061_v27 = vmul.f32 %v7747_v24, %v190_v55 }
 0x221   :  { %v8063_v28 = vmul.f32 %v7749_v25, %v191_v54 }
 0x222   :  { %7140 = vmatprep.mubr.msk.f32.mxu1 %vm171_vm1, %v237_v26  ;;  %7156 = vmatprep.mubr.msk.f32.mxu0 %vm171_vm1, %v237_v26  ;;  %v230_v29 = vmul.f32 %v6693_v20, %v8061_v27 }
 0x223   :  { %v7751_v30 = vpop.eup %7750  ;;  %v231_v31 = vmul.f32 %v6693_v20, %v8063_v28 }
 0x224   :  { %v238_v32 = vadd.f32 %v6694_v22, %v230_v29  ;;  %v8069_v33 = vmul.f32 %v7751_v30, %v192_v61 }
 0x225   :  { %v239_v34 = vadd.f32 %v6694_v22, %v231_v31 }
 0x226   :  { %7141 = vmatmul.mubr.msk.f32.vlgmr.msra.gmra.mrb[0].mxu1 %vm171_vm1, %v238_v32  ;;  %7157 = vmatmul.mubr.msk.f32.vlgmr.msra.gmra.mrb[4].mxu0 %vm171_vm1, %v238_v32  ;;  %v232_v36 = vmul.f32 %v6693_v20, %v8069_v33 }
 0x227   :  { %7143 = vmatprep.mubr.msk.f32.mxu1 %vm171_vm1, %v239_v34  ;;  %7159 = vmatprep.mubr.msk.f32.mxu0 %vm171_vm1, %v239_v34 }
 0x228   :  { %v240_v38 = vadd.f32 %v6694_v22, %v232_v36  ;;  %7147 = vmatpush3.msra.mxu1 %v169_v4 }
 0x229   :  { %7162 = vmatprep.subr.mxu1 %v7938_v39 }
 0x22a   :  { %7144 = vmatmul.mubr.msk.f32.gmra.mrb[2].mxu1 %vm171_vm1, %v240_v38  ;;  %7160 = vmatmul.mubr.msk.f32.gmra.mrb[6].mxu0 %vm171_vm1, %v240_v38 }
 0x22b   :  { %7148 = vmatprep.mubr.msk.f32.mxu1 %vm171_vm1, %v237_v26  ;;  %7174 = vmatprep.mubr.msk.f32.mxu0 %vm7939_vm2, %v7938_v39 }
 0x22e   :  { %7149 = vmatmul.mubr.msk.f32.vlgmr.msra.gmra.mrb[4].mxu1 %vm171_vm1, %v238_v32 }
 0x22f   :  { %7151 = vmatprep.mubr.msk.f32.mxu1 %vm171_vm1, %v239_v34 }
 0x232   :  { %7152 = vmatmul.mubr.msk.f32.gmra.mrb[6].mxu1 %vm171_vm1, %v240_v38 }
 0x233   :  { %7164 = vmatprep.mubr.msk.f32.mxu1 %vm7939_vm2, %v7938_v39 }
 0x2f9   :  { %v7142_v40 = vpop.f32.mrb[0].mxu1  ;;  %v8088_v43 = vpop.f32.mrb[4].mxu0 }
 0x2fa   :  { %v319_v44 = vpop.f32.mrb[1].mxu1  ;;  %v8090_v45 = vpop.f32.mrb[5].mxu0  ;;  %v8115_v55 = vmul.f32 0.35355338, %v7142_v40 }
 0x2fb   :  { %v8102_v52 = vmul.f32 0.35355338, %v319_v44 }
 0x2fd   :  { %v7145_v46 = vpop.f32.mrb[2].mxu1  ;;  %v8092_v47 = vpop.f32.mrb[6].mxu0 }
 0x2fe   :  { %v329_v48 = vpop.f32.mrb[3].mxu1  ;;  %v8094_v49 = vpop.f32.mrb[7].mxu0  ;;  %v8130_v57 = vmul.f32 0.35355338, %v7145_v46 }
 0x2ff   :  { %v8117_v56 = vmul.f32 0.35355338, %v329_v48 }
 0x301   :  { %v8096_v50 = vpop.f32.mrb[4].mxu1 }
 0x302   :  { %v8098_v51 = vpop.f32.mrb[5].mxu1 }
 0x303   :  { %7163 = vmatpush3.xpose.msk.msra.mxu1 %vm171_vm1, %v8098_v51 }
 0x304   :  { %7167 = vmatprep.subr.mxu1 %v7938_v39 }
 0x305   :  { %v8105_v53 = vpop.f32.mrb[6].mxu1 }
 0x306   :  { %v8107_v54 = vpop.f32.mrb[7].mxu1  ;;  %7165 = vmatmul.mubr.msk.f32.vlgmr.msra.gmra.mrb[8].mxu1 %vm171_vm1, %v8102_v52 }
 0x307   :  { %7168 = vmatpush3.xpose.msk.msra.mxu1 %vm171_vm1, %v8096_v50  ;;  %7173 = vmatpush3.xpose.msk.msra.mxu0 %vm171_vm1, %v8107_v54 }
 0x308   :  { %7169 = vmatprep.mubr.msk.f32.mxu1 %vm7939_vm2, %v7938_v39  ;;  %7177 = vmatprep.subr.mxu1 %v7938_v39 }
 0x309   :  { %7182 = vmatprep.subr.mxu0 %v7938_v39 }
 0x30a   :  { %7170 = vmatmul.mubr.msk.f32.vlgmr.msra.gmra.mrb[10].mxu1 %vm171_vm1, %v8115_v55  ;;  %7175 = vmatmul.mubr.msk.f32.vlgmr.msra.gmra.mrb[8].mxu0 %vm171_vm1, %v8117_v56 }
 0x30b   :  { %7178 = vmatpush3.xpose.msk.msra.mxu1 %vm171_vm1, %v8105_v53  ;;  %7183 = vmatpush3.msra.mxu0 %v8090_v45 }
 0x30c   :  { %7179 = vmatprep.mubr.msk.f32.mxu1 %vm7939_vm2, %v7938_v39  ;;  %7187 = vmatprep.subr.mxu1 %v7938_v39 }
 0x30d   :  { %7184 = vmatprep.mubr.msk.f32.mxu0 %vm7939_vm2, %v7938_v39  ;;  %7192 = vmatprep.subr.mxu0 %v7938_v39 }
 0x30e   :  { %7180 = vmatmul.mubr.msk.f32.vlgmr.msra.gmra.mrb[12].mxu1 %vm171_vm1, %v8130_v57 }
 0x30f   :  { %7188 = vmatpush3.msra.mxu1 %v8088_v43  ;;  %7189 = vmatprep.mubr.msk.f32.mxu1 %vm7939_vm2, %v7938_v39 }
 0x310   :  { %7197 = vmatprep.subr.mxu1 %v7938_v39 }
 0x3d9   :  { %v8144_v58 = vpop.f32.mrb[8].mxu1 }
 0x3da   :  { %v7166_v59 = vpop.f32.mrb[9].mxu1  ;;  %v816_v15 = vsel %vm171_vm1, %v8144_v58, -inf }
 0x3dd   :  { %v660_v60 = vpop.f32.mrb[10].mxu1  ;;  %v8146_v61 = vpop.f32.mrb[8].mxu0 }
 0x3de   :  { %v7171_v62 = vpop.f32.mrb[11].mxu1  ;;  %v7176_v63 = vpop.f32.mrb[9].mxu0  ;;  %v819_v0 = vsel %vm171_vm1, %v660_v60, -inf  ;;  %v822_v16 = vsel %vm171_vm1, %v8146_v61, -inf }
 0x3df   :  { %820 = vmax.xlane.f32.xlu0 %v819_v0 }
 0x3e1   :  { %v812_v1 = vpop.f32.mrb[12].mxu1 }
 0x3e2   :  { %v7181_v2 = vpop.f32.mrb[13].mxu1  ;;  %v825_v3 = vsel %vm171_vm1, %v812_v1, -inf }
 0x3e3   :  { %826 = vmax.xlane.f32.xlu1 %v825_v3 }
 0x3f4   :  { %1231 = vrot.lane.b32.xlu1 %v8115_v55, %s7940_s24 }
 0x46c   :  { %v821_v4 = vpop.xlane.xlu0 %820 }
 0x46d   :  { %v829_v5 = vsub.f32 %v660_v60, %v821_v4 }
 0x46f   :  { %v834_v6 = vmul.f32 1.442695, %v829_v5 }
 0x470   :  { %v827_v7 = vpop.xlane.xlu1 %826 }
 0x471   :  { %7752 = vpow2.f32 %v834_v6  ;;  %v831_v8 = vsub.f32 %v812_v1, %v827_v7 }
 0x473   :  { %v838_v9 = vmul.f32 1.442695, %v831_v8 }
 0x474   :  { %v1232_v17 = vpop.permute.xlu1 %1231 }
 0x475   :  { %7754 = vpow2.f32 %v838_v9 }
 0x47b   :  { %v7753_v10 = vpop.eup %7752 }
 0x47c   :  { %v843_v11 = vsel %vm171_vm1, %v7753_v10, 0.0 }
 0x47d   :  { %844 = vadd.xlane.f32.xlu0 %v843_v11 }
 0x47f   :  { %v7755_v12 = vpop.eup %7754 }
 0x480   :  { %v849_v14 = vsel %vm171_vm1, %v7755_v12, 0.0 }
 0x481   :  { %850 = vadd.xlane.f32.xlu1 %v849_v14 }
 0x492   :  { %1389 = vrot.lane.b32.xlu1 %v8105_v53, %s7940_s24 }
 0x493   :  { %1233 = vrot.lane.b32.xlu0 %v8096_v50, %s7940_s24 }
 0x496   :  { %1387 = vrot.lane.b32.xlu1 %v8130_v57, %s7940_s24 }
 0x4b2   :  { %817 = vmax.xlane.f32.xlu0 %v816_v15 }
 0x4ba   :  { %823 = vmax.xlane.f32.xlu1 %v822_v16 }
 0x4cb   :  { %1153 = vrot.lane.b32.xlu1 %v8102_v52, %s7940_s24 }
 0x4cf   :  { %1311 = vrot.lane.b32.xlu1 %v8107_v54, %s7940_s24 }
 0x4d3   :  { %1309 = vrot.lane.b32.xlu1 %v8117_v56, %s7940_s24 }
 0x50a   :  { %v845_v19 = vpop.xlane.xlu0 %844 }
 0x50b   :  { %7756 = vrcp.f32 %v845_v19 }
 0x50e   :  { %v851_v20 = vpop.xlane.xlu1 %850  ;;  %v1234_v26 = vpop.permute.xlu0 %1233 }
 0x50f   :  { %7758 = vrcp.f32 %v851_v20 }
 0x512   :  { %v1390_v29 = vpop.permute.xlu1 %1389 }
 0x515   :  { %v7757_v22 = vpop.eup %7756 }
 0x516   :  { %v855_v23 = vmul.f32 %v7757_v22, %v7753_v10  ;;  %v1388_v30 = vpop.permute.xlu1 %1387 }
 0x518   :  { %7190 = vmatmul.mubr.msk.f32.vlgmr.msra.gmra.mrb[14].mxu1 %vm171_vm1, %v855_v23 }
 0x519   :  { %v7759_v24 = vpop.eup %7758  ;;  %7198 = vmatpush3.msra.mxu1 %v8092_v47  ;;  %7199 = vmatprep.mubr.msk.f32.mxu1 %vm7939_vm2, %v7938_v39 }
 0x51a   :  { %v859_v25 = vmul.f32 %v7759_v24, %v7755_v12  ;;  %7207 = vmatprep.subr.mxu1 %v7938_v39 }
 0x51c   :  { %7200 = vmatmul.mubr.msk.f32.vlgmr.msra.gmra.mrb[16].mxu1 %vm171_vm1, %v859_v25 }
 0x51d   :  { %7209 = vmatprep.mubr.msk.f32.mxu1 %vm7939_vm2, %v7938_v39 }
 0x520   :  { %7208 = vmatpush3.xpose.msk.msra.mxu1 %vm171_vm1, %v1234_v26 }
 0x521   :  { %7217 = vmatprep.subr.mxu1 %v7938_v39 }
 0x523   :  { %7210 = vmatmul.mubr.msk.f32.vlgmr.msra.gmra.mrb[18].mxu1 %vm171_vm1, %v1232_v17 }
 0x524   :  { %7218 = vmatpush3.xpose.msk.msra.mxu1 %vm171_vm1, %v1390_v29  ;;  %7219 = vmatprep.mubr.msk.f32.mxu1 %vm7939_vm2, %v7938_v39 }
 0x525   :  { %7227 = vmatprep.subr.mxu1 %v7938_v39 }
 0x527   :  { %7220 = vmatmul.mubr.msk.f32.vlgmr.msra.gmra.mrb[20].mxu1 %vm171_vm1, %v1388_v30 }
 0x528   :  { %7229 = vmatprep.mubr.msk.f32.mxu1 %vm7939_vm2, %v7938_v39 }
 0x53f   :  { %v818_v31 = vpop.xlane.xlu0 %817 }
 0x540   :  { %v828_v32 = vsub.f32 %v8144_v58, %v818_v31 }
 0x542   :  { %v832_v34 = vmul.f32 1.442695, %v828_v32 }
 0x544   :  { %7760 = vpow2.f32 %v832_v34 }
 0x547   :  { %v824_v36 = vpop.xlane.xlu1 %823 }
 0x548   :  { %v830_v38 = vsub.f32 %v8146_v61, %v824_v36 }
 0x54a   :  { %v836_v40 = vmul.f32 1.442695, %v830_v38 }
 0x54b   :  { %v1154_v1 = vpop.permute.xlu1 %1153 }
 0x54c   :  { %7762 = vpow2.f32 %v836_v40 }
 0x54e   :  { %v7761_v44 = vpop.eup %7760 }
 0x54f   :  { %v840_v46 = vsel %vm171_vm1, %v7761_v44, 0.0  ;;  %v1312_v7 = vpop.permute.xlu1 %1311 }
 0x550   :  { %841 = vadd.xlane.f32.xlu0 %v840_v46 }
 0x553   :  { %v1310_v11 = vpop.permute.xlu1 %1309 }
 0x556   :  { %v7763_v48 = vpop.eup %7762 }
 0x557   :  { %v846_v59 = vsel %vm171_vm1, %v7763_v48, 0.0 }
 0x558   :  { %847 = vadd.xlane.f32.xlu0 %v846_v59 }
 0x56e   :  { %1155 = vrot.lane.b32.xlu0 %v8098_v51, %s7940_s24 }
 0x5dd   :  { %v842_v60 = vpop.xlane.xlu0 %841 }
 0x5de   :  { %7764 = vrcp.f32 %v842_v60 }
 0x5e5   :  { %v848_v58 = vpop.xlane.xlu0 %847 }
 0x5e6   :  { %7766 = vrcp.f32 %v848_v58 }
 0x5e8   :  { %v7765_v62 = vpop.eup %7764 }
 0x5e9   :  { %v853_v63 = vmul.f32 %v7765_v62, %v7761_v44  ;;  %v1156_v6 = vpop.permute.xlu0 %1155 }
 0x5eb   :  { %7185 = vmatmul.mubr.msk.f32.vlgmr.msra.gmra.mrb[10].mxu0 %vm171_vm1, %v853_v63  ;;  %v8195_v61 = vpop.f32.mrb[14].mxu1 }
 0x5ec   :  { %7193 = vmatpush3.msra.mxu0 %v8094_v49  ;;  %v7191_v0 = vpop.f32.mrb[15].mxu1  ;;  %7194 = vmatprep.mubr.msk.f32.mxu0 %vm7939_vm2, %v7938_v39 }
 0x5ed   :  { %7202 = vmatprep.subr.mxu0 %v7938_v39 }
 0x5ef   :  { %v8201_v2 = vpop.f32.mrb[16].mxu1 }
 0x5f0   :  { %v7767_v3 = vpop.eup %7766  ;;  %v7201_v4 = vpop.f32.mrb[17].mxu1 }
 0x5f1   :  { %v857_v5 = vmul.f32 %v7767_v3, %v7763_v48 }
 0x5f3   :  { %7195 = vmatmul.mubr.msk.f32.vlgmr.msra.gmra.mrb[12].mxu0 %vm171_vm1, %v857_v5 }
 0x5f4   :  { %7203 = vmatpush3.xpose.msk.msra.mxu0 %vm171_vm1, %v1156_v6  ;;  %7204 = vmatprep.mubr.msk.f32.mxu0 %vm7939_vm2, %v7938_v39 }
 0x5f5   :  { %7212 = vmatprep.subr.mxu0 %v7938_v39 }
 0x5f6   :  { %v1305_v8 = vpop.f32.mrb[18].mxu1 }
 0x5f7   :  { %v7211_v9 = vpop.f32.mrb[19].mxu1  ;;  %v1468_v10 = vsel %vm171_vm1, %v1305_v8, -inf  ;;  %7205 = vmatmul.mubr.msk.f32.vlgmr.msra.gmra.mrb[14].mxu0 %vm171_vm1, %v1154_v1 }
 0x5f8   :  { %1469 = vmax.xlane.f32.xlu0 %v1468_v10  ;;  %7213 = vmatpush3.xpose.msk.msra.mxu0 %vm171_vm1, %v1312_v7 }
 0x5f9   :  { %7214 = vmatprep.mubr.msk.f32.mxu0 %vm7939_vm2, %v7938_v39  ;;  %7222 = vmatprep.subr.mxu0 %v7938_v39 }
 0x5fa   :  { %v1461_v12 = vpop.f32.mrb[20].mxu1 }
 0x5fb   :  { %v7221_v14 = vpop.f32.mrb[21].mxu1  ;;  %v1474_v15 = vsel %vm171_vm1, %v1461_v12, -inf  ;;  %7215 = vmatmul.mubr.msk.f32.vlgmr.msra.gmra.mrb[16].mxu0 %vm171_vm1, %v1310_v11 }
 0x5fc   :  { %1475 = vmax.xlane.f32.xlu1 %v1474_v15  ;;  %7224 = vmatprep.mubr.msk.f32.mxu0 %vm7939_vm2, %v7938_v39 }
 0x60d   :  { %1741 = vrot.lane.b32.xlu1 %v8092_v47, %s7940_s24 }
 0x611   :  { %2014 = vrot.lane.b32.xlu1 %v8098_v51, %s7941_s25 }
 0x615   :  { %2012 = vrot.lane.b32.xlu1 %v8102_v52, %s7941_s25 }
 0x619   :  { %2090 = vrot.lane.b32.xlu1 %v8115_v55, %s7941_s25 }
 0x61d   :  { %2168 = vrot.lane.b32.xlu1 %v8117_v56, %s7941_s25 }
 0x621   :  { %2246 = vrot.lane.b32.xlu1 %v8130_v57, %s7941_s25 }
 0x685   :  { %v1470_v16 = vpop.xlane.xlu0 %1469 }
 0x686   :  { %v1478_v17 = vsub.f32 %v1305_v8, %v1470_v16 }
 0x688   :  { %v1483_v19 = vmul.f32 1.442695, %v1478_v17 }
 0x689   :  { %v1476_v20 = vpop.xlane.xlu1 %1475 }
 0x68a   :  { %7768 = vpow2.f32 %v1483_v19  ;;  %v1480_v22 = vsub.f32 %v1461_v12, %v1476_v20 }
 0x68c   :  { %v1487_v23 = vmul.f32 1.442695, %v1480_v22 }
 0x68d   :  { %v1742_v58 = vpop.permute.xlu1 %1741 }
 0x68e   :  { %7770 = vpow2.f32 %v1487_v23 }
 0x691   :  { %v2015_v0 = vpop.permute.xlu1 %2014 }
 0x694   :  { %v7769_v24 = vpop.eup %7768 }
 0x695   :  { %v1492_v25 = vsel %vm171_vm1, %v7769_v24, 0.0  ;;  %v2013_v5 = vpop.permute.xlu1 %2012 }
 0x696   :  { %1493 = vadd.xlane.f32.xlu0 %v1492_v25 }
 0x698   :  { %v7771_v26 = vpop.eup %7770 }
 0x699   :  { %v1498_v29 = vsel %vm171_vm1, %v7771_v26, 0.0  ;;  %v2091_v7 = vpop.permute.xlu1 %2090 }
 0x69a   :  { %1499 = vadd.xlane.f32.xlu0 %v1498_v29 }
 0x69d   :  { %v2169_v9 = vpop.permute.xlu1 %2168 }
 0x6a1   :  { %v2247_v11 = vpop.permute.xlu1 %2246 }
 0x6b0   :  { %1587 = vrot.lane.b32.xlu0 %v8088_v43, %s7940_s24 }
 0x6b4   :  { %2092 = vrot.lane.b32.xlu0 %v8096_v50, %s7941_s25 }
 0x6b8   :  { %2170 = vrot.lane.b32.xlu0 %v8107_v54, %s7941_s25 }
 0x6bc   :  { %2248 = vrot.lane.b32.xlu0 %v8105_v53, %s7941_s25 }
 0x6be   :  { %v8240_v30 = vpop.f32.mrb[10].mxu0 }
 0x6bf   :  { %v7186_v31 = vpop.f32.mrb[11].mxu0 }
 0x6c6   :  { %v8242_v32 = vpop.f32.mrb[12].mxu0 }
 0x6c7   :  { %v7196_v34 = vpop.f32.mrb[13].mxu0 }
 0x6ca   :  { %v1227_v36 = vpop.f32.mrb[14].mxu0 }
 0x6cb   :  { %v7206_v38 = vpop.f32.mrb[15].mxu0  ;;  %v1465_v48 = vsel %vm171_vm1, %v1227_v36, -inf }
 0x6ce   :  { %v1383_v40 = vpop.f32.mrb[16].mxu0 }
 0x6cf   :  { %v7216_v44 = vpop.f32.mrb[17].mxu0  ;;  %v1471_v46 = vsel %vm171_vm1, %v1383_v40, -inf }
 0x6d0   :  { %1472 = vmax.xlane.f32.xlu1 %v1471_v46 }
 0x6db   :  { %1466 = vmax.xlane.f32.xlu0 %v1465_v48 }
 0x6e1   :  { %1664 = vrot.lane.b32.xlu1 %v8094_v49, %s7940_s24 }
 0x723   :  { %v1494_v59 = vpop.xlane.xlu0 %1493 }
 0x724   :  { %7772 = vrcp.f32 %v1494_v59 }
 0x727   :  { %v1500_v60 = vpop.xlane.xlu0 %1499 }
 0x728   :  { %7774 = vrcp.f32 %v1500_v60 }
 0x72b   :  { %v1588_v62 = vpop.permute.xlu0 %1587 }
 0x72c   :  { %7228 = vmatpush3.msra.mxu1 %v1588_v62 }
 0x72d   :  { %7237 = vmatprep.subr.mxu1 %v7938_v39 }
 0x72e   :  { %v7773_v63 = vpop.eup %7772 }
 0x72f   :  { %v1504_v1 = vmul.f32 %v7773_v63, %v7769_v24  ;;  %v2093_v6 = vpop.permute.xlu0 %2092 }
 0x731   :  { %7230 = vmatmul.mubr.msk.f32.vlgmr.msra.gmra.mrb[22].mxu1 %vm171_vm1, %v1504_v1 }
 0x732   :  { %v7775_v3 = vpop.eup %7774  ;;  %7238 = vmatpush3.msra.mxu1 %v1742_v58  ;;  %7239 = vmatprep.mubr.msk.f32.mxu1 %vm7939_vm2, %v7938_v39 }
 0x733   :  { %v1508_v4 = vmul.f32 %v7775_v3, %v7771_v26  ;;  %7258 = vmatprep.subr.mxu1 %v7938_v39  ;;  %v2171_v8 = vpop.permute.xlu0 %2170 }
 0x735   :  { %7240 = vmatmul.mubr.msk.f32.vlgmr.msra.gmra.mrb[24].mxu1 %vm171_vm1, %v1508_v4 }
 0x736   :  { %7260 = vmatprep.mubr.msk.f32.mxu1 %vm7939_vm2, %v7938_v39 }
 0x737   :  { %v2249_v10 = vpop.permute.xlu0 %2248 }
 0x739   :  { %7259 = vmatpush3.xpose.msk.msra.mxu1 %vm171_vm1, %v2015_v0 }
 0x73a   :  { %7263 = vmatprep.subr.mxu1 %v7938_v39 }
 0x73c   :  { %7261 = vmatmul.mubr.msk.f32.vlgmr.msra.gmra.mrb[26].mxu1 %vm171_vm1, %v2013_v5 }
 0x73d   :  { %7264 = vmatpush3.xpose.msk.msra.mxu1 %vm171_vm1, %v2093_v6  ;;  %7265 = vmatprep.mubr.msk.f32.mxu1 %vm7939_vm2, %v7938_v39 }
 0x73e   :  { %7268 = vmatprep.subr.mxu1 %v7938_v39 }
 0x740   :  { %7266 = vmatmul.mubr.msk.f32.vlgmr.msra.gmra.mrb[28].mxu1 %vm171_vm1, %v2091_v7 }
 0x741   :  { %7269 = vmatpush3.xpose.msk.msra.mxu1 %vm171_vm1, %v2171_v8  ;;  %7270 = vmatprep.mubr.msk.f32.mxu1 %vm7939_vm2, %v7938_v39 }
 0x742   :  { %7273 = vmatprep.subr.mxu1 %v7938_v39 }
 0x744   :  { %7271 = vmatmul.mubr.msk.f32.vlgmr.msra.gmra.mrb[30].mxu1 %vm171_vm1, %v2169_v9  ;;  %v1817_v9 = vld [vmem:[%s8928_s2 + $0x20] sm:$0xff] }
 0x745   :  { %7274 = vmatpush3.xpose.msk.msra.mxu1 %vm171_vm1, %v2249_v10  ;;  %7275 = vmatprep.mubr.msk.f32.mxu1 %vm7939_vm2, %v7938_v39  ;;  %v1152_v10 = vld [vmem:[%s8928_s2 + $0x18] sm:$0xff] }
 0x746   :  { %7283 = vmatprep.subr.mxu1 %v7938_v39 }
 0x748   :  { %7276 = vmatmul.mubr.msk.f32.vlgmr.msra.gmra.mrb[32].mxu1 %vm171_vm1, %v2247_v11 }
 0x749   :  { %7285 = vmatprep.mubr.msk.f32.mxu1 %vm7939_vm2, %v7938_v39 }
 0x75d   :  { %v1473_v12 = vpop.xlane.xlu1 %1472 }
 0x75e   :  { %v1479_v14 = vsub.f32 %v1383_v40, %v1473_v12 }
 0x760   :  { %v1485_v17 = vmul.f32 1.442695, %v1479_v14 }
 0x761   :  { %v1665_v58 = vpop.permute.xlu1 %1664 }
 0x768   :  { %v1467_v15 = vpop.xlane.xlu0 %1466 }
 0x769   :  { %v1477_v16 = vsub.f32 %v1227_v36, %v1467_v15 }
 0x76b   :  { %v1481_v19 = vmul.f32 1.442695, %v1477_v16 }
 0x76d   :  { %7776 = vpow2.f32 %v1481_v19 }
 0x76e   :  { %7778 = vpow2.f32 %v1485_v17 }
 0x777   :  { %v7777_v20 = vpop.eup %7776 }
 0x778   :  { %v1489_v22 = vsel %vm171_vm1, %v7777_v20, 0.0  ;;  %v7779_v23 = vpop.eup %7778 }
 0x779   :  { %1490 = vadd.xlane.f32.xlu0 %v1489_v22  ;;  %v1495_v24 = vsel %vm171_vm1, %v7779_v23, 0.0 }
 0x77d   :  { %1496 = vadd.xlane.f32.xlu0 %v1495_v24 }
 0x793   :  { %1510 = vrot.lane.b32.xlu0 %v8090_v45, %s7940_s24 }
 0x804   :  { %v8280_v25 = vpop.f32.mrb[22].mxu1 }
 0x805   :  { %v7231_v26 = vpop.f32.mrb[23].mxu1 }
 0x806   :  { %v1491_v29 = vpop.xlane.xlu0 %1490 }
 0x807   :  { %7780 = vrcp.f32 %v1491_v29 }
 0x808   :  { %v8282_v31 = vpop.f32.mrb[24].mxu1 }
 0x809   :  { %v7241_v34 = vpop.f32.mrb[25].mxu1 }
 0x80a   :  { %v1497_v36 = vpop.xlane.xlu0 %1496 }
 0x80b   :  { %7782 = vrcp.f32 %v1497_v36 }
 0x80e   :  { %v1511_v38 = vpop.permute.xlu0 %1510 }
 0x80f   :  { %v2086_v40 = vpop.f32.mrb[26].mxu1  ;;  %7223 = vmatpush3.msra.mxu0 %v1511_v38 }
 0x810   :  { %v7262_v44 = vpop.f32.mrb[27].mxu1  ;;  %v2324_v46 = vsel %vm171_vm1, %v2086_v40, -inf  ;;  %7232 = vmatprep.subr.mxu0 %v7938_v39 }
 0x811   :  { %v7781_v48 = vpop.eup %7780  ;;  %2325 = vmax.xlane.f32.xlu1 %v2324_v46 }
 0x812   :  { %v1502_v59 = vmul.f32 %v7781_v48, %v7777_v20 }
 0x813   :  { %v2164_v60 = vpop.f32.mrb[28].mxu1 }
 0x814   :  { %v7267_v62 = vpop.f32.mrb[29].mxu1  ;;  %v2327_v63 = vsel %vm171_vm1, %v2164_v60, -inf  ;;  %7225 = vmatmul.mubr.msk.f32.vlgmr.msra.gmra.mrb[18].mxu0 %vm171_vm1, %v1502_v59 }
 0x815   :  { %v7783_v0 = vpop.eup %7782  ;;  %2328 = vmax.xlane.f32.xlu0 %v2327_v63  ;;  %7233 = vmatpush3.msra.mxu0 %v1665_v58 }
 0x816   :  { %7234 = vmatprep.mubr.msk.f32.mxu0 %vm7939_vm2, %v7938_v39  ;;  %v1506_v1 = vmul.f32 %v7783_v0, %v7779_v23  ;;  %7242 = vmatprep.subr.mxu0 %v1817_v9 }
 0x817   :  { %v2242_v3 = vpop.f32.mrb[30].mxu1 }
 0x818   :  { %v7272_v4 = vpop.f32.mrb[31].mxu1  ;;  %v2330_v5 = vsel %vm171_vm1, %v2242_v3, -inf  ;;  %7235 = vmatmul.mubr.msk.f32.vlgmr.msra.gmra.mrb[20].mxu0 %vm171_vm1, %v1506_v1 }
 0x819   :  { %2331 = vmax.xlane.f32.xlu0 %v2330_v5  ;;  %7243 = vmatpush3.msra.mxu0 %v1817_v9 }
 0x81a   :  { %7250 = vmatprep.subr.mxu0 %v1152_v10 }
 0x81b   :  { %v2320_v6 = vpop.f32.mrb[32].mxu1 }
 0x81c   :  { %v7277_v7 = vpop.f32.mrb[33].mxu1  ;;  %v2333_v8 = vsel %vm171_vm1, %v2320_v6, -inf }
 0x81d   :  { %2334 = vmax.xlane.f32.xlu1 %v2333_v8 }
 0x89e   :  { %v2326_v11 = vpop.xlane.xlu1 %2325 }
 0x89f   :  { %v2336_v12 = vsub.f32 %v2086_v40, %v2326_v11 }
 0x8a1   :  { %v2340_v14 = vmul.f32 1.442695, %v2336_v12 }
 0x8a2   :  { %v2329_v15 = vpop.xlane.xlu0 %2328 }
 0x8a3   :  { %7784 = vpow2.f32 %v2340_v14  ;;  %v2337_v16 = vsub.f32 %v2164_v60, %v2329_v15 }
 0x8a5   :  { %v2342_v17 = vmul.f32 1.442695, %v2337_v16 }
 0x8a6   :  { %v2332_v19 = vpop.xlane.xlu0 %2331 }
 0x8a7   :  { %7786 = vpow2.f32 %v2342_v17  ;;  %v2338_v20 = vsub.f32 %v2242_v3, %v2332_v19 }
 0x8a9   :  { %v2344_v22 = vmul.f32 1.442695, %v2338_v20 }
 0x8aa   :  { %v2335_v38 = vpop.xlane.xlu1 %2334 }
 0x8ab   :  { %7788 = vpow2.f32 %v2344_v22  ;;  %v2339_v40 = vsub.f32 %v2320_v6, %v2335_v38 }
 0x8ad   :  { %v7785_v23 = vpop.eup %7784  ;;  %v2346_v44 = vmul.f32 1.442695, %v2339_v40 }
 0x8ae   :  { %v2348_v24 = vsel %vm171_vm1, %v7785_v23, 0.0 }
 0x8af   :  { %2349 = vadd.xlane.f32.xlu0 %v2348_v24  ;;  %7790 = vpow2.f32 %v2346_v44 }
 0x8b1   :  { %v7787_v26 = vpop.eup %7786 }
 0x8b2   :  { %v2351_v29 = vsel %vm171_vm1, %v7787_v26, 0.0 }
 0x8b3   :  { %2352 = vadd.xlane.f32.xlu1 %v2351_v29 }
 0x8b5   :  { %v8301_v34 = vpop.eup %7788 }
 0x8b6   :  { %v2354_v36 = vsel %vm171_vm1, %v8301_v34, 0.0 }
 0x8b7   :  { %2355 = vadd.xlane.f32.xlu0 %v2354_v36 }
 0x8b9   :  { %v7791_v48 = vpop.eup %7790 }
 0x8c4   :  { %2444 = vrot.lane.b32.xlu1 %v8088_v43, %s7941_s25 }
 0x8c8   :  { %2520 = vrot.lane.b32.xlu1 %v8094_v49, %s7941_s25 }
 0x8cd   :  { %2368 = vrot.lane.b32.xlu0 %v8090_v45, %s7941_s25 }
 0x8d1   :  { %2776 = vrot.lane.b32.xlu0 %v8098_v51, %s7942_s30 }
 0x8d5   :  { %2854 = vrot.lane.b32.xlu0 %v8096_v50, %s7942_s30  ;;  %v2357_v50 = vsel %vm171_vm1, %v7791_v48, 0.0 }
 0x8d9   :  { %2932 = vrot.lane.b32.xlu0 %v8107_v54, %s7942_s30 }
 0x8dd   :  { %2930 = vrot.lane.b32.xlu0 %v8117_v56, %s7942_s30 }
 0x8e7   :  { %v1582_v46 = vpop.f32.mrb[18].mxu0 }
 0x8e8   :  { %v7226_v59 = vpop.f32.mrb[19].mxu0  ;;  %7244 = vmatprep.mubr.msk.f32.mxu0 %vm171_vm1, %v1582_v46 }
 0x8e9   :  { %7245 = vmatmul.mubr.msk.f32.vlgmr.msra.gmra.mrb[22].mxu0 %vm171_vm1, %v8280_v25 }
 0x8ea   :  { %7251 = vmatpush3.msra.mxu0 %v1152_v10 }
 0x8eb   :  { %v1736_v51 = vpop.f32.mrb[20].mxu0  ;;  %7278 = vmatprep.subr.mxu0 %v7938_v39 }
 0x8ec   :  { %2358 = vadd.xlane.f32.xlu1 %v2357_v50  ;;  %v7236_v54 = vpop.f32.mrb[21].mxu0  ;;  %7247 = vmatprep.mubr.msk.f32.mxu0 %vm171_vm1, %v1736_v51 }
 0x8ed   :  { %7248 = vmatmul.mubr.msk.f32.gmra.mrb[24].mxu0 %vm171_vm1, %v8282_v31 }
 0x8ee   :  { %7252 = vmatprep.mubr.msk.f32.mxu0 %vm171_vm1, %v8240_v30 }
 0x8f1   :  { %7253 = vmatmul.mubr.msk.f32.vlgmr.msra.gmra.mrb[22].mxu0 %vm171_vm1, %v8195_v61 }
 0x8f2   :  { %7255 = vmatprep.mubr.msk.f32.mxu0 %vm171_vm1, %v8242_v32 }
 0x8f5   :  { %7256 = vmatmul.mubr.msk.f32.gmra.mrb[24].mxu0 %vm171_vm1, %v8201_v2 }
 0x8f6   :  { %7280 = vmatprep.mubr.msk.f32.mxu0 %vm7939_vm2, %v7938_v39 }
 0x8fd   :  { %2596 = vrot.lane.b32.xlu1 %v8092_v47, %s7941_s25 }
 0x901   :  { %2774 = vrot.lane.b32.xlu1 %v8102_v52, %s7942_s30 }
 0x905   :  { %2852 = vrot.lane.b32.xlu1 %v8115_v55, %s7942_s30 }
 0x909   :  { %3010 = vrot.lane.b32.xlu1 %v8105_v53, %s7942_s30  ;;  %v2672_v53 = vld [vmem:[%s8928_s2 + $0x28] sm:$0xff] }
 0x90d   :  { %3008 = vrot.lane.b32.xlu1 %v8130_v57, %s7942_s30 }
 0x93c   :  { %v2350_v56 = vpop.xlane.xlu0 %2349 }
 0x93d   :  { %7792 = vrcp.f32 %v2350_v56 }
 0x940   :  { %v2353_v61 = vpop.xlane.xlu1 %2352 }
 0x941   :  { %7794 = vrcp.f32 %v2353_v61 }
 0x944   :  { %v2356_v2 = vpop.xlane.xlu0 %2355  ;;  %v2445_v30 = vpop.permute.xlu1 %2444 }
 0x945   :  { %7796 = vrcp.f32 %v2356_v2  ;;  %7284 = vmatpush3.msra.mxu1 %v2445_v30 }
 0x946   :  { %7293 = vmatprep.subr.mxu1 %v7938_v39 }
 0x947   :  { %v7793_v52 = vpop.eup %7792 }
 0x948   :  { %v2361_v32 = vmul.f32 %v7793_v52, %v7785_v23  ;;  %v2369_v25 = vpop.permute.xlu0 %2368  ;;  %v2521_v55 = vpop.permute.xlu1 %2520 }
 0x949   :  { %7279 = vmatpush3.msra.mxu0 %v2369_v25 }
 0x94a   :  { %7281 = vmatmul.mubr.msk.f32.vlgmr.msra.gmra.mrb[26].mxu0 %vm171_vm1, %v2361_v32  ;;  %7288 = vmatprep.subr.mxu0 %v7938_v39 }
 0x94b   :  { %v7795_v57 = vpop.eup %7794  ;;  %7289 = vmatpush3.msra.mxu0 %v2521_v55  ;;  %7290 = vmatprep.mubr.msk.f32.mxu0 %vm7939_vm2, %v7938_v39 }
 0x94c   :  { %v2363_v31 = vmul.f32 %v7795_v57, %v7787_v26  ;;  %7298 = vmatprep.subr.mxu0 %v2672_v53  ;;  %v2777_v3 = vpop.permute.xlu0 %2776 }
 0x94e   :  { %7286 = vmatmul.mubr.msk.f32.vlgmr.msra.gmra.mrb[34].mxu1 %vm171_vm1, %v2363_v31 }
 0x94f   :  { %v7797_v60 = vpop.eup %7796  ;;  %7295 = vmatprep.mubr.msk.f32.mxu1 %vm7939_vm2, %v7938_v39 }
 0x950   :  { %v2365_v58 = vmul.f32 %v7797_v60, %v8301_v34  ;;  %v2855_v6 = vpop.permute.xlu0 %2854 }
 0x952   :  { %7291 = vmatmul.mubr.msk.f32.vlgmr.msra.gmra.mrb[28].mxu0 %vm171_vm1, %v2365_v58 }
 0x953   :  { %7299 = vmatpush3.msra.mxu0 %v2672_v53 }
 0x954   :  { %7316 = vmatprep.subr.mxu0 %v7938_v39  ;;  %v2933_v12 = vpop.permute.xlu0 %2932 }
 0x958   :  { %v2931_v20 = vpop.permute.xlu0 %2930 }
 0x979   :  { %v2359_v62 = vpop.xlane.xlu1 %2358 }
 0x97a   :  { %7798 = vrcp.f32 %v2359_v62 }
 0x97d   :  { %v2597_v63 = vpop.permute.xlu1 %2596 }
 0x97e   :  { %7294 = vmatpush3.msra.mxu1 %v2597_v63 }
 0x97f   :  { %7306 = vmatprep.subr.mxu1 %v7938_v39 }
 0x981   :  { %v2775_v0 = vpop.permute.xlu1 %2774 }
 0x984   :  { %v7799_v1 = vpop.eup %7798 }
 0x985   :  { %v2367_v4 = vmul.f32 %v7799_v1, %v7791_v48  ;;  %v2853_v5 = vpop.permute.xlu1 %2852 }
 0x987   :  { %7296 = vmatmul.mubr.msk.f32.vlgmr.msra.gmra.mrb[36].mxu1 %vm171_vm1, %v2367_v4 }
 0x988   :  { %7307 = vmatpush3.xpose.msk.msra.mxu1 %vm171_vm1, %v2777_v3  ;;  %7308 = vmatprep.mubr.msk.f32.mxu1 %vm7939_vm2, %v7938_v39 }
 0x989   :  { %7311 = vmatprep.subr.mxu1 %v7938_v39  ;;  %v3011_v7 = vpop.permute.xlu1 %3010 }
 0x98b   :  { %7309 = vmatmul.mubr.msk.f32.vlgmr.msra.gmra.mrb[38].mxu1 %vm171_vm1, %v2775_v0 }
 0x98c   :  { %7312 = vmatpush3.xpose.msk.msra.mxu1 %vm171_vm1, %v2855_v6  ;;  %7313 = vmatprep.mubr.msk.f32.mxu1 %vm7939_vm2, %v7938_v39 }
 0x98d   :  { %7321 = vmatprep.subr.mxu1 %v7938_v39  ;;  %v3009_v8 = vpop.permute.xlu1 %3008 }
 0x98f   :  { %7314 = vmatmul.mubr.msk.f32.vlgmr.msra.gmra.mrb[40].mxu1 %vm171_vm1, %v2853_v5 }
 0x990   :  { %7322 = vmatpush3.xpose.msk.msra.mxu1 %vm171_vm1, %v3011_v7  ;;  %7323 = vmatprep.mubr.msk.f32.mxu1 %vm7939_vm2, %v7938_v39 }
 0x991   :  { %7331 = vmatprep.subr.mxu1 %v7938_v39 }
 0x993   :  { %7324 = vmatmul.mubr.msk.f32.vlgmr.msra.gmra.mrb[42].mxu1 %vm171_vm1, %v3009_v8 }
 0x994   :  { %7333 = vmatprep.mubr.msk.f32.mxu1 %vm7939_vm2, %v7938_v39 }
 0xa1d   :  { %v2440_v9 = vpop.f32.mrb[26].mxu0 }
 0xa1e   :  { %v7282_v10 = vpop.f32.mrb[27].mxu0  ;;  %7300 = vmatprep.mubr.msk.f32.mxu0 %vm171_vm1, %v2440_v9 }
 0xa21   :  { %v2516_v11 = vpop.f32.mrb[34].mxu1 }
 0xa22   :  { %v7287_v14 = vpop.f32.mrb[35].mxu1  ;;  %7301 = vmatmul.mubr.msk.f32.vlgmr.msra.gmra.mrb[22].mxu0 %vm171_vm1, %v2516_v11 }
 0xa23   :  { %7317 = vmatpush3.xpose.msk.msra.mxu0 %vm171_vm1, %v2933_v12 }
 0xa24   :  { %7326 = vmatprep.subr.mxu0 %v7938_v39 }
 0xa25   :  { %v2592_v15 = vpop.f32.mrb[28].mxu0 }
 0xa26   :  { %v7292_v16 = vpop.f32.mrb[29].mxu0  ;;  %7303 = vmatprep.mubr.msk.f32.mxu0 %vm171_vm1, %v2592_v15  ;;  %v3434_v15 = vld [vmem:[%s8928_s2 + $0x30] sm:$0xff] }
 0xa5a   :  { %v2668_v17 = vpop.f32.mrb[36].mxu1 }
 0xa5b   :  { %v7297_v19 = vpop.f32.mrb[37].mxu1  ;;  %7304 = vmatmul.mubr.msk.f32.gmra.mrb[24].mxu0 %vm171_vm1, %v2668_v17 }
 0xa5c   :  { %7318 = vmatprep.mubr.msk.f32.mxu0 %vm7939_vm2, %v7938_v39 }
 0xa5e   :  { %v2848_v22 = vpop.f32.mrb[38].mxu1 }
 0xa5f   :  { %v7310_v23 = vpop.f32.mrb[39].mxu1  ;;  %7319 = vmatmul.mubr.msk.f32.vlgmr.msra.gmra.mrb[30].mxu0 %vm171_vm1, %v2931_v20  ;;  %v3086_v24 = vsel %vm171_vm1, %v2848_v22, -inf }
 0xa60   :  { %3087 = vmax.xlane.f32.xlu0 %v3086_v24  ;;  %7328 = vmatprep.mubr.msk.f32.mxu0 %vm7939_vm2, %v7938_v39 }
 0xa62   :  { %v2926_v26 = vpop.f32.mrb[40].mxu1 }
 0xa63   :  { %v7315_v29 = vpop.f32.mrb[41].mxu1  ;;  %v3089_v34 = vsel %vm171_vm1, %v2926_v26, -inf }
 0xa64   :  { %3090 = vmax.xlane.f32.xlu1 %v3089_v34 }
 0xa66   :  { %v3082_v36 = vpop.f32.mrb[42].mxu1 }
 0xa67   :  { %v7325_v38 = vpop.f32.mrb[43].mxu1  ;;  %v3095_v30 = vsel %vm171_vm1, %v3082_v36, -inf }
 0xaed   :  { %v3088_v50 = vpop.xlane.xlu0 %3087 }
 0xaee   :  { %v3098_v51 = vsub.f32 %v2848_v22, %v3088_v50 }
 0xaf0   :  { %v3102_v54 = vmul.f32 1.442695, %v3098_v51 }
 0xaf1   :  { %v3091_v40 = vpop.xlane.xlu1 %3090 }
 0xaf2   :  { %v3099_v44 = vsub.f32 %v2926_v26, %v3091_v40 }
 0xaf4   :  { %v3104_v46 = vmul.f32 1.442695, %v3099_v44 }
 0xaf6   :  { %7800 = vpow2.f32 %v3104_v46 }
 0xaf7   :  { %7802 = vpow2.f32 %v3102_v54 }
 0xb00   :  { %v7801_v48 = vpop.eup %7800 }
 0xb01   :  { %v3113_v59 = vsel %vm171_vm1, %v7801_v48, 0.0  ;;  %v7803_v52 = vpop.eup %7802 }
 0xb02   :  { %3114 = vadd.xlane.f32.xlu1 %v3113_v59  ;;  %v3110_v32 = vsel %vm171_vm1, %v7803_v52, 0.0 }
 0xb32   :  { %v3004_v56 = vpop.f32.mrb[30].mxu0 }
 0xb33   :  { %v7320_v61 = vpop.f32.mrb[31].mxu0  ;;  %v3092_v2 = vsel %vm171_vm1, %v3004_v56, -inf }
 0xb34   :  { %3093 = vmax.xlane.f32.xlu0 %v3092_v2 }
 0xb38   :  { %3096 = vmax.xlane.f32.xlu0 %v3095_v30 }
 0xb3c   :  { %3111 = vadd.xlane.f32.xlu0 %v3110_v32 }
 0xb8f   :  { %v3115_v3 = vpop.xlane.xlu1 %3114 }
 0xbc1   :  { %v3094_v25 = vpop.xlane.xlu0 %3093 }
 0xbc2   :  { %v3100_v53 = vsub.f32 %v3004_v56, %v3094_v25 }
 0xbc4   :  { %v3106_v55 = vmul.f32 1.442695, %v3100_v53 }
 0xbc5   :  { %v3097_v57 = vpop.xlane.xlu0 %3096 }
 0xbc6   :  { %7804 = vpow2.f32 %v3106_v55  ;;  %v3101_v31 = vsub.f32 %v3082_v36, %v3097_v57 }
 0xbc8   :  { %v3108_v60 = vmul.f32 1.442695, %v3101_v31 }
 0xbc9   :  { %v3112_v1 = vpop.xlane.xlu0 %3111 }
 0xbca   :  { %7806 = vpow2.f32 %v3108_v60 }
 0xbcb   :  { %7808 = vrcp.f32 %v3112_v1 }
 0xbcc   :  { %7810 = vrcp.f32 %v3115_v3 }
 0xbd0   :  { %v7805_v58 = vpop.eup %7804 }
 0xbd1   :  { %v3116_v62 = vsel %vm171_vm1, %v7805_v58, 0.0 }
 0xbd2   :  { %3117 = vadd.xlane.f32.xlu0 %v3116_v62 }
 0xbd4   :  { %v7807_v63 = vpop.eup %7806 }
 0xbd5   :  { %v3119_v0 = vsel %vm171_vm1, %v7807_v63, 0.0  ;;  %v7809_v5 = vpop.eup %7808 }
 0xbd6   :  { %3120 = vadd.xlane.f32.xlu1 %v3119_v0  ;;  %v3123_v8 = vmul.f32 %v7809_v5, %v7803_v52  ;;  %v3540_v5 = vld [vmem:[%s8928_s2 + $0x38] sm:$0xff] }
 0xbe7   :  { %3206 = vrot.lane.b32.xlu1 %v8088_v43, %s7942_s30  ;;  %v7811_v43 = vpop.eup %7810 }
 0xbe8   :  { %3130 = vrot.lane.b32.xlu0 %v8090_v45, %s7942_s30  ;;  %v3125_v45 = vmul.f32 %v7811_v43, %v7801_v48 }
 0xbeb   :  { %3282 = vrot.lane.b32.xlu1 %v8094_v49, %s7942_s30 }
 0xbef   :  { %3358 = vrot.lane.b32.xlu1 %v8092_v47, %s7942_s30 }
 0xc5f   :  { %v3118_v4 = vpop.xlane.xlu0 %3117 }
 0xc60   :  { %7812 = vrcp.f32 %v3118_v4 }
 0xc63   :  { %v3121_v6 = vpop.xlane.xlu1 %3120  ;;  %v3131_v7 = vpop.permute.xlu0 %3130 }
 0xc64   :  { %7814 = vrcp.f32 %v3121_v6  ;;  %7327 = vmatpush3.msra.mxu0 %v3131_v7  ;;  %v6785_v6 = vld [vmem:[%s8928_s2 + $0x48] sm:$0xff] }
 0xc65   :  { %7329 = vmatmul.mubr.msk.f32.vlgmr.msra.gmra.mrb[32].mxu0 %vm171_vm1, %v3123_v8  ;;  %7336 = vmatprep.subr.mxu0 %v7938_v39 }
 0xc66   :  { %7338 = vmatprep.mubr.msk.f32.mxu0 %vm7939_vm2, %v7938_v39 }
 0xc67   :  { %v3207_v47 = vpop.permute.xlu1 %3206 }
 0xc68   :  { %7332 = vmatpush3.msra.mxu1 %v3207_v47 }
 0xc69   :  { %7334 = vmatmul.mubr.msk.f32.vlgmr.msra.gmra.mrb[44].mxu1 %vm171_vm1, %v3125_v45  ;;  %7341 = vmatprep.subr.mxu1 %v7938_v39 }
 0xc6a   :  { %v7813_v49 = vpop.eup %7812  ;;  %7343 = vmatprep.mubr.msk.f32.mxu1 %vm7939_vm2, %v7938_v39 }
 0xc6b   :  { %v3283_v9 = vpop.permute.xlu1 %3282  ;;  %v3127_v10 = vmul.f32 %v7813_v49, %v7805_v58 }
 0xc6c   :  { %7337 = vmatpush3.msra.mxu0 %v3283_v9 }
 0xc6d   :  { %7339 = vmatmul.mubr.msk.f32.vlgmr.msra.gmra.mrb[34].mxu0 %vm171_vm1, %v3127_v10  ;;  %7346 = vmatprep.subr.mxu0 %v3434_v15 }
 0xc6e   :  { %v7815_v11 = vpop.eup %7814  ;;  %7347 = vmatpush3.msra.mxu0 %v3434_v15 }
 0xc6f   :  { %v3129_v12 = vmul.f32 %v7815_v11, %v7807_v63  ;;  %v3359_v14 = vpop.permute.xlu1 %3358 }
 0xc70   :  { %7342 = vmatpush3.msra.mxu1 %v3359_v14 }
 0xc71   :  { %7344 = vmatmul.mubr.msk.f32.vlgmr.msra.gmra.mrb[46].mxu1 %vm171_vm1, %v3129_v12  ;;  %7354 = vmatprep.subr.mxu1 %v3540_v5 }
 0xc72   :  { %7355 = vmatpush3.msra.mxu1 %v3540_v5 }
 0xc73   :  { %7370 = vmatprep.subr.mxu1 %v6785_v6 }
 0xd38   :  { %v3202_v16 = vpop.f32.mrb[32].mxu0 }
 0xd39   :  { %v7330_v17 = vpop.f32.mrb[33].mxu0  ;;  %7348 = vmatprep.mubr.msk.f32.mxu0 %vm171_vm1, %v3202_v16  ;;  %v6771_v16 = vld [vmem:[%s8929_s3 + $0xc] ss:$0 sm:$0xff] }
 0xd3c   :  { %v3278_v39 = vpop.f32.mrb[44].mxu1 }
 0xd3d   :  { %v7335_v19 = vpop.f32.mrb[45].mxu1  ;;  %7349 = vmatmul.mubr.msk.f32.vlgmr.msra.gmra.mrb[22].mxu0 %vm171_vm1, %v3278_v39 }
 0xd40   :  { %v3354_v20 = vpop.f32.mrb[34].mxu0 }
 0xd41   :  { %v7340_v22 = vpop.f32.mrb[35].mxu0  ;;  %7351 = vmatprep.mubr.msk.f32.mxu0 %vm171_vm1, %v3354_v20 }
 0xd42   :  { %v6772_v22 = vld [vmem:[%s8929_s3 + $0xd] ss:$0 sm:$0xff] }
 0xd44   :  { %v3430_v23 = vpop.f32.mrb[46].mxu1 }
 0xd45   :  { %v7345_v24 = vpop.f32.mrb[47].mxu1  ;;  %7352 = vmatmul.mubr.msk.f32.gmra.mrb[24].mxu0 %vm171_vm1, %v3430_v23 }
 0xe10   :  { %v7350_v26 = vpop.f32.mrb[22].mxu0 }
 0xe11   :  { %v8425_v29 = vadd.f32 %v7350_v26, %v8021_v37  ;;  %v3513_v34 = vpop.f32.mrb[23].mxu0 }
 0xe12   :  { %v8428_v36 = vadd.f32 %v3513_v34, %v8019_v35 }
 0xe13   :  { %v3545_v38 = vsel %vm171_vm1, %v8425_v29, 0.0 }
 0xe14   :  { %3546 = vadd.xlane.f32.xlu1 %v3545_v38  ;;  %v3542_v40 = vsel %vm171_vm1, %v8428_v36, 0.0  ;;  %v6787_v38 = vld [vmem:[%s8928_s2 + $0x58] sm:$0xff] }
 0xe15   :  { %3543 = vadd.xlane.f32.xlu0 %v3542_v40 }
 0xe18   :  { %v7353_v44 = vpop.f32.mrb[24].mxu0 }
 0xe19   :  { %v3523_v46 = vpop.f32.mrb[25].mxu0  ;;  %v8438_v59 = vadd.f32 %v7353_v44, %v8027_v42 }
 0xe1a   :  { %v8435_v48 = vadd.f32 %v3523_v46, %v8025_v41  ;;  %v6788_v46 = vld [vmem:[%s8929_s3 + $0x12] ss:$0 sm:$0xff] }
 0xe1b   :  { %v3551_v51 = vsel %vm171_vm1, %v8438_v59, 0.0 }
 0xe1c   :  { %v3548_v50 = vsel %vm171_vm1, %v8435_v48, 0.0 }
 0xe1d   :  { %3549 = vadd.xlane.f32.xlu0 %v3548_v50 }
 0xe21   :  { %3552 = vadd.xlane.f32.xlu0 %v3551_v51 }
 0xea1   :  { %v3547_v54 = vpop.xlane.xlu1 %3546 }
 0xea2   :  { %v3555_v56 = vmul.f32 0.125, %v3547_v54  ;;  %v3544_v61 = vpop.xlane.xlu0 %3543 }
 0xea3   :  { %v3554_v2 = vmul.f32 0.125, %v3544_v61  ;;  %v3908_v61 = vmul.f32 %v6788_v46, %v8055_v21  ;;  %v3911_v21 = vmul.f32 %v6788_v46, %v8069_v33  ;;  %v6773_v33 = vld [vmem:[%s8929_s3 + $0x10] ss:$0 sm:$0xff] }
 0xea4   :  { %v3559_v30 = vsub.f32 %v8425_v29, %v3555_v56 }
 0xea5   :  { %v3558_v52 = vsub.f32 %v8428_v36, %v3554_v2 }
 0xea6   :  { %v3563_v32 = vmul.f32 %v3559_v30, %v3559_v30 }
 0xea7   :  { %v3562_v25 = vmul.f32 %v3558_v52, %v3558_v52 }
 0xea8   :  { %v3569_v53 = vsel %vm171_vm1, %v3563_v32, 0.0 }
 0xea9   :  { %3570 = vadd.xlane.f32.xlu1 %v3569_v53  ;;  %v3566_v55 = vsel %vm171_vm1, %v3562_v25, 0.0  ;;  %v3910_v53 = vmul.f32 %v6788_v46, %v8063_v28  ;;  %v6786_v28 = vld [vmem:[%s8928_s2 + $0x50] sm:$0xff] }
 0xeaa   :  { %3567 = vadd.xlane.f32.xlu0 %v3566_v55  ;;  %v3550_v57 = vpop.xlane.xlu0 %3549 }
 0xeab   :  { %v3556_v31 = vmul.f32 0.125, %v3550_v57 }
 0xead   :  { %v3560_v60 = vsub.f32 %v8435_v48, %v3556_v31 }
 0xeae   :  { %v3553_v58 = vpop.xlane.xlu0 %3552 }
 0xeaf   :  { %v3557_v62 = vmul.f32 0.125, %v3553_v58  ;;  %v3564_v63 = vmul.f32 %v3560_v60, %v3560_v60 }
 0xeb1   :  { %v3561_v0 = vsub.f32 %v8438_v59, %v3557_v62  ;;  %v3572_v1 = vsel %vm171_vm1, %v3564_v63, 0.0 }
 0xeb2   :  { %3573 = vadd.xlane.f32.xlu0 %v3572_v1 }
 0xeb3   :  { %v3565_v3 = vmul.f32 %v3561_v0, %v3561_v0 }
 0xeb5   :  { %v3575_v4 = vsel %vm171_vm1, %v3565_v3, 0.0 }
 0xeb6   :  { %3576 = vadd.xlane.f32.xlu1 %v3575_v4 }
 0xf36   :  { %v3571_v7 = vpop.xlane.xlu1 %3570 }
 0xf37   :  { %v3579_v8 = vmul.f32 0.125, %v3571_v7  ;;  %v3568_v43 = vpop.xlane.xlu0 %3567 }
 0xf38   :  { %v3578_v45 = vmul.f32 0.125, %v3568_v43 }
 0xf39   :  { %v3583_v47 = vadd.f32 1e-06, %v3579_v8 }
 0xf3a   :  { %v3582_v49 = vadd.f32 1e-06, %v3578_v45 }
 0xf3b   :  { %7816 = vrsqrt.f32 %v3583_v47 }
 0xf3c   :  { %7818 = vrsqrt.f32 %v3582_v49 }
 0xf3f   :  { %v3574_v9 = vpop.xlane.xlu0 %3573 }
 0xf40   :  { %v3580_v10 = vmul.f32 0.125, %v3574_v9 }
 0xf42   :  { %v3584_v11 = vadd.f32 1e-06, %v3580_v10 }
 0xf43   :  { %v3577_v12 = vpop.xlane.xlu1 %3576 }
 0xf44   :  { %7820 = vrsqrt.f32 %v3584_v11  ;;  %v3581_v14 = vmul.f32 0.125, %v3577_v12 }
 0xf45   :  { %v7817_v15 = vpop.eup %7816 }
 0xf46   :  { %v7819_v17 = vpop.eup %7818  ;;  %v3591_v39 = vmul.f32 %v7817_v15, %v3559_v30  ;;  %v3585_v19 = vadd.f32 1e-06, %v3581_v14  ;;  %v6789_v30 = vld [vmem:[%s8929_s3 + $0x13] ss:$0 sm:$0xff] }
 0xf47   :  { %v3590_v20 = vmul.f32 %v7819_v17, %v3558_v52  ;;  %v3909_v52 = vmul.f32 %v6788_v46, %v8061_v27  ;;  %v3916_v25 = vadd.f32 %v6789_v30, %v3908_v61  ;;  %v3918_v57 = vadd.f32 %v6789_v30, %v3910_v53  ;;  %v3541_v27 = vld [vmem:[%s8928_s2 + $0x40] sm:$0xff] }
 0xf48   :  { %7822 = vrsqrt.f32 %v3585_v19  ;;  %v3599_v23 = vmul.f32 %v6771_v16, %v3591_v39  ;;  %v3919_v31 = vadd.f32 %v6789_v30, %v3911_v21  ;;  %7362 = vmatprep.subr.mxu0 %v3541_v27 }
 0xf49   :  { %v3598_v24 = vmul.f32 %v6771_v16, %v3590_v20  ;;  %v3917_v55 = vadd.f32 %v6789_v30, %v3909_v52  ;;  %7363 = vmatpush3.msra.mxu0 %v3541_v27 }
 0xf4a   :  { %v3607_v34 = vadd.f32 %v6772_v22, %v3599_v23  ;;  %7378 = vmatprep.subr.mxu0 %v6786_v28 }
 0xf4b   :  { %v3606_v26 = vadd.f32 %v6772_v22, %v3598_v24 }
 0xf4d   :  { %7356 = vmatprep.mubr.msk.f32.mxu1 %vm171_vm1, %v3606_v26 }
 0xf4e   :  { %v7821_v40 = vpop.eup %7820  ;;  %7357 = vmatmul.mubr.msk.f32.vlgmr.msra.gmra.mrb[48].mxu1 %vm171_vm1, %v3607_v34 }
 0xf4f   :  { %v3592_v44 = vmul.f32 %v7821_v40, %v3560_v60  ;;  %7371 = vmatpush3.msra.mxu1 %v6785_v6 }
 0xf50   :  { %7386 = vmatprep.subr.mxu1 %v6787_v38 }
 0xf51   :  { %v3600_v50 = vmul.f32 %v6771_v16, %v3592_v44 }
 0xf52   :  { %v7823_v51 = vpop.eup %7822 }
 0xf53   :  { %v3608_v54 = vadd.f32 %v6772_v22, %v3600_v50  ;;  %v3593_v56 = vmul.f32 %v7823_v51, %v3561_v0 }
 0xf55   :  { %7359 = vmatprep.mubr.msk.f32.mxu1 %vm171_vm1, %v3608_v54  ;;  %v3601_v2 = vmul.f32 %v6771_v16, %v3593_v56 }
 0xf57   :  { %v3609_v32 = vadd.f32 %v6772_v22, %v3601_v2 }
 0xf59   :  { %7360 = vmatmul.mubr.msk.f32.gmra.mrb[50].mxu1 %vm171_vm1, %v3609_v32 }
 0xf5a   :  { %7372 = vmatprep.mubr.msk.f32.mxu1 %vm171_vm1, %v3916_v25 }
 0xf5d   :  { %7373 = vmatmul.mubr.msk.f32.vlgmr.msra.gmra.mrb[52].mxu1 %vm171_vm1, %v3917_v55 }
 0xf5e   :  { %7375 = vmatprep.mubr.msk.f32.mxu1 %vm171_vm1, %v3918_v57  ;;  %7387 = vmatpush3.msra.mxu1 %v6787_v38 }
 0xf61   :  { %7376 = vmatmul.mubr.msk.f32.gmra.mrb[54].mxu1 %vm171_vm1, %v3919_v31 }
 0xf62   :  { %7388 = vmatprep.mubr.msk.f32.mxu1 %vm171_vm1, %v3916_v25 }
 0xf65   :  { %7389 = vmatmul.mubr.msk.f32.vlgmr.msra.gmra.mrb[56].mxu1 %vm171_vm1, %v3917_v55 }
 0xf66   :  { %7391 = vmatprep.mubr.msk.f32.mxu1 %vm171_vm1, %v3918_v57 }
 0xf69   :  { %7392 = vmatmul.mubr.msk.f32.gmra.mrb[58].mxu1 %vm171_vm1, %v3919_v31 }
0x1021   :  { %v7358_v60 = vpop.f32.mrb[48].mxu1 }
0x1022   :  { %v3698_v58 = vadd.f32 %v7358_v60, %v6773_v33  ;;  %v3692_v62 = vpop.f32.mrb[49].mxu1 }
0x1023   :  { %v3693_v63 = vadd.f32 %v6773_v33, %v3692_v62 }
0x1024   :  { %v3712_v1 = vmax.f32 %v3698_v58, 0.0 }
0x1025   :  { %v3711_v0 = vmax.f32 %v3693_v63, 0.0 }
0x1027   :  { %7364 = vmatprep.mubr.msk.f32.mxu0 %vm171_vm1, %v3711_v0 }
0x1028   :  { %7365 = vmatmul.mubr.msk.f32.vlgmr.msra.gmra.mrb[36].mxu0 %vm171_vm1, %v3712_v1 }
0x1029   :  { %7379 = vmatpush3.msra.mxu0 %v6786_v28 }
0x102c   :  { %v7361_v3 = vpop.f32.mrb[50].mxu1 }
0x102d   :  { %v3708_v4 = vadd.f32 %v7361_v3, %v6773_v33  ;;  %v3702_v5 = vpop.f32.mrb[51].mxu1 }
0x102e   :  { %v3703_v6 = vadd.f32 %v6773_v33, %v3702_v5 }
0x102f   :  { %v3714_v43 = vmax.f32 %v3708_v4, 0.0 }
0x1030   :  { %v3713_v7 = vmax.f32 %v3703_v6, 0.0  ;;  %v7374_v8 = vpop.f32.mrb[52].mxu1 }
0x1031   :  { %v3998_v45 = vpop.f32.mrb[53].mxu1  ;;  %v8544_v56 = vmul.f32 0.35355338, %v7374_v8 }
0x1032   :  { %7367 = vmatprep.mubr.msk.f32.mxu0 %vm171_vm1, %v3713_v7  ;;  %v8509_v11 = vmul.f32 0.35355338, %v3998_v45 }
0x1033   :  { %7368 = vmatmul.mubr.msk.f32.gmra.mrb[38].mxu0 %vm171_vm1, %v3714_v43 }
0x1034   :  { %v7377_v47 = vpop.f32.mrb[54].mxu1  ;;  %7380 = vmatprep.mubr.msk.f32.mxu0 %vm171_vm1, %v3916_v25 }
0x1035   :  { %v4008_v49 = vpop.f32.mrb[55].mxu1  ;;  %v8548_v61 = vmul.f32 0.35355338, %v7377_v47 }
0x1036   :  { %v8503_v9 = vmul.f32 0.35355338, %v4008_v49 }
0x1037   :  { %7381 = vmatmul.mubr.msk.f32.vlgmr.msra.gmra.mrb[40].mxu0 %vm171_vm1, %v3917_v55 }
0x1038   :  { %7383 = vmatprep.mubr.msk.f32.mxu0 %vm171_vm1, %v3918_v57  ;;  %v7390_v10 = vpop.f32.mrb[56].mxu1  ;;  %7405 = vmatprep.mubr.msk.f32.mxu1 %vm171_vm1, %v8503_v9 }
0x1039   :  { %v4172_v12 = vpop.f32.mrb[57].mxu1 }
0x103a   :  { %v8511_v14 = vpack.i.bf16 %v7390_v10, %v4172_v12  ;;  %v7582_v15 = vpack.c.bf16 %v7390_v10, %v4172_v12 }
0x103b   :  { %7384 = vmatmul.mubr.msk.f32.gmra.mrb[42].mxu0 %vm171_vm1, %v3919_v31 }
0x103c   :  { %v7393_v16 = vpop.f32.mrb[58].mxu1  ;;  %7398 = vmatprep.mubr.msk.f32.mxu0 %vm171_vm1, %v8509_v11 }
0x103d   :  { %v4182_v17 = vpop.f32.mrb[59].mxu1 }
0x103e   :  { %v8516_v39 = vpack.i.bf16 %v7393_v16, %v4182_v17  ;;  %v7586_v19 = vpack.c.bf16 %v7393_v16, %v4182_v17 }
0x10fb   :  { %v8518_v20 = vpop.f32.mrb[36].mxu0 }
0x10fc   :  { %v8520_v22 = vpop.f32.mrb[37].mxu0 }
0x1106   :  { %v8522_v23 = vpop.f32.mrb[38].mxu0 }
0x1107   :  { %v8524_v24 = vpop.f32.mrb[39].mxu0 }
0x110a   :  { %v7382_v26 = vpop.f32.mrb[40].mxu0 }
0x110b   :  { %v4087_v34 = vpop.f32.mrb[41].mxu0 }
0x110c   :  { %v8532_v40 = vpack.i.bf16 %v7382_v26, %v4087_v34  ;;  %v7570_v44 = vpack.c.bf16 %v7382_v26, %v4087_v34 }
0x110e   :  { %v7385_v46 = vpop.f32.mrb[42].mxu0  ;;  %7572 = vmatprep.subr.msk.bf16.mxu0 %vm8528_vm3, %v7570_v44 }
0x110f   :  { %v4097_v50 = vpop.f32.mrb[43].mxu0  ;;  %7575 = vmatpush3.bf16.xpose.msk.msra.mxu0 %vm8528_vm3, %v7570_v44 }
0x1110   :  { %v8538_v51 = vpack.i.bf16 %v7385_v46, %v4097_v50  ;;  %v7576_v54 = vpack.c.bf16 %v7385_v46, %v4097_v50  ;;  %7583 = vmatprep.subr.bf16.mxu0 %v7582_v15 }
0x1112   :  { %7578 = vmatprep.subr.msk.bf16.mxu1 %vm8528_vm3, %v7576_v54 }
0x1113   :  { %7581 = vmatpush3.bf16.xpose.msk.msra.mxu1 %vm8528_vm3, %v7576_v54 }
0x1114   :  { %7587 = vmatprep.subr.bf16.mxu1 %v7586_v19 }
0x1116   :  { %7399 = vmatmul.mubr.msk.f32.vlgmr.msra.gmra.mrb[44].mxu0 %vm171_vm1, %v8544_v56 }
0x1117   :  { %7585 = vmatpush3.bf16.msra.mxu0 %v7582_v15 }
0x111a   :  { %7406 = vmatmul.mubr.msk.f32.vlgmr.msra.gmra.mrb[60].mxu1 %vm171_vm1, %v8548_v61 }
0x111b   :  { %7589 = vmatpush3.bf16.msra.mxu1 %v7586_v19 }
0x11e9   :  { %v7400_v2 = vpop.f32.mrb[44].mxu0 }
0x11ea   :  { %v4269_v30 = vpop.f32.mrb[45].mxu0  ;;  %v4369_v63 = vsel %vm4365_vm4, %v7400_v2, -inf }
0x11eb   :  { %v4366_v0 = vsel %vm4365_vm4, %v4269_v30, -inf }
0x11ed   :  { %v7407_v52 = vpop.f32.mrb[60].mxu1 }
0x11ee   :  { %v4356_v32 = vpop.f32.mrb[61].mxu1  ;;  %v4375_v25 = vsel %vm4365_vm4, %v7407_v52, -inf }
0x11ef   :  { %4376 = vmax.xlane.f32.xlu1 %v4375_v25  ;;  %v4372_v53 = vsel %vm4365_vm4, %v4356_v32, -inf }
0x11f0   :  { %4373 = vmax.xlane.f32.xlu0 %v4372_v53 }
0x127c   :  { %v4377_v55 = vpop.xlane.xlu1 %4376 }
0x127d   :  { %v4381_v21 = vsub.f32 %v7407_v52, %v4377_v55  ;;  %v4374_v57 = vpop.xlane.xlu0 %4373 }
0x127e   :  { %v4380_v31 = vsub.f32 %v4356_v32, %v4374_v57 }
0x127f   :  { %v4388_v27 = vmul.f32 1.442695, %v4381_v21 }
0x1280   :  { %v4386_v28 = vmul.f32 1.442695, %v4380_v31 }
0x1281   :  { %7824 = vpow2.f32 %v4388_v27 }
0x1282   :  { %7826 = vpow2.f32 %v4386_v28 }
0x128b   :  { %v7825_v33 = vpop.eup %7824 }
0x128c   :  { %v7827_v60 = vpop.eup %7826  ;;  %v4399_v58 = vsel %vm4365_vm4, %v7825_v33, 0.0 }
0x128d   :  { %4400 = vadd.xlane.f32.xlu1 %v4399_v58  ;;  %v4396_v62 = vsel %vm4365_vm4, %v7827_v60, 0.0 }
0x128e   :  { %4397 = vadd.xlane.f32.xlu0 %v4396_v62 }
0x129e   :  { %4664 = vrot.lane.b32.xlu1 %v8503_v9, %s7940_s24 }
0x12a2   :  { %4666 = vrot.lane.b32.xlu1 %v8548_v61, %s7940_s24 }
0x12a4   :  { %7683 = vrot.lane.b32.xlu0 %v8538_v51, %s7940_s24 }
0x12c3   :  { %4370 = vmax.xlane.f32.xlu0 %v4369_v63 }
0x12c6   :  { %4367 = vmax.xlane.f32.xlu1 %v4366_v0 }
0x12d7   :  { %7688 = vrot.lane.b32.xlu1 %v8532_v40, %s7940_s24 }
0x12db   :  { %4575 = vrot.lane.b32.xlu1 %v8544_v56, %s7940_s24 }
0x131a   :  { %v4401_v1 = vpop.xlane.xlu1 %4400 }
0x131b   :  { %7828 = vrcp.f32 %v4401_v1  ;;  %v4398_v3 = vpop.xlane.xlu0 %4397 }
0x131c   :  { %7830 = vrcp.f32 %v4398_v3 }
0x131e   :  { %v4665_v49 = vpop.permute.xlu1 %4664 }
0x131f   :  { %v7684_v4 = vpop.permute.xlu0 %7683 }
0x1320   :  { %v7686_v5 = vunpack.i.h.bf16 %v7684_v4  ;;  %v7685_v6 = vunpack.i.l.bf16 %v7684_v4 }
0x1322   :  { %v7596_v7 = vpack.c.bf16 %v7686_v5, %v7685_v6  ;;  %v4667_v10 = vpop.permute.xlu1 %4666 }
0x1324   :  { %7598 = vmatprep.subr.msk.bf16.mxu1 %vm8528_vm3, %v7596_v7 }
0x1325   :  { %v7829_v8 = vpop.eup %7828 }
0x1326   :  { %v7831_v43 = vpop.eup %7830  ;;  %v4409_v47 = vmul.f32 %v7829_v8, %v7825_v33 }
0x1327   :  { %v4407_v45 = vmul.f32 %v7831_v43, %v7827_v60 }
0x1329   :  { %7419 = vmatprep.mubr.msk.f32.mxu1 %vm4365_vm4, %v4407_v45 }
0x132a   :  { %7420 = vmatmul.mubr.msk.f32.vlgmr.msra.gmra.mrb[62].mxu1 %vm4365_vm4, %v4409_v47 }
0x132b   :  { %7601 = vmatpush3.bf16.xpose.msk.msra.mxu1 %vm8528_vm3, %v7596_v7  ;;  %7433 = vmatprep.mubr.msk.f32.mxu1 %vm171_vm1, %v4665_v49 }
0x1332   :  { %7434 = vmatmul.mubr.msk.f32.vlgmr.msra.gmra.mrb[64].mxu1 %vm171_vm1, %v4667_v10 }
0x1350   :  { %v4371_v12 = vpop.xlane.xlu0 %4370 }
0x1351   :  { %v4379_v15 = vsub.f32 %v7400_v2, %v4371_v12 }
0x1353   :  { %v4368_v16 = vpop.xlane.xlu1 %4367  ;;  %v4384_v19 = vmul.f32 1.442695, %v4379_v15 }
0x1354   :  { %v4378_v17 = vsub.f32 %v4269_v30, %v4368_v16 }
0x1356   :  { %v4382_v26 = vmul.f32 1.442695, %v4378_v17 }
0x1357   :  { %v7689_v34 = vpop.permute.xlu1 %7688 }
0x1358   :  { %7832 = vpow2.f32 %v4382_v26  ;;  %v7691_v44 = vunpack.i.h.bf16 %v7689_v34  ;;  %v7690_v46 = vunpack.i.l.bf16 %v7689_v34 }
0x1359   :  { %7834 = vpow2.f32 %v4384_v19 }
0x135a   :  { %v7590_v50 = vpack.c.bf16 %v7691_v44, %v7690_v46 }
0x135b   :  { %v4576_v63 = vpop.permute.xlu1 %4575 }
0x135c   :  { %7592 = vmatprep.subr.msk.bf16.mxu0 %vm8528_vm3, %v7590_v50 }
0x1362   :  { %v7833_v54 = vpop.eup %7832 }
0x1363   :  { %v4390_v52 = vsel %vm4365_vm4, %v7833_v54, 0.0  ;;  %v7835_v32 = vpop.eup %7834 }
0x1364   :  { %4391 = vadd.xlane.f32.xlu0 %v4390_v52  ;;  %v4393_v2 = vsel %vm4365_vm4, %v7835_v32, 0.0 }
0x1368   :  { %4394 = vadd.xlane.f32.xlu0 %v4393_v2 }
0x137e   :  { %4573 = vrot.lane.b32.xlu0 %v8509_v11, %s7940_s24 }
0x13f1   :  { %v4392_v30 = vpop.xlane.xlu0 %4391 }
0x13f2   :  { %7836 = vrcp.f32 %v4392_v30 }
0x13f5   :  { %v4395_v25 = vpop.xlane.xlu0 %4394 }
0x13f6   :  { %7838 = vrcp.f32 %v4395_v25 }
0x13f9   :  { %v4574_v28 = vpop.permute.xlu0 %4573 }
0x13fc   :  { %v7837_v53 = vpop.eup %7836 }
0x13fd   :  { %v8582_v55 = vpop.f32.mrb[62].mxu1  ;;  %v4403_v21 = vmul.f32 %v7837_v53, %v7833_v54 }
0x13fe   :  { %v8584_v57 = vpop.f32.mrb[63].mxu1 }
0x13ff   :  { %7412 = vmatprep.mubr.msk.f32.mxu0 %vm4365_vm4, %v4403_v21 }
0x1400   :  { %v7839_v31 = vpop.eup %7838 }
0x1401   :  { %v4405_v27 = vmul.f32 %v7839_v31, %v7835_v32 }
0x1403   :  { %7413 = vmatmul.mubr.msk.f32.vlgmr.msra.gmra.mrb[46].mxu0 %vm4365_vm4, %v4405_v27 }
0x1404   :  { %7595 = vmatpush3.bf16.xpose.msk.msra.mxu0 %vm8528_vm3, %v7590_v50  ;;  %7426 = vmatprep.mubr.msk.f32.mxu0 %vm171_vm1, %v4574_v28 }
0x1405   :  { %v7435_v33 = vpop.f32.mrb[64].mxu1 }
0x1406   :  { %v4746_v60 = vpop.f32.mrb[65].mxu1  ;;  %v4764_v58 = vsel %vm4365_vm4, %v7435_v33, -inf }
0x1407   :  { %4765 = vmax.xlane.f32.xlu0 %v4764_v58  ;;  %v4761_v62 = vsel %vm4365_vm4, %v4746_v60, -inf }
0x1408   :  { %4762 = vmax.xlane.f32.xlu1 %v4761_v62 }
0x140b   :  { %7427 = vmatmul.mubr.msk.f32.vlgmr.msra.gmra.mrb[48].mxu0 %vm171_vm1, %v4576_v63 }
0x1494   :  { %v4766_v0 = vpop.xlane.xlu0 %4765 }
0x1495   :  { %v4770_v1 = vsub.f32 %v7435_v33, %v4766_v0  ;;  %v4763_v3 = vpop.xlane.xlu1 %4762 }
0x1496   :  { %v4769_v4 = vsub.f32 %v4746_v60, %v4763_v3 }
0x1497   :  { %v4777_v5 = vmul.f32 1.442695, %v4770_v1 }
0x1498   :  { %v4775_v6 = vmul.f32 1.442695, %v4769_v4 }
0x1499   :  { %7840 = vpow2.f32 %v4777_v5 }
0x149a   :  { %7842 = vpow2.f32 %v4775_v6 }
0x14a3   :  { %v7841_v7 = vpop.eup %7840 }
0x14a4   :  { %v7843_v8 = vpop.eup %7842  ;;  %v4788_v43 = vsel %vm4365_vm4, %v7841_v7, 0.0 }
0x14a5   :  { %4789 = vadd.xlane.f32.xlu1 %v4788_v43  ;;  %v4785_v45 = vsel %vm4365_vm4, %v7843_v8, 0.0 }
0x14a6   :  { %4786 = vadd.xlane.f32.xlu0 %v4785_v45 }
0x14b6   :  { %7698 = vrot.lane.b32.xlu1 %v8532_v40, %s7941_s25 }
0x14ba   :  { %7703 = vrot.lane.b32.xlu1 %v8538_v51, %s7941_s25 }
0x14bc   :  { %7693 = vrot.lane.b32.xlu0 %v8516_v39, %s7940_s24 }
0x14be   :  { %5172 = vrot.lane.b32.xlu1 %v8509_v11, %s7941_s25 }
0x14c0   :  { %5174 = vrot.lane.b32.xlu0 %v8544_v56, %s7941_s25 }
0x14c2   :  { %5263 = vrot.lane.b32.xlu1 %v8503_v9, %s7941_s25 }
0x14c4   :  { %5265 = vrot.lane.b32.xlu0 %v8548_v61, %s7941_s25 }
0x14d6   :  { %v8610_v47 = vpop.f32.mrb[46].mxu0 }
0x14d7   :  { %v8612_v49 = vpop.f32.mrb[47].mxu0 }
0x14de   :  { %v7428_v10 = vpop.f32.mrb[48].mxu0 }
0x14df   :  { %v4655_v12 = vpop.f32.mrb[49].mxu0  ;;  %v4758_v15 = vsel %vm4365_vm4, %v7428_v10, -inf }
0x14e0   :  { %v4755_v16 = vsel %vm4365_vm4, %v4655_v12, -inf }
0x14e3   :  { %4759 = vmax.xlane.f32.xlu0 %v4758_v15 }
0x14e6   :  { %4756 = vmax.xlane.f32.xlu1 %v4755_v16 }
0x14f7   :  { %7708 = vrot.lane.b32.xlu1 %v8511_v14, %s7940_s24 }
0x1532   :  { %v4790_v17 = vpop.xlane.xlu1 %4789 }
0x1533   :  { %7844 = vrcp.f32 %v4790_v17  ;;  %v4787_v19 = vpop.xlane.xlu0 %4786 }
0x1534   :  { %7846 = vrcp.f32 %v4787_v19 }
0x1536   :  { %v7699_v26 = vpop.permute.xlu1 %7698 }
0x1537   :  { %v7694_v34 = vpop.permute.xlu0 %7693  ;;  %v7701_v44 = vunpack.i.h.bf16 %v7699_v26  ;;  %v7700_v46 = vunpack.i.l.bf16 %v7699_v26 }
0x1538   :  { %v7696_v50 = vunpack.i.h.bf16 %v7694_v34  ;;  %v7695_v54 = vunpack.i.l.bf16 %v7694_v34 }
0x1539   :  { %v7610_v32 = vpack.c.bf16 %v7701_v44, %v7700_v46 }
0x153a   :  { %v7606_v52 = vpack.c.bf16 %v7696_v50, %v7695_v54  ;;  %v7704_v2 = vpop.permute.xlu1 %7703 }
0x153b   :  { %v7706_v31 = vunpack.i.h.bf16 %v7704_v2  ;;  %v7705_v27 = vunpack.i.l.bf16 %v7704_v2  ;;  %v5175_v60 = vpop.permute.xlu0 %5174 }
0x153c   :  { %7607 = vmatprep.subr.bf16.mxu1 %v7606_v52 }
0x153d   :  { %v7845_v30 = vpop.eup %7844  ;;  %7609 = vmatpush3.bf16.msra.mxu1 %v7606_v52  ;;  %v7616_v33 = vpack.c.bf16 %v7706_v31, %v7705_v27  ;;  %v6827_v31 = vld [vmem:[%s8928_s2 + $0x68] sm:$0xff]  ;;  %v6814_v27 = vld [vmem:[%s8928_s2 + $0x60] sm:$0xff] }
0x153e   :  { %v7847_v25 = vpop.eup %7846  ;;  %7612 = vmatprep.subr.msk.bf16.mxu1 %vm8528_vm3, %v7610_v32  ;;  %v4798_v21 = vmul.f32 %v7845_v30, %v7841_v7  ;;  %v5173_v28 = vpop.permute.xlu1 %5172 }
0x153f   :  { %v4796_v53 = vmul.f32 %v7847_v25, %v7843_v8  ;;  %v5266_v62 = vpop.permute.xlu0 %5265 }
0x1541   :  { %7447 = vmatprep.mubr.msk.f32.mxu1 %vm4365_vm4, %v4796_v53 }
0x1542   :  { %7448 = vmatmul.mubr.msk.f32.vlgmr.msra.gmra.mrb[66].mxu1 %vm4365_vm4, %v4798_v21  ;;  %v5264_v58 = vpop.permute.xlu1 %5263 }
0x1543   :  { %7470 = vmatprep.mubr.msk.f32.mxu1 %vm171_vm1, %v5173_v28 }
0x1546   :  { %7615 = vmatpush3.bf16.xpose.msk.msra.mxu1 %vm8528_vm3, %v7610_v32 }
0x1547   :  { %7618 = vmatprep.subr.msk.bf16.mxu1 %vm8528_vm3, %v7616_v33 }
0x154d   :  { %7471 = vmatmul.mubr.msk.f32.vlgmr.msra.gmra.mrb[68].mxu1 %vm171_vm1, %v5175_v60 }
0x154e   :  { %7621 = vmatpush3.bf16.xpose.msk.msra.mxu1 %vm8528_vm3, %v7616_v33  ;;  %7477 = vmatprep.mubr.msk.f32.mxu1 %vm171_vm1, %v5264_v58 }
0x1555   :  { %7478 = vmatmul.mubr.msk.f32.vlgmr.msra.gmra.mrb[70].mxu1 %vm171_vm1, %v5266_v62 }
0x1570   :  { %v4760_v63 = vpop.xlane.xlu0 %4759 }
0x1571   :  { %v4768_v0 = vsub.f32 %v7428_v10, %v4760_v63 }
0x1573   :  { %v4757_v1 = vpop.xlane.xlu1 %4756  ;;  %v4773_v4 = vmul.f32 1.442695, %v4768_v0 }
0x1574   :  { %v4767_v3 = vsub.f32 %v4655_v12, %v4757_v1 }
0x1576   :  { %v4771_v5 = vmul.f32 1.442695, %v4767_v3 }
0x1577   :  { %v7709_v6 = vpop.permute.xlu1 %7708 }
0x1578   :  { %7848 = vpow2.f32 %v4771_v5  ;;  %v7711_v7 = vunpack.i.h.bf16 %v7709_v6  ;;  %v7710_v8 = vunpack.i.l.bf16 %v7709_v6 }
0x1579   :  { %7850 = vpow2.f32 %v4773_v4 }
0x157a   :  { %v7602_v43 = vpack.c.bf16 %v7711_v7, %v7710_v8 }
0x157c   :  { %7603 = vmatprep.subr.bf16.mxu0 %v7602_v43 }
0x157d   :  { %7605 = vmatpush3.bf16.msra.mxu0 %v7602_v43 }
0x157e   :  { %7450 = vmatprep.subr.mxu0 %v6827_v31 }
0x1582   :  { %v7849_v45 = vpop.eup %7848 }
0x1583   :  { %v4779_v15 = vsel %vm4365_vm4, %v7849_v45, 0.0  ;;  %v7851_v16 = vpop.eup %7850 }
0x1584   :  { %4780 = vadd.xlane.f32.xlu0 %v4779_v15  ;;  %v4782_v17 = vsel %vm4365_vm4, %v7851_v16, 0.0 }
0x1588   :  { %4783 = vadd.xlane.f32.xlu0 %v4782_v17 }
0x1611   :  { %v4781_v10 = vpop.xlane.xlu0 %4780 }
0x1612   :  { %7852 = vrcp.f32 %v4781_v10 }
0x1615   :  { %v8634_v12 = vpop.f32.mrb[66].mxu1  ;;  %v4784_v19 = vpop.xlane.xlu0 %4783 }
0x1616   :  { %7854 = vrcp.f32 %v4784_v19  ;;  %v8636_v26 = vpop.f32.mrb[67].mxu1 }
0x161c   :  { %v7853_v34 = vpop.eup %7852 }
0x161d   :  { %v4792_v44 = vmul.f32 %v7853_v34, %v7849_v45 }
0x161f   :  { %7440 = vmatprep.mubr.msk.f32.mxu0 %vm4365_vm4, %v4792_v44 }
0x1620   :  { %v7855_v46 = vpop.eup %7854  ;;  %v7472_v50 = vpop.f32.mrb[68].mxu1 }
0x1621   :  { %v4794_v54 = vmul.f32 %v7855_v46, %v7851_v16  ;;  %v5254_v52 = vpop.f32.mrb[69].mxu1  ;;  %v5357_v32 = vsel %vm4365_vm4, %v7472_v50, -inf }
0x1622   :  { %5358 = vmax.xlane.f32.xlu0 %v5357_v32  ;;  %v5354_v2 = vsel %vm4365_vm4, %v5254_v52, -inf }
0x1623   :  { %7441 = vmatmul.mubr.msk.f32.vlgmr.msra.gmra.mrb[50].mxu0 %vm4365_vm4, %v4794_v54 }
0x1624   :  { %7451 = vmatpush3.msra.mxu0 %v6827_v31 }
0x1625   :  { %7458 = vmatprep.subr.mxu0 %v6814_v27 }
0x1626   :  { %5355 = vmax.xlane.f32.xlu0 %v5354_v2 }
0x1628   :  { %v7479_v30 = vpop.f32.mrb[70].mxu1 }
0x1629   :  { %v5345_v25 = vpop.f32.mrb[71].mxu1  ;;  %v5363_v21 = vsel %vm4365_vm4, %v7479_v30, -inf }
0x162a   :  { %v5360_v53 = vsel %vm4365_vm4, %v5345_v25, -inf }
0x162b   :  { %5361 = vmax.xlane.f32.xlu0 %v5360_v53 }
0x162f   :  { %5364 = vmax.xlane.f32.xlu0 %v5363_v21 }
0x16af   :  { %v5359_v28 = vpop.xlane.xlu0 %5358 }
0x16b0   :  { %v5367_v33 = vsub.f32 %v7472_v50, %v5359_v28 }
0x16b2   :  { %v5372_v60 = vmul.f32 1.442695, %v5367_v33 }
0x16b3   :  { %v5356_v58 = vpop.xlane.xlu0 %5355 }
0x16b4   :  { %7856 = vpow2.f32 %v5372_v60  ;;  %v5366_v62 = vsub.f32 %v5254_v52, %v5356_v58  ;;  %v6848_v52 = vld [vmem:[%s8928_s2 + $0x70] sm:$0xff] }
0x16b6   :  { %v5370_v63 = vmul.f32 1.442695, %v5366_v62 }
0x16b8   :  { %7858 = vpow2.f32 %v5370_v63  ;;  %v5362_v0 = vpop.xlane.xlu0 %5361 }
0x16b9   :  { %v5368_v1 = vsub.f32 %v5345_v25, %v5362_v0 }
0x16bb   :  { %v5374_v6 = vmul.f32 1.442695, %v5368_v1 }
0x16bc   :  { %v5365_v3 = vpop.xlane.xlu0 %5364 }
0x16bd   :  { %v5369_v4 = vsub.f32 %v7479_v30, %v5365_v3 }
0x16be   :  { %v8650_v5 = vpop.eup %7856 }
0x16bf   :  { %v5376_v7 = vmul.f32 1.442695, %v5369_v4  ;;  %v5381_v8 = vsel %vm4365_vm4, %v8650_v5, 0.0 }
0x16c0   :  { %5382 = vadd.xlane.f32.xlu0 %v5381_v8 }
0x16c1   :  { %7860 = vpow2.f32 %v5376_v7 }
0x16c2   :  { %v7859_v43 = vpop.eup %7858  ;;  %7862 = vpow2.f32 %v5374_v6 }
0x16c3   :  { %v5378_v45 = vsel %vm4365_vm4, %v7859_v43, 0.0 }
0x16c4   :  { %5379 = vadd.xlane.f32.xlu1 %v5378_v45 }
0x16cb   :  { %v7861_v15 = vpop.eup %7860 }
0x16cc   :  { %v5387_v16 = vsel %vm4365_vm4, %v7861_v15, 0.0  ;;  %v7863_v17 = vpop.eup %7862 }
0x16cd   :  { %5388 = vadd.xlane.f32.xlu0 %v5387_v16  ;;  %v5384_v10 = vsel %vm4365_vm4, %v7863_v17, 0.0 }
0x16d1   :  { %5385 = vadd.xlane.f32.xlu0 %v5384_v10 }
0x16d5   :  { %7718 = vrot.lane.b32.xlu1 %v8516_v39, %s7941_s25 }
0x16d9   :  { %5767 = vrot.lane.b32.xlu1 %v8548_v61, %s7942_s30 }
0x16e7   :  { %7713 = vrot.lane.b32.xlu0 %v8511_v14, %s7941_s25 }
0x16eb   :  { %7723 = vrot.lane.b32.xlu0 %v8532_v40, %s7942_s30 }
0x16ef   :  { %7728 = vrot.lane.b32.xlu0 %v8538_v51, %s7942_s30 }
0x16f3   :  { %5674 = vrot.lane.b32.xlu0 %v8509_v11, %s7942_s30 }
0x16f6   :  { %v7442_v19 = vpop.f32.mrb[50].mxu0 }
0x16f7   :  { %5676 = vrot.lane.b32.xlu0 %v8544_v56, %s7942_s30  ;;  %v4879_v34 = vpop.f32.mrb[51].mxu0 }
0x16f8   :  { %7452 = vmatprep.mubr.msk.f32.mxu0 %vm171_vm1, %v4879_v34 }
0x16f9   :  { %7453 = vmatmul.mubr.msk.f32.vlgmr.msra.gmra.mrb[52].mxu0 %vm171_vm1, %v7442_v19 }
0x16fa   :  { %7455 = vmatprep.mubr.msk.f32.mxu0 %vm171_vm1, %v8636_v26  ;;  %7459 = vmatpush3.msra.mxu0 %v6814_v27 }
0x16fb   :  { %5765 = vrot.lane.b32.xlu0 %v8503_v9, %s7942_s30 }
0x16fd   :  { %7456 = vmatmul.mubr.msk.f32.gmra.mrb[54].mxu0 %vm171_vm1, %v8634_v12 }
0x16fe   :  { %7460 = vmatprep.mubr.msk.f32.mxu0 %vm171_vm1, %v8612_v49 }
0x1701   :  { %7461 = vmatmul.mubr.msk.f32.vlgmr.msra.gmra.mrb[52].mxu0 %vm171_vm1, %v8610_v47 }
0x1702   :  { %7463 = vmatprep.mubr.msk.f32.mxu0 %vm171_vm1, %v8584_v57 }
0x1705   :  { %7464 = vmatmul.mubr.msk.f32.gmra.mrb[54].mxu0 %vm171_vm1, %v8582_v55 }
0x174d   :  { %v5383_v51 = vpop.xlane.xlu0 %5382 }
0x1751   :  { %v5380_v11 = vpop.xlane.xlu1 %5379 }
0x1752   :  { %7864 = vrcp.f32 %v5380_v11 }
0x1753   :  { %7866 = vrcp.f32 %v5383_v51 }
0x1755   :  { %v7719_v40 = vpop.permute.xlu1 %7718 }
0x1756   :  { %v7721_v9 = vunpack.i.h.bf16 %v7719_v40  ;;  %v7720_v56 = vunpack.i.l.bf16 %v7719_v40 }
0x1758   :  { %v7626_v61 = vpack.c.bf16 %v7721_v9, %v7720_v56 }
0x1759   :  { %v5768_v6 = vpop.permute.xlu1 %5767 }
0x175a   :  { %v5389_v12 = vpop.xlane.xlu0 %5388  ;;  %7627 = vmatprep.subr.bf16.mxu1 %v7626_v61 }
0x175b   :  { %7629 = vmatpush3.bf16.msra.mxu1 %v7626_v61  ;;  %7868 = vrcp.f32 %v5389_v12 }
0x175c   :  { %v7865_v49 = vpop.eup %7864 }
0x175d   :  { %v5391_v26 = vmul.f32 %v7865_v49, %v7859_v43  ;;  %v7867_v50 = vpop.eup %7866 }
0x175e   :  { %v5386_v47 = vpop.xlane.xlu0 %5385  ;;  %v5393_v53 = vmul.f32 %v7867_v50, %v8650_v5 }
0x175f   :  { %7870 = vrcp.f32 %v5386_v47  ;;  %7484 = vmatprep.mubr.msk.f32.mxu0 %vm4365_vm4, %v5391_v26 }
0x1762   :  { %v7714_v57 = vpop.permute.xlu0 %7713 }
0x1763   :  { %v7716_v55 = vunpack.i.h.bf16 %v7714_v57  ;;  %v7715_v44 = vunpack.i.l.bf16 %v7714_v57 }
0x1765   :  { %v7622_v46 = vpack.c.bf16 %v7716_v55, %v7715_v44  ;;  %v7869_v30 = vpop.eup %7868 }
0x1766   :  { %v7724_v54 = vpop.permute.xlu0 %7723  ;;  %v5397_v28 = vmul.f32 %v7869_v30, %v7861_v15 }
0x1767   :  { %v7726_v32 = vunpack.i.h.bf16 %v7724_v54  ;;  %v7725_v2 = vunpack.i.l.bf16 %v7724_v54  ;;  %7623 = vmatprep.subr.bf16.mxu0 %v7622_v46 }
0x1768   :  { %7625 = vmatpush3.bf16.msra.mxu0 %v7622_v46 }
0x1769   :  { %v7871_v25 = vpop.eup %7870  ;;  %v7630_v21 = vpack.c.bf16 %v7726_v32, %v7725_v2  ;;  %7494 = vmatprep.subr.mxu0 %v6848_v52 }
0x176a   :  { %v7729_v31 = vpop.permute.xlu0 %7728  ;;  %v5395_v27 = vmul.f32 %v7871_v25, %v7863_v17 }
0x176b   :  { %v7731_v33 = vunpack.i.h.bf16 %v7729_v31  ;;  %v7730_v60 = vunpack.i.l.bf16 %v7729_v31  ;;  %7485 = vmatmul.mubr.msk.f32.vlgmr.msra.gmra.mrb[56].mxu0 %vm4365_vm4, %v5393_v53  ;;  %7632 = vmatprep.subr.msk.bf16.mxu1 %vm8528_vm3, %v7630_v21 }
0x176c   :  { %7491 = vmatprep.mubr.msk.f32.mxu1 %vm4365_vm4, %v5395_v27  ;;  %7495 = vmatpush3.msra.mxu0 %v6848_v52 }
0x176d   :  { %v7636_v58 = vpack.c.bf16 %v7731_v33, %v7730_v60  ;;  %7492 = vmatmul.mubr.msk.f32.vlgmr.msra.gmra.mrb[72].mxu1 %vm4365_vm4, %v5397_v28 }
0x176e   :  { %7635 = vmatpush3.bf16.xpose.msk.msra.mxu1 %vm8528_vm3, %v7630_v21  ;;  %v5675_v62 = vpop.permute.xlu0 %5674 }
0x176f   :  { %7506 = vmatprep.mubr.msk.f32.mxu1 %vm171_vm1, %v5675_v62  ;;  %7638 = vmatprep.subr.msk.bf16.mxu0 %vm8528_vm3, %v7636_v58 }
0x1772   :  { %v5677_v63 = vpop.permute.xlu0 %5676 }
0x1775   :  { %7507 = vmatmul.mubr.msk.f32.vlgmr.msra.gmra.mrb[74].mxu1 %vm171_vm1, %v5677_v63 }
0x1776   :  { %v5766_v5 = vpop.permute.xlu0 %5765 }
0x183e   :  { %v7486_v0 = vpop.f32.mrb[56].mxu0 }
0x183f   :  { %v5476_v1 = vpop.f32.mrb[57].mxu0 }
0x1840   :  { %v7493_v3 = vpop.f32.mrb[72].mxu1  ;;  %7496 = vmatprep.mubr.msk.f32.mxu0 %vm171_vm1, %v5476_v1 }
0x1841   :  { %v5563_v4 = vpop.f32.mrb[73].mxu1  ;;  %7497 = vmatmul.mubr.msk.f32.vlgmr.msra.gmra.mrb[52].mxu0 %vm171_vm1, %v7486_v0 }
0x1842   :  { %7641 = vmatpush3.bf16.xpose.msk.msra.mxu0 %vm8528_vm3, %v7636_v58  ;;  %7499 = vmatprep.mubr.msk.f32.mxu0 %vm171_vm1, %v5563_v4 }
0x1845   :  { %7500 = vmatmul.mubr.msk.f32.gmra.mrb[54].mxu0 %vm171_vm1, %v7493_v3 }
0x1846   :  { %7513 = vmatprep.mubr.msk.f32.mxu0 %vm171_vm1, %v5766_v5  ;;  %v6865_v5 = vld [vmem:[%s8928_s2 + $0x78] sm:$0xff] }
0x1848   :  { %v7508_v7 = vpop.f32.mrb[74].mxu1 }
0x1849   :  { %v5756_v8 = vpop.f32.mrb[75].mxu1  ;;  %v5859_v43 = vsel %vm4365_vm4, %v7508_v7, -inf  ;;  %7514 = vmatmul.mubr.msk.f32.vlgmr.msra.gmra.mrb[58].mxu0 %vm171_vm1, %v5768_v6 }
0x184a   :  { %5860 = vmax.xlane.f32.xlu1 %v5859_v43  ;;  %v5856_v45 = vsel %vm4365_vm4, %v5756_v8, -inf }
0x184b   :  { %5857 = vmax.xlane.f32.xlu0 %v5856_v45 }
0x18d7   :  { %v5861_v19 = vpop.xlane.xlu1 %5860 }
0x18d8   :  { %v5858_v38 = vpop.xlane.xlu0 %5857  ;;  %v5869_v34 = vsub.f32 %v7508_v7, %v5861_v19 }
0x18d9   :  { %v5868_v15 = vsub.f32 %v5756_v8, %v5858_v38 }
0x18da   :  { %v5874_v11 = vmul.f32 1.442695, %v5869_v34 }
0x18db   :  { %v5872_v16 = vmul.f32 1.442695, %v5868_v15 }
0x18dd   :  { %7872 = vpow2.f32 %v5872_v16 }
0x18de   :  { %7874 = vpow2.f32 %v5874_v11 }
0x18e7   :  { %v7873_v17 = vpop.eup %7872 }
0x18e8   :  { %v5880_v10 = vsel %vm4365_vm4, %v7873_v17, 0.0  ;;  %v7875_v61 = vpop.eup %7874 }
0x18e9   :  { %5881 = vadd.xlane.f32.xlu1 %v5880_v10  ;;  %v5883_v12 = vsel %vm4365_vm4, %v7875_v61, 0.0 }
0x191c   :  { %v7515_v40 = vpop.f32.mrb[58].mxu0 }
0x191d   :  { %v5847_v51 = vpop.f32.mrb[59].mxu0  ;;  %v5865_v56 = vsel %vm4365_vm4, %v7515_v40, -inf }
0x191e   :  { %v5862_v9 = vsel %vm4365_vm4, %v5847_v51, -inf }
0x191f   :  { %5863 = vmax.xlane.f32.xlu0 %v5862_v9 }
0x1923   :  { %5866 = vmax.xlane.f32.xlu0 %v5865_v56 }
0x1927   :  { %5884 = vadd.xlane.f32.xlu0 %v5883_v12 }
0x1976   :  { %v5882_v49 = vpop.xlane.xlu1 %5881 }
0x1977   :  { %7876 = vrcp.f32 %v5882_v49 }
0x1981   :  { %v7877_v26 = vpop.eup %7876 }
0x1982   :  { %v5893_v47 = vmul.f32 %v7877_v26, %v7873_v17  ;;  %v6778_v26 = vld [vmem:[%s8929_s3 + $0x11] ss:$0 sm:$0xff] }
0x1984   :  { %7520 = vmatprep.mubr.msk.f32.mxu1 %vm4365_vm4, %v5893_v47 }
0x19ac   :  { %v5864_v57 = vpop.xlane.xlu0 %5863 }
0x19ad   :  { %v5870_v55 = vsub.f32 %v5847_v51, %v5864_v57 }
0x19af   :  { %v5876_v44 = vmul.f32 1.442695, %v5870_v55 }
0x19b0   :  { %v5867_v46 = vpop.xlane.xlu0 %5866 }
0x19b1   :  { %7878 = vpow2.f32 %v5876_v44  ;;  %v5871_v50 = vsub.f32 %v7515_v40, %v5867_v46 }
0x19b3   :  { %v5878_v54 = vmul.f32 1.442695, %v5871_v50 }
0x19b4   :  { %v5885_v25 = vpop.xlane.xlu0 %5884 }
0x19b5   :  { %7880 = vpow2.f32 %v5878_v54 }
0x19b6   :  { %7882 = vrcp.f32 %v5885_v25 }
0x19bb   :  { %v7879_v52 = vpop.eup %7878 }
0x19bc   :  { %v5886_v32 = vsel %vm4365_vm4, %v7879_v52, 0.0 }
0x19bd   :  { %5887 = vadd.xlane.f32.xlu1 %v5886_v32 }
0x19bf   :  { %v7881_v2 = vpop.eup %7880 }
0x19c0   :  { %v5889_v30 = vsel %vm4365_vm4, %v7881_v2, 0.0  ;;  %v7883_v60 = vpop.eup %7882 }
0x19c1   :  { %5890 = vadd.xlane.f32.xlu0 %v5889_v30  ;;  %v5895_v0 = vmul.f32 %v7883_v60, %v7875_v61 }
0x19ce   :  { %7733 = vrot.lane.b32.xlu1 %v8511_v14, %s7942_s30 }
0x19d7   :  { %7738 = vrot.lane.b32.xlu0 %v8516_v39, %s7942_s30 }
0x1a4a   :  { %v5888_v53 = vpop.xlane.xlu1 %5887 }
0x1a4b   :  { %7884 = vrcp.f32 %v5888_v53  ;;  %v3803_v53 = vadd.f32 %v8518_v20, %v6778_v26 }
0x1a4e   :  { %v7734_v21 = vpop.permute.xlu1 %7733  ;;  %v5891_v31 = vpop.xlane.xlu0 %5890 }
0x1a4f   :  { %v7736_v27 = vunpack.i.h.bf16 %v7734_v21  ;;  %v7735_v28 = vunpack.i.l.bf16 %v7734_v21  ;;  %7886 = vrcp.f32 %v5891_v31 }
0x1a51   :  { %v7642_v33 = vpack.c.bf16 %v7736_v27, %v7735_v28  ;;  %v3808_v27 = vadd.f32 %v6778_v26, %v8524_v24 }
0x1a52   :  { %v7739_v58 = vpop.permute.xlu0 %7738 }
0x1a53   :  { %v7741_v62 = vunpack.i.h.bf16 %v7739_v58  ;;  %v7740_v63 = vunpack.i.l.bf16 %v7739_v58  ;;  %7643 = vmatprep.subr.bf16.mxu1 %v7642_v33  ;;  %v3818_v60 = vadd.f32 %v3808_v27, %v8435_v48 }
0x1a54   :  { %7645 = vmatpush3.bf16.msra.mxu1 %v7642_v33  ;;  %v3813_v33 = vadd.f32 %v8522_v23, %v6778_v26 }
0x1a55   :  { %v7885_v14 = vpop.eup %7884  ;;  %v7646_v1 = vpack.c.bf16 %v7741_v62, %v7740_v63  ;;  %v3826_v20 = vsel %vm171_vm1, %v3818_v60, 0.0 }
0x1a56   :  { %v5897_v39 = vmul.f32 %v7885_v14, %v7879_v52  ;;  %v3798_v52 = vadd.f32 %v6778_v26, %v8520_v22  ;;  %v3817_v22 = vadd.f32 %v3803_v53, %v8425_v29  ;;  %v6870_v29 = vld [vmem:[%s8928_s2 + $0x80] sm:$0xff] }
0x1a57   :  { %7521 = vmatmul.mubr.msk.f32.vlgmr.msra.gmra.mrb[76].mxu1 %vm4365_vm4, %v5895_v0  ;;  %7647 = vmatprep.subr.bf16.mxu0 %v7646_v1 }
0x1a58   :  { %7649 = vmatpush3.bf16.msra.mxu0 %v7646_v1  ;;  %7527 = vmatprep.mubr.msk.f32.mxu0 %vm4365_vm4, %v5897_v39  ;;  %v3816_v21 = vadd.f32 %v3798_v52, %v8428_v36  ;;  %v3823_v58 = vsel %vm171_vm1, %v3817_v22, 0.0  ;;  %v3819_v36 = vadd.f32 %v3813_v33, %v8438_v59  ;;  %v6874_v33 = vld [vmem:[%s8929_s3 + $0x18] ss:$0 sm:$0xff] }
0x1a59   :  { %v7887_v3 = vpop.eup %7886  ;;  %7530 = vmatprep.subr.mxu0 %v6865_v5  ;;  %7538 = vmatprep.subr.mxu1 %v6870_v29 }
0x1a5a   :  { %v5899_v4 = vmul.f32 %v7887_v3, %v7881_v2  ;;  %v3820_v28 = vsel %vm171_vm1, %v3816_v21, 0.0  ;;  %v3829_v62 = vsel %vm171_vm1, %v3819_v36, 0.0  ;;  %7539 = vmatpush3.msra.mxu1 %v6870_v29 }
0x1a5c   :  { %7528 = vmatmul.mubr.msk.f32.vlgmr.msra.gmra.mrb[60].mxu0 %vm4365_vm4, %v5899_v4 }
0x1a5d   :  { %7531 = vmatpush3.msra.mxu0 %v6865_v5 }
0x1b2a   :  { %v7522_v6 = vpop.f32.mrb[76].mxu1 }
0x1b2b   :  { %v5978_v7 = vpop.f32.mrb[77].mxu1 }
0x1b2c   :  { %7532 = vmatprep.mubr.msk.f32.mxu0 %vm171_vm1, %v5978_v7 }
0x1b2d   :  { %7533 = vmatmul.mubr.msk.f32.vlgmr.msra.gmra.mrb[52].mxu0 %vm171_vm1, %v7522_v6 }
0x1b2f   :  { %v7529_v8 = vpop.f32.mrb[60].mxu0 }
0x1b30   :  { %v6065_v43 = vpop.f32.mrb[61].mxu0 }
0x1b31   :  { %7535 = vmatprep.mubr.msk.f32.mxu0 %vm171_vm1, %v6065_v43 }
0x1b32   :  { %7536 = vmatmul.mubr.msk.f32.gmra.mrb[54].mxu0 %vm171_vm1, %v7529_v8 }
0x1c00   :  { %v7534_v45 = vpop.f32.mrb[52].mxu0 }
0x1c01   :  { %v8735_v38 = vadd.f32 %v7534_v45, %v8021_v37  ;;  %v6153_v15 = vpop.f32.mrb[53].mxu0 }
0x1c02   :  { %v8738_v16 = vadd.f32 %v6153_v15, %v8019_v35 }
0x1c03   :  { %v6185_v17 = vsel %vm171_vm1, %v8735_v38, 0.0 }
0x1c04   :  { %6186 = vadd.xlane.f32.xlu0 %v6185_v17  ;;  %v6182_v10 = vsel %vm171_vm1, %v8738_v16, 0.0 }
0x1c05   :  { %6183 = vadd.xlane.f32.xlu1 %v6182_v10  ;;  %v7537_v19 = vpop.f32.mrb[54].mxu0  ;;  %v6872_v10 = vld [vmem:[%s8929_s3 + $0x14] ss:$0 sm:$0xff] }
0x1c06   :  { %v8745_v34 = vadd.f32 %v7537_v19, %v8027_v42  ;;  %v6163_v11 = vpop.f32.mrb[55].mxu0 }
0x1c07   :  { %v8748_v37 = vadd.f32 %v6163_v11, %v8025_v41 }
0x1c08   :  { %v6191_v35 = vsel %vm171_vm1, %v8745_v34, 0.0 }
0x1c09   :  { %6192 = vadd.xlane.f32.xlu0 %v6191_v35  ;;  %v6188_v40 = vsel %vm171_vm1, %v8748_v37, 0.0 }
0x1c0a   :  { %6189 = vadd.xlane.f32.xlu1 %v6188_v40 }
0x1c91   :  { %v6187_v51 = vpop.xlane.xlu0 %6186 }
0x1c92   :  { %v6195_v9 = vmul.f32 0.125, %v6187_v51  ;;  %v6184_v56 = vpop.xlane.xlu1 %6183 }
0x1c93   :  { %v6194_v61 = vmul.f32 0.125, %v6184_v56  ;;  %v6873_v56 = vld [vmem:[%s8929_s3 + $0x15] ss:$0 sm:$0xff] }
0x1c94   :  { %v8755_v12 = vsub.f32 %v8735_v38, %v6195_v9 }
0x1c95   :  { %v8758_v42 = vsub.f32 %v8738_v16, %v6194_v61 }
0x1c96   :  { %v6193_v41 = vpop.xlane.xlu0 %6192  ;;  %v6203_v49 = vmul.f32 %v8755_v12, %v8755_v12 }
0x1c97   :  { %v6197_v47 = vmul.f32 0.125, %v6193_v41  ;;  %v6190_v57 = vpop.xlane.xlu1 %6189  ;;  %v6202_v55 = vmul.f32 %v8758_v42, %v8758_v42 }
0x1c98   :  { %v6196_v44 = vmul.f32 0.125, %v6190_v57  ;;  %v6209_v46 = vsel %vm171_vm1, %v6203_v49, 0.0 }
0x1c99   :  { %v8769_v50 = vsub.f32 %v8745_v34, %v6197_v47  ;;  %6210 = vadd.xlane.f32.xlu0 %v6209_v46  ;;  %v6206_v54 = vsel %vm171_vm1, %v6202_v55, 0.0 }
0x1c9a   :  { %v8774_v32 = vsub.f32 %v8748_v37, %v6196_v44  ;;  %6207 = vadd.xlane.f32.xlu1 %v6206_v54 }
0x1c9b   :  { %v6205_v2 = vmul.f32 %v8769_v50, %v8769_v50 }
0x1c9c   :  { %v6204_v30 = vmul.f32 %v8774_v32, %v8774_v32 }
0x1c9d   :  { %v6215_v25 = vsel %vm171_vm1, %v6205_v2, 0.0 }
0x1c9e   :  { %6216 = vadd.xlane.f32.xlu0 %v6215_v25  ;;  %v6212_v31 = vsel %vm171_vm1, %v6204_v30, 0.0 }
0x1c9f   :  { %6213 = vadd.xlane.f32.xlu1 %v6212_v31 }
0x1ca3   :  { %3821 = vadd.xlane.f32.xlu1 %v3820_v28  ;;  %v6871_v28 = vld [vmem:[%s8928_s2 + $0x88] sm:$0xff] }
0x1ca4   :  { %7546 = vmatprep.subr.mxu1 %v6871_v28 }
0x1ca7   :  { %3824 = vadd.xlane.f32.xlu1 %v3823_v58 }
0x1cab   :  { %3827 = vadd.xlane.f32.xlu1 %v3826_v20 }
0x1caf   :  { %3830 = vadd.xlane.f32.xlu1 %v3829_v62 }
0x1d26   :  { %v6211_v23 = vpop.xlane.xlu0 %6210 }
0x1d27   :  { %v6219_v24 = vmul.f32 0.125, %v6211_v23  ;;  %v6208_v48 = vpop.xlane.xlu1 %6207 }
0x1d28   :  { %v6218_v63 = vmul.f32 0.125, %v6208_v48 }
0x1d29   :  { %v6223_v14 = vadd.f32 1e-06, %v6219_v24 }
0x1d2a   :  { %v6222_v0 = vadd.f32 1e-06, %v6218_v63 }
0x1d2b   :  { %7888 = vrsqrt.f32 %v6223_v14  ;;  %v6217_v59 = vpop.xlane.xlu0 %6216 }
0x1d2c   :  { %7890 = vrsqrt.f32 %v6222_v0  ;;  %v6221_v1 = vmul.f32 0.125, %v6217_v59  ;;  %v6214_v39 = vpop.xlane.xlu1 %6213  ;;  %v6879_v59 = vld [vmem:[%s8929_s3 + $0x19] ss:$0 sm:$0xff] }
0x1d2d   :  { %v6220_v3 = vmul.f32 0.125, %v6214_v39 }
0x1d2e   :  { %v6225_v4 = vadd.f32 1e-06, %v6221_v1 }
0x1d2f   :  { %v6224_v5 = vadd.f32 1e-06, %v6220_v3 }
0x1d30   :  { %7892 = vrsqrt.f32 %v6225_v4  ;;  %v3822_v6 = vpop.xlane.xlu1 %3821 }
0x1d31   :  { %7894 = vrsqrt.f32 %v6224_v5  ;;  %v3832_v7 = vmul.f32 0.125, %v3822_v6 }
0x1d33   :  { %v8796_v8 = vsub.f32 %v3816_v21, %v3832_v7 }
0x1d34   :  { %v3825_v43 = vpop.xlane.xlu1 %3824 }
0x1d35   :  { %v7889_v45 = vpop.eup %7888  ;;  %v3833_v15 = vmul.f32 0.125, %v3825_v43  ;;  %v3840_v17 = vmul.f32 %v8796_v8, %v8796_v8 }
0x1d36   :  { %v7891_v19 = vpop.eup %7890  ;;  %v6231_v11 = vmul.f32 %v7889_v45, %v8755_v12 }
0x1d37   :  { %v8804_v35 = vsub.f32 %v3817_v22, %v3833_v15  ;;  %v3844_v40 = vsel %vm171_vm1, %v3840_v17, 0.0  ;;  %v6230_v51 = vmul.f32 %v7891_v19, %v8758_v42 }
0x1d38   :  { %3845 = vadd.xlane.f32.xlu1 %v3844_v40  ;;  %v3828_v9 = vpop.xlane.xlu1 %3827  ;;  %v6239_v61 = vmul.f32 %v6872_v10, %v6231_v11 }
0x1d39   :  { %v3834_v41 = vmul.f32 0.125, %v3828_v9  ;;  %v3841_v49 = vmul.f32 %v8804_v35, %v8804_v35  ;;  %v6238_v26 = vmul.f32 %v6872_v10, %v6230_v51 }
0x1d3a   :  { %v7893_v47 = vpop.eup %7892  ;;  %v6247_v54 = vadd.f32 %v6873_v56, %v6239_v61 }
0x1d3b   :  { %v7895_v12 = vpop.eup %7894  ;;  %v8813_v57 = vsub.f32 %v3818_v60, %v3834_v41  ;;  %v3847_v55 = vsel %vm171_vm1, %v3841_v49, 0.0  ;;  %v6246_v44 = vadd.f32 %v6873_v56, %v6238_v26  ;;  %v6233_v42 = vmul.f32 %v7893_v47, %v8769_v50 }
0x1d3c   :  { %3848 = vadd.xlane.f32.xlu1 %v3847_v55  ;;  %v3831_v46 = vpop.xlane.xlu1 %3830  ;;  %v6232_v52 = vmul.f32 %v7895_v12, %v8774_v32 }
0x1d3d   :  { %v3835_v2 = vmul.f32 0.125, %v3831_v46  ;;  %7540 = vmatprep.mubr.msk.f32.mxu1 %vm171_vm1, %v6246_v44  ;;  %v3842_v30 = vmul.f32 %v8813_v57, %v8813_v57  ;;  %v6241_v25 = vmul.f32 %v6872_v10, %v6233_v42 }
0x1d3e   :  { %7541 = vmatmul.mubr.msk.f32.vlgmr.msra.gmra.mrb[78].mxu1 %vm171_vm1, %v6247_v54  ;;  %v6240_v53 = vmul.f32 %v6872_v10, %v6232_v52 }
0x1d3f   :  { %v8822_v21 = vsub.f32 %v3819_v36, %v3835_v2  ;;  %v3850_v31 = vsel %vm171_vm1, %v3842_v30, 0.0  ;;  %v6249_v22 = vadd.f32 %v6873_v56, %v6241_v25  ;;  %7547 = vmatpush3.msra.mxu1 %v6871_v28  ;;  %v6532_v25 = vld [vmem:[%s8927_s1 + $0x20] sm:$0xff] }
0x1d40   :  { %3851 = vadd.xlane.f32.xlu1 %v3850_v31  ;;  %v6248_v50 = vadd.f32 %v6873_v56, %v6240_v53  ;;  %7554 = vmatprep.subr.mxu0 %v6532_v25 }
0x1d41   :  { %v3843_v32 = vmul.f32 %v8822_v21, %v8822_v21  ;;  %7555 = vmatpush3.msra.mxu0 %v6532_v25 }
0x1d42   :  { %7543 = vmatprep.mubr.msk.f32.mxu1 %vm171_vm1, %v6248_v50 }
0x1d43   :  { %7544 = vmatmul.mubr.msk.f32.gmra.mrb[80].mxu1 %vm171_vm1, %v6249_v22  ;;  %v3853_v27 = vsel %vm171_vm1, %v3843_v32, 0.0 }
0x1d44   :  { %3854 = vadd.xlane.f32.xlu1 %v3853_v27 }
0x1dc5   :  { %v3846_v53 = vpop.xlane.xlu1 %3845 }
0x1dc6   :  { %v3856_v50 = vmul.f32 0.125, %v3846_v53 }
0x1dc8   :  { %v3860_v27 = vadd.f32 1e-06, %v3856_v50 }
0x1dc9   :  { %v3849_v31 = vpop.xlane.xlu1 %3848 }
0x1dca   :  { %v3857_v22 = vmul.f32 0.125, %v3849_v31  ;;  %7896 = vrsqrt.f32 %v3860_v27  ;;  %v6534_v27 = vld [vmem:[%s8929_s3 + $0x6] sm:$0x1] }
0x1dcc   :  { %v3861_v28 = vadd.f32 1e-06, %v3857_v22  ;;  %v6537_v22 = vld [vmem:[%s8929_s3 + $0x9] sm:$0x1] }
0x1dcd   :  { %v3852_v32 = vpop.xlane.xlu1 %3851 }
0x1dce   :  { %7898 = vrsqrt.f32 %v3861_v28 }
0x1e11   :  { %v7542_v60 = vpop.f32.mrb[78].mxu1 }
0x1e12   :  { %v6338_v58 = vadd.f32 %v7542_v60, %v6874_v33  ;;  %v6332_v36 = vpop.f32.mrb[79].mxu1  ;;  %v3855_v60 = vpop.xlane.xlu1 %3854 }
0x1e13   :  { %v6333_v20 = vadd.f32 %v6874_v33, %v6332_v36 }
0x1e14   :  { %v6352_v29 = vmax.f32 %v6338_v58, 0.0 }
0x1e15   :  { %v6351_v62 = vmax.f32 %v6333_v20, 0.0 }
0x1e16   :  { %v7545_v23 = vpop.f32.mrb[80].mxu1 }
0x1e17   :  { %v6348_v24 = vadd.f32 %v7545_v23, %v6874_v33  ;;  %v6342_v48 = vpop.f32.mrb[81].mxu1  ;;  %7548 = vmatprep.mubr.msk.f32.mxu1 %vm171_vm1, %v6351_v62  ;;  %v3859_v62 = vmul.f32 0.125, %v3855_v60  ;;  %v6891_v60 = vld [vmem:[%s8929_s3 + $0x8] ss:$0 sm:$0xff] }
0x1e18   :  { %v6343_v63 = vadd.f32 %v6874_v33, %v6342_v48  ;;  %7549 = vmatmul.mubr.msk.f32.vlgmr.msra.gmra.mrb[82].mxu1 %vm171_vm1, %v6352_v29  ;;  %v3858_v33 = vmul.f32 0.125, %v3852_v32  ;;  %v6647_v32 = vadd.f32 1e-05, %v6537_v22 }
0x1e19   :  { %v6354_v0 = vmax.f32 %v6348_v24, 0.0  ;;  %v3863_v48 = vadd.f32 1e-06, %v3859_v62 }
0x1e1a   :  { %v6353_v14 = vmax.f32 %v6343_v63, 0.0  ;;  %v3862_v20 = vadd.f32 1e-06, %v3858_v33  ;;  %v6886_v33 = vld [vmem:[%s8929_s3 + $0x5] ss:$0 sm:$0xff] }
0x1e1c   :  { %7551 = vmatprep.mubr.msk.f32.mxu1 %vm171_vm1, %v6353_v14 }
0x1e1d   :  { %7552 = vmatmul.mubr.msk.f32.gmra.mrb[84].mxu1 %vm171_vm1, %v6354_v0  ;;  %v7897_v0 = vpop.eup %7896 }
0x1eeb   :  { %v7550_v1 = vpop.f32.mrb[82].mxu1 }
0x1eec   :  { %v6443_v39 = vadd.f32 %v7550_v1, %v6879_v59  ;;  %v6437_v3 = vpop.f32.mrb[83].mxu1 }
0x1eed   :  { %v6438_v4 = vadd.f32 %v6879_v59, %v6437_v3  ;;  %v3868_v3 = vmul.f32 %v7897_v0, %v8796_v8  ;;  %v6784_v8 = vld [vmem:[%s8929_s3 + $0xf] ss:$0 sm:$0xff] }
0x1eee   :  { %v6457_v5 = vadd.f32 %v6443_v39, %v8735_v38  ;;  %v7899_v39 = vpop.eup %7898 }
0x1eef   :  { %v6456_v6 = vadd.f32 %v6438_v4, %v8738_v16 }
0x1ef0   :  { %v7553_v7 = vpop.f32.mrb[84].mxu1  ;;  %v6463_v43 = vsel %vm171_vm1, %v6457_v5, 0.0 }
0x1ef1   :  { %6464 = vadd.xlane.f32.xlu0 %v6463_v43  ;;  %v6447_v45 = vpop.f32.mrb[85].mxu1  ;;  %v6453_v17 = vadd.f32 %v7553_v7, %v6879_v59  ;;  %v6460_v19 = vsel %vm171_vm1, %v6456_v6, 0.0  ;;  %v3869_v43 = vmul.f32 %v7899_v39, %v8804_v35 }
0x1ef2   :  { %v6448_v15 = vadd.f32 %v6879_v59, %v6447_v45  ;;  %v6884_v45 = vld [vmem:[%s8929_s3 + $0x16] ss:$0 sm:$0xff] }
0x1ef3   :  { %v6459_v11 = vadd.f32 %v6453_v17, %v8745_v34 }
0x1ef4   :  { %v6458_v10 = vadd.f32 %v6448_v15, %v8748_v37 }
0x1ef5   :  { %6461 = vadd.xlane.f32.xlu0 %v6460_v19  ;;  %v6469_v38 = vsel %vm171_vm1, %v6459_v11, 0.0 }
0x1ef6   :  { %v6466_v40 = vsel %vm171_vm1, %v6458_v10, 0.0 }
0x1ef9   :  { %6467 = vadd.xlane.f32.xlu0 %v6466_v40 }
0x1efd   :  { %6470 = vadd.xlane.f32.xlu0 %v6469_v38 }
0x1f7e   :  { %v6465_v16 = vpop.xlane.xlu0 %6464 }
0x1f7f   :  { %v6473_v51 = vmul.f32 0.125, %v6465_v16 }
0x1f81   :  { %v8851_v61 = vsub.f32 %v6457_v5, %v6473_v51  ;;  %v6783_v5 = vld [vmem:[%s8929_s3 + $0xe] ss:$0 sm:$0xff] }
0x1f82   :  { %v6462_v9 = vpop.xlane.xlu0 %6461  ;;  %v3877_v35 = vmul.f32 %v6783_v5, %v3869_v43 }
0x1f83   :  { %v6472_v56 = vmul.f32 0.125, %v6462_v9  ;;  %v6481_v12 = vmul.f32 %v8851_v61, %v8851_v61 }
0x1f85   :  { %v6476_v41 = vsub.f32 %v6456_v6, %v6472_v56  ;;  %v6487_v46 = vsel %vm171_vm1, %v6481_v12, 0.0 }
0x1f86   :  { %v6468_v49 = vpop.xlane.xlu0 %6467 }
0x1f87   :  { %v6474_v37 = vmul.f32 0.125, %v6468_v49  ;;  %v6480_v26 = vmul.f32 %v6476_v41, %v6476_v41 }
0x1f89   :  { %v8853_v47 = vsub.f32 %v6458_v10, %v6474_v37  ;;  %v6484_v34 = vsel %vm171_vm1, %v6480_v26, 0.0  ;;  %v3876_v10 = vmul.f32 %v6783_v5, %v3868_v3 }
0x1f8a   :  { %6485 = vadd.xlane.f32.xlu0 %v6484_v34  ;;  %v6471_v55 = vpop.xlane.xlu0 %6470  ;;  %v3885_v34 = vadd.f32 %v6784_v8, %v3877_v35 }
0x1f8b   :  { %v6475_v44 = vmul.f32 0.125, %v6471_v55  ;;  %v6482_v54 = vmul.f32 %v8853_v47, %v8853_v47  ;;  %v3884_v9 = vadd.f32 %v6784_v8, %v3876_v10 }
0x1f8d   :  { %v8858_v42 = vsub.f32 %v6459_v11, %v6475_v44  ;;  %v6490_v52 = vsel %vm171_vm1, %v6482_v54, 0.0  ;;  %v6885_v11 = vld [vmem:[%s8929_s3 + $0x17] ss:$0 sm:$0xff] }
0x1f8e   :  { %6488 = vadd.xlane.f32.xlu0 %v6487_v46 }
0x1f8f   :  { %v6483_v2 = vmul.f32 %v8858_v42, %v8858_v42 }
0x1f91   :  { %v6493_v30 = vsel %vm171_vm1, %v6483_v2, 0.0 }
0x1f92   :  { %6491 = vadd.xlane.f32.xlu0 %v6490_v52 }
0x1f96   :  { %6494 = vadd.xlane.f32.xlu0 %v6493_v30 }
0x2017   :  { %v6486_v58 = vpop.xlane.xlu0 %6485 }
0x2018   :  { %v6496_v36 = vmul.f32 0.125, %v6486_v58 }
0x201a   :  { %v6500_v29 = vadd.f32 1e-06, %v6496_v36 }
0x201b   :  { %v6489_v23 = vpop.xlane.xlu0 %6488 }
0x201c   :  { %7900 = vrsqrt.f32 %v6500_v29  ;;  %v6497_v24 = vmul.f32 0.125, %v6489_v23 }
0x201d   :  { %7902 = vrsqrt.f32 %v3862_v20 }
0x201e   :  { %v6501_v63 = vadd.f32 1e-06, %v6497_v24  ;;  %v6892_v24 = vld [vmem:[%s8929_s3 + $0x7] ss:$0 sm:$0xff]  ;;  %s7914_s3 = scalar_lea.vmem %s6676_s15, 512 }
0x201f   :  { %v6492_v14 = vpop.xlane.xlu0 %6491  ;;  %p7915_p0 = scmp.ne.s32.totalorder %s6676_s15, %s7914_s3  ;;  %p7920_p2 = scmp.lt.s32.totalorder %s7914_s3, %s7914_s3 }
0x2020   :  { %7904 = vrsqrt.f32 %v6501_v63  ;;  %v6498_v59 = vmul.f32 0.125, %v6492_v14 }
0x2021   :  { %7906 = vrsqrt.f32 %v3863_v48  ;;  %p7921_p3 = por %p7920_p2, %p7919_p1 }
0x2022   :  { %v6502_v1 = vadd.f32 1e-06, %v6498_v59 }
0x2023   :  { %v6495_v4 = vpop.xlane.xlu0 %6494  ;;  %p7922_p4 = pnand %p7921_p3, %p7915_p0 }
0x2024   :  { %7908 = vrsqrt.f32 %v6502_v1  ;;  %v6499_v6 = vmul.f32 0.125, %v6495_v4 }
0x2026   :  { %v7901_v7 = vpop.eup %7900  ;;  %v6503_v15 = vadd.f32 1e-06, %v6499_v6 }
0x2027   :  { %v6508_v17 = vmul.f32 %v7901_v7, %v6476_v41  ;;  %v7903_v19 = vpop.eup %7902 }
0x2028   :  { %7910 = vrsqrt.f32 %v6503_v15  ;;  %v3870_v16 = vmul.f32 %v7903_v19, %v8813_v57 }
0x2029   :  { %v6516_v40 = vmul.f32 %v6884_v45, %v6508_v17  ;;  %7912 = vrsqrt.f32 %v6647_v32 }
0x202a   :  { %v7905_v38 = vpop.eup %7904  ;;  %v3878_v46 = vmul.f32 %v6783_v5, %v3870_v16 }
0x202b   :  { %v6509_v51 = vmul.f32 %v7905_v38, %v8851_v61  ;;  %v6524_v56 = vadd.f32 %v6885_v11, %v6516_v40  ;;  %v7907_v41 = vpop.eup %7906 }
0x202c   :  { %v3871_v12 = vmul.f32 %v7907_v41, %v8822_v21  ;;  %v3886_v2 = vadd.f32 %v6784_v8, %v3878_v46 }
0x202d   :  { %v6517_v49 = vmul.f32 %v6884_v45, %v6509_v51  ;;  %v6528_v37 = vadd.f32 %v6524_v56, %v3884_v9 }
0x202e   :  { %v7909_v26 = vpop.eup %7908  ;;  %v3879_v25 = vmul.f32 %v6783_v5, %v3871_v12 }
0x202f   :  { %v6510_v55 = vmul.f32 %v7909_v26, %v8853_v47  ;;  %v6525_v44 = vadd.f32 %v6885_v11, %v6517_v49  ;;  %7556 = vmatprep.mubr.msk.f32.mxu0 %vm171_vm1, %v6528_v37 }
0x2030   :  { %v3887_v21 = vadd.f32 %v6784_v8, %v3879_v25 }
0x2031   :  { %v6529_v54 = vadd.f32 %v6525_v44, %v3885_v34  ;;  %v6518_v52 = vmul.f32 %v6884_v45, %v6510_v55 }
0x2032   :  { %v7911_v57 = vpop.eup %7910 }
0x2033   :  { %v6511_v61 = vmul.f32 %v7911_v57, %v8858_v42  ;;  %7557 = vmatmul.mubr.msk.f32.vlgmr.msra.gmra.mrb[62].mxu0 %vm171_vm1, %v6529_v54  ;;  %v6526_v30 = vadd.f32 %v6885_v11, %v6518_v52  ;;  %v7913_v42 = vpop.eup %7912 }
0x2034   :  { %v6649_v28 = vmul.f32 %v7913_v42, %v6534_v27 }
0x2035   :  { %v6530_v53 = vadd.f32 %v6526_v30, %v3886_v2  ;;  %v6519_v31 = vmul.f32 %v6884_v45, %v6511_v61 }
0x2036   :  { %v6653_v20 = vrot.slane %v6649_v28, %v146_v18 }
0x2037   :  { %7559 = vmatprep.mubr.msk.f32.mxu0 %vm171_vm1, %v6530_v53  ;;  %v6527_v47 = vadd.f32 %v6885_v11, %v6519_v31 }
0x2039   :  { %v6531_v50 = vadd.f32 %v6527_v47, %v3887_v21 }
0x203b   :  { %7560 = vmatmul.mubr.msk.f32.gmra.mrb[64].mxu0 %vm171_vm1, %v6531_v50 }
0x2106   :  { %v7558_v58 = vpop.f32.mrb[62].mxu0 }
0x2107   :  { %v6626_v36 = vadd.f32 %v7558_v58, %v6886_v33  ;;  %v6620_v62 = vpop.f32.mrb[63].mxu0 }
0x2108   :  { %v6621_v29 = vadd.f32 %v6886_v33, %v6620_v62 }
0x2109   :  { %v6644_v23 = vsub.f32 %v6626_v36, %v6891_v60 }
0x210a   :  { %v6643_v48 = vsub.f32 %v6621_v29, %v6891_v60 }
0x210b   :  { %v6655_v63 = vmul.f32 %v6653_v20, %v6644_v23 }
0x210c   :  { %v6654_v14 = vmul.f32 %v6653_v20, %v6643_v48 }
0x210d   :  { %v6663_v0 = vadd.f32 %v6892_v24, %v6655_v63 }
0x210e   :  { %v6662_v59 = vadd.f32 %v6892_v24, %v6654_v14  ;;  %v7561_v1 = vpop.f32.mrb[64].mxu0 }
0x210f   :  { %6667 = vst.msk [vmem:[#allocation2 + $0x8] sm:$0xff] %vm35_vm0, %v6663_v0  ;;  %v6636_v39 = vadd.f32 %v7561_v1, %v6886_v33  ;;  %v6630_v3 = vpop.f32.mrb[65].mxu0 }
0x2110   :  { %6666 = vst.msk [vmem:[#allocation2] sm:$0xff] %vm35_vm0, %v6662_v59  ;;  %v6631_v13 = vadd.f32 %v6886_v33, %v6630_v3 }
0x2111   :  { %v6646_v18 = vsub.f32 %v6636_v39, %v6891_v60 }
0x2112   :  { %v6645_v4 = vsub.f32 %v6631_v13, %v6891_v60 }
0x2113   :  { %v6657_v5 = vmul.f32 %v6653_v20, %v6646_v18 }
0x2114   :  { %v6656_v6 = vmul.f32 %v6653_v20, %v6645_v4 }
0x2115   :  { %v6665_v7 = vadd.f32 %v6892_v24, %v6657_v5 }
0x2116   :  { %v6664_v43 = vadd.f32 %v6892_v24, %v6656_v6 }
0x2117   :  { %6669 = vst.msk [vmem:[#allocation2 + $0x18] sm:$0xff] %vm35_vm0, %v6665_v7 }
0x2118   :  { %6668 = vst.msk [vmem:[#allocation2 + $0x10] sm:$0xff] %vm35_vm0, %v6664_v43 }
0x2119   :  { %7925 = shalt.err (!%p7922_p4)
}
0x211a   :  { %s7926_s18 = scalar_lea.hbm %s8930_s4, 512 }
0x211b   :  { %p7927_p5 = scmp.ne.s32.totalorder %s8930_s4, %s7926_s18  ;;  %p7930_p6 = scmp.lt.u32.totalorder %s7926_s18, %s8930_s4 }
0x211d   :  { %p7932_p7 = pnand %p7930_p6, %p7927_p5 }
0x211f   :  { %7935 = shalt.err (!%p7932_p7)
}
0x2120   :  { %s7944_s22 = smov 128   ;;  %s7945_s23 = smov 8  }
0x2121   :  { %6681 = dma.vmem_to_hbm [thread:$0]  %s6676_s15, 512, %s8930_s4, [#allocation3], %s7944_s22, %s7944_s22, %s7945_s23  }
0x2122   :  { %7936 = dma.done.wait [#allocation3], 512  }
0x2123   :  { %7937 = vsyncadd [#allocation3], 4294966784 }
0x2124   :  { %6685 = vsyncpa [#allocation3], 1 }

</bundles_post_ra>
